<compile_context>
chip_gen: v7x
topology: tpu7x:2x2x1
jax: 0.10.0
libtpu: 0.0.40
codegen_flags: <defaults>
</compile_context>

<pallas_src>
import math
import numpy as np
import jax
import jax.numpy as jnp
from jax.experimental import pallas as pl
from jax.experimental.pallas import tpu as pltpu

H = 32            # config.model.hidden_dim
ANNEAL_POWER = 2.0
NUM_BOND_TYPES = 4
ORDER = 3
NUM_NOISE_LEVEL = 10
SIGMA_BEGIN, SIGMA_END = 10.0, 0.01


def _round_up(x, m):
    return ((x + m - 1) // m) * m


# ----------------------------------------------------------------------------
# Pallas kernel: per-edge feature pipeline, edges on the lane axis.
#   eemb_ref : (H, te)  f32   edge-type embedding (transposed)
#   pos_ref  : (8, te)  f32   rows = pix,piy,piz,pjx,pjy,pjz,pad,pad
#   cols_ref : (H, 8)   f32   packed small params (see _prep_edge_params)
#   w_in_ref : (H, 2H)  bf16  input_mlp weight, transposed
#   w_cp_ref : (H, 8H)  bf16  coff_mlp folded into project-L1, transposed
#   w_p2_ref : (H, H)   bf16  project-L2 weight, transposed
#   out_ref  : (H, te)  f32   edge_attr + edge_embed (transposed)
# ----------------------------------------------------------------------------
def edge_feature_kernel(eemb_ref, pos_ref, cols_ref,
                        w_in_ref, w_cp_ref, w_p2_ref, out_ref):
    f32, bf16 = jnp.float32, jnp.bfloat16

    cols = cols_ref[...]                       # (H, 8) small parameter columns
    wdist_c = cols[:, 0:1]                     # W_dist * 2*pi
    wcf_c = cols[:, 1:2]                       # W_coff_fourier * 2*pi
    b_in_c = cols[:, 2:3]                      # input_mlp bias
    b_p1_c = cols[:, 3:4]                      # project-L1 bias (+ folded b_coff)
    b_p2_c = cols[:, 4:5]                      # project-L2 bias
    wp1s_c = cols[:, 5:6]                      # project-L1 column for psin
    wp1c_c = cols[:, 6:7]                      # project-L1 column for pcos

    pix = pos_ref[0:1, :]
    piy = pos_ref[1:2, :]
    piz = pos_ref[2:3, :]
    pjx = pos_ref[3:4, :]
    pjy = pos_ref[4:5, :]
    pjz = pos_ref[5:6, :]

    # --- geometry: all (1, te) lane-dense rows -------------------------------
    dx, dy, dz = pix - pjx, piy - pjy, piz - pjz
    d = jnp.sqrt(dx * dx + dy * dy + dz * dz)                 # edge distance

    # --- dist Gaussian-Fourier + input_mlp (single Linear) -------------------
    darg = wdist_c * d                                        # (H, te) f32 phases
    dist_feat = jnp.concatenate([jnp.sin(darg), jnp.cos(darg)], axis=0)   # (2H, te)
    d_emb = jnp.dot(w_in_ref[...], dist_feat.astype(bf16),
                    preferred_element_type=f32) + b_in_c                  # (H, te)
    edge_attr = d_emb * eemb_ref[...]

    # --- coord2basis ----------------------------------------------------------
    cx = piy * pjz - piz * pjy
    cy = piz * pjx - pix * pjz
    cz = pix * pjy - piy * pjx
    inv_d1 = 1.0 / (d + 1.0)
    ddx, ddy, ddz = dx * inv_d1, dy * inv_d1, dz * inv_d1
    inv_cn = 1.0 / (jnp.sqrt(cx * cx + cy * cy + cz * cz) + 1.0)
    ccx, ccy, ccz = cx * inv_cn, cy * inv_cn, cz * inv_cn
    vx = ddy * ccz - ddz * ccy
    vy = ddz * ccx - ddx * ccz
    vz = ddx * ccy - ddy * ccx

    i0 = ddx * pix + ddy * piy + ddz * piz
    i1 = ccx * pix + ccy * piy + ccz * piz
    i2 = vx * pix + vy * piy + vz * piz
    j0 = ddx * pjx + ddy * pjy + ddz * pjz
    j1 = ccx * pjx + ccy * pjy + ccz * pjz
    j2 = vx * pjx + vy * pjy + vz * pjz

    mul_sum = i0 * j0 + i1 * j1 + i2 * j2
    ni = jnp.sqrt(i0 * i0 + i1 * i1 + i2 * i2)
    nj = jnp.sqrt(j0 * j0 + j1 * j1 + j2 * j2)
    pcos = mul_sum / (ni + 1e-5) / (nj + 1e-5)
    pcos = jnp.minimum(jnp.maximum(pcos, -1.0), 1.0)          # NaN guard
    psin = jnp.sqrt(jnp.maximum(1.0 - pcos * pcos, 0.0))

    # --- coff Gaussian-Fourier: feature-major (4H, te) arg slab --------------
    coff_arg = jnp.concatenate(
        [wcf_c * i0, wcf_c * i2, wcf_c * j0, wcf_c * j2], axis=0)          # (4H, te)
    coff_feat = jnp.concatenate(
        [jnp.sin(coff_arg), jnp.cos(coff_arg)], axis=0)                    # (8H, te)

    # --- coff_mlp + project layer 1 (folded host-side), relu, layer 2 --------
    h1 = (jnp.dot(w_cp_ref[...], coff_feat.astype(bf16),
                  preferred_element_type=f32)
          + wp1s_c * psin + wp1c_c * pcos + b_p1_c)                        # (H, te)
    h1 = jnp.maximum(h1, 0.0)                                              # mlp_act
    h2 = jnp.dot(w_p2_ref[...], h1.astype(bf16),
                 preferred_element_type=f32) + b_p2_c                      # (H, te)

    out_ref[...] = edge_attr + h2


# ----------------------------------------------------------------------------
# Host-side parameter packaging (fold coff_mlp into project layer 1, transpose
# all weights so they sit on the matmul LHS, pack the small vectors).
# ----------------------------------------------------------------------------
def _prep_edge_params(params):
    h = H
    two_pi = 2.0 * math.pi

    # coff_mlp weight rows follow torch cat order [sin(i0W), cos(i0W), sin(i2W), cos(i2W)]
    w_coff = params['w_coff']                                  # (4H, H)
    B_s0, B_c0 = w_coff[:h], w_coff[h:2 * h]
    B_s2, B_c2 = w_coff[2 * h:3 * h], w_coff[3 * h:]

    w_p1 = params['w_p1']                                      # (2H+2, H)
    wp1_sin, wp1_cos = w_p1[0], w_p1[1]
    wp1_i, wp1_j = w_p1[2:2 + h], w_p1[2 + h:]

    # Fold coff_mlp into project layer 1 (both linear, no activation between).
    # Row blocks must match the kernel's coff_feat layout:
    #   [sin(i0W), sin(i2W), sin(j0W), sin(j2W), cos(i0W), cos(i2W), cos(j0W), cos(j2W)]
    w_cp = jnp.concatenate(
        [B_s0 @ wp1_i, B_s2 @ wp1_i, B_s0 @ wp1_j, B_s2 @ wp1_j,
         B_c0 @ wp1_i, B_c2 @ wp1_i, B_c0 @ wp1_j, B_c2 @ wp1_j], axis=0)  # (8H, H)
    b_p1_eff = (params['b_p1']
                + params['b_coff'] @ wp1_i + params['b_coff'] @ wp1_j)     # (1, H)

    cols = jnp.zeros((h, 8), jnp.float32)
    cols = cols.at[:, 0].set(params['w_dist'][0] * two_pi)
    cols = cols.at[:, 1].set(params['w_coff_f'][0] * two_pi)
    cols = cols.at[:, 2].set(params['b_in'][0])
    cols = cols.at[:, 3].set(b_p1_eff[0])
    cols = cols.at[:, 4].set(params['b_p2'][0])
    cols = cols.at[:, 5].set(wp1_sin)
    cols = cols.at[:, 6].set(wp1_cos)

    return (cols,
            params['w_in'].T.astype(jnp.bfloat16),     # (H, 2H)
            w_cp.T.astype(jnp.bfloat16),                # (H, 8H)
            params['w_p2'].T.astype(jnp.bfloat16))      # (H, H)


def edge_features_T(eemb_T, ri_T, rj_T, params, *, block_edges=1024):
    """Per-edge feature pipeline; inputs/outputs have edges on the last axis.

    eemb_T: (H, E) f32, ri_T/rj_T: (3, E) f32.  Returns (H, E) f32.
    """
    h = H
    E = eemb_T.shape[1]

    # Edge tile: multiple of 128 lanes; force >= 2 grid steps so both v7x
    # TensorCores get work; cap at block_edges for vreg pressure.
    half_e = _round_up(max((E + 1) // 2, 1), 128)
    te = min(block_edges, half_e)
    te = max(128, (te // 128) * 128)
    e_pad = max(_round_up(max(E, 1), te), 2 * te)
    pad = e_pad - E

    eemb_p = jnp.pad(eemb_T, ((0, 0), (0, pad)))
    pos = jnp.concatenate(
        [ri_T, rj_T, jnp.zeros((2, E), jnp.float32)], axis=0)   # (8, E)
    pos_p = jnp.pad(pos, ((0, 0), (0, pad)))

    cols, w_in_T, w_cp_T, w_p2_T = _prep_edge_params(params)

    const = lambda i: (0, 0)
    tile = lambda i: (0, i)
    out = pl.pallas_call(
        edge_feature_kernel,
        out_shape=jax.ShapeDtypeStruct((h, e_pad), jnp.float32),
        grid=(e_pad // te,),
        in_specs=[
            pl.BlockSpec((h, te), tile),          # edge embedding (transposed)
            pl.BlockSpec((8, te), tile),          # positions slab
            pl.BlockSpec((h, 8), const),          # packed small params
            pl.BlockSpec((h, 2 * h), const),      # input_mlp weight^T
            pl.BlockSpec((h, 8 * h), const),      # folded coff/project-L1 weight^T
            pl.BlockSpec((h, h), const),          # project-L2 weight^T
        ],
        out_specs=pl.BlockSpec((h, te), tile),
        compiler_params=pltpu.CompilerParams(
            dimension_semantics=("parallel",),
            vmem_limit_bytes=32 * 1024 * 1024),
    )(eemb_p, pos_p, cols, w_in_T, w_cp_T, w_p2_T)
    return out[:, :E]


# ----------------------------------------------------------------------------
# Parameters (deterministic synthetic init)
# ----------------------------------------------------------------------------
def init_params(key, hidden=H):
    ks = jax.random.split(key, 12)

    def lin(k, fin, fout):
        kw, kb = jax.random.split(k)
        bound = 1.0 / math.sqrt(fin)
        w = jax.random.uniform(kw, (fin, fout), jnp.float32, -bound, bound)
        b = jax.random.uniform(kb, (1, fout), jnp.float32, -bound, bound)
        return w, b

    p = {}
    p['node_emb'] = jax.random.normal(ks[0], (100, hidden), jnp.float32)
    p['edge_emb'] = jax.random.normal(ks[1], (100, hidden), jnp.float32)
    p['w_dist'] = jax.random.normal(ks[2], (1, hidden), jnp.float32)       # dist GaussianFourier W
    p['w_in'], p['b_in'] = lin(ks[3], 2 * hidden, hidden)                  # input_mlp
    p['w_coff_f'] = jax.random.normal(ks[4], (1, hidden), jnp.float32)     # coff GaussianFourier W
    p['w_coff'], p['b_coff'] = lin(ks[5], 4 * hidden, hidden)              # coff_mlp
    p['w_p1'], p['b_p1'] = lin(ks[6], 2 * hidden + 2, hidden)              # project layer 1
    p['w_p2'], p['b_p2'] = lin(ks[7], hidden, hidden)                      # project layer 2
    # surrogate GNN (GradientGCN stand-in)
    p['w_msg'], p['b_msg'] = lin(ks[8], hidden, hidden)
    p['w_coef'], _ = lin(ks[9], hidden, 1)
    sigmas = np.exp(np.linspace(np.log(SIGMA_BEGIN), np.log(SIGMA_END),
                                NUM_NOISE_LEVEL)).astype(np.float32)
    p['sigmas'] = jnp.asarray(sigmas)
    return p


# ----------------------------------------------------------------------------
# Graph construction + extend_graph (dense numpy glue, mirrors the torch code)
# ----------------------------------------------------------------------------
def build_batch(num_graphs=2, nodes_per_graph=5, order=ORDER,
                num_bond_types=NUM_BOND_TYPES):
    N = num_graphs * nodes_per_graph
    adj = np.zeros((N, N), dtype=np.int64)
    for g in range(num_graphs):
        off = g * nodes_per_graph
        for i in range(nodes_per_graph - 1):      # chain molecule, single bonds
            adj[off + i, off + i + 1] = 1
            adj[off + i + 1, off + i] = 1
    I = np.eye(N, dtype=np.int64)
    mats = [I, ((adj + I) > 0).astype(np.int64)]
    for i in range(2, order + 1):
        mats.append(((mats[i - 1] @ mats[1]) > 0).astype(np.int64))
    order_mat = np.zeros_like(adj)
    for i in range(1, order + 1):
        order_mat += (mats[i] - mats[i - 1]) * i
    type_mat = adj * 1                            # bond type 1 (single)
    type_high = np.where(order_mat > 1, num_bond_types + order_mat - 1, 0)
    assert (type_mat * type_high == 0).all()
    type_new = type_mat + type_high
    rows, cols = np.nonzero(type_new)
    edge_type = type_new[rows, cols]
    node2graph = np.repeat(np.arange(num_graphs), nodes_per_graph)
    return (N, rows.astype(np.int32), cols.astype(np.int32),
            edge_type.astype(np.int32), node2graph.astype(np.int32))


# ----------------------------------------------------------------------------
# Forward pass (loss)
# ----------------------------------------------------------------------------
def forward(params, key, pos, atom_type, row, col, edge_type, node2graph,
            num_graphs, anneal_power=ANNEAL_POWER):
    N = pos.shape[0]
    k1, k2 = jax.random.split(key)

    noise_level = jax.random.randint(k1, (num_graphs,), 0, params['sigmas'].shape[0])
    used_sigmas = params['sigmas'][noise_level][node2graph][:, None]       # (N,1)
    coord_noise = jax.random.normal(k2, pos.shape, jnp.float32)            # noise_type == 'rand'
    pert_pos = pos + coord_noise * used_sigmas
    target = -1.0 / used_sigmas ** 2 * (pert_pos - pos)                    # (N,3)

    node_attr = jnp.take(params['node_emb'], atom_type, axis=0)            # (N,H)
    # gathers done directly in edge-on-lanes (transposed) layout
    eemb_T = params['edge_emb'].T[:, edge_type]                            # (H,E)
    pert_T = pert_pos.T                                                    # (3,N)
    ri_T = pert_T[:, row]                                                  # (3,E)
    rj_T = pert_T[:, col]                                                  # (3,E)

    # Pallas hot path: full per-edge feature pipeline (pads internally to tile)
    edge_attr = edge_features_T(eemb_T, ri_T, rj_T, params).T              # (E,H)

    # TODO(synk): layers.GradientGCN source is not provided in the reference; using a
    # minimal equivariant message-passing surrogate to produce the per-node 'gradient'.
    msg = jax.nn.relu((node_attr[row] + node_attr[col] + edge_attr)
                      @ params['w_msg'] + params['b_msg'])                 # (E,H)
    coeff = msg @ params['w_coef']                                         # (E,1)
    diff = (ri_T - rj_T).T                                                 # (E,3)
    grad = jax.ops.segment_sum(coeff * diff, row, num_segments=N)          # (N,3)

    scores = grad * (1.0 / used_sigmas)
    loss_pos = 0.5 * jnp.sum((scores - target) ** 2, axis=-1) \
        * used_sigmas[:, 0] ** anneal_power
    seg_sum = jax.ops.segment_sum(loss_pos, node2graph, num_segments=num_graphs)
    cnt = jax.ops.segment_sum(jnp.ones_like(loss_pos), node2graph,
                              num_segments=num_graphs)
    loss_pos_graph = seg_sum / cnt                                         # scatter_mean
    return {'position': jnp.mean(loss_pos_graph),
            'distance': jnp.zeros((1,), jnp.float32)}


# ----------------------------------------------------------------------------
if __name__ == "__main__":
    key = jax.random.PRNGKey(0)
    kparam, kpos, katom, knoise = jax.random.split(key, 4)

    params = init_params(kparam)
    num_graphs, nodes_per_graph = 2, 5
    N, row, col, edge_type, node2graph = build_batch(num_graphs, nodes_per_graph)

    pos = jax.random.normal(kpos, (N, 3), jnp.float32)
    atom_type = jax.random.randint(katom, (N,), 0, 100)

    out = forward(params, knoise, pos, atom_type,
                  jnp.asarray(row), jnp.asarray(col), jnp.asarray(edge_type),
                  jnp.asarray(node2graph), num_graphs)
    jax.block_until_ready(out['position'])
    assert np.isfinite(float(out['position']))
    print("KERNEL_OK")
</pallas_src>

<mosaic_0001>
module attributes {stable_mosaic.version = 11 : i64} {
  func.func @edge_feature_kernel(%arg0: i32, %arg1: memref<32x128xf32, #tpu.memory_space<vmem>>, %arg2: memref<8x128xf32, #tpu.memory_space<vmem>>, %arg3: memref<32x8xf32, #tpu.memory_space<vmem>>, %arg4: memref<32x64xbf16, #tpu.memory_space<vmem>>, %arg5: memref<32x256xbf16, #tpu.memory_space<vmem>>, %arg6: memref<32x32xbf16, #tpu.memory_space<vmem>>, %arg7: memref<32x128xf32, #tpu.memory_space<vmem>>) attributes {dimension_semantics = [#tpu.dimension_semantics<parallel>], iteration_bounds = array<i64: 2>, scalar_prefetch = 0 : i64, scratch_operands = 0 : i64, tpu.core_type = #tpu.core_type<tc>, window_params = [{transform_indices = @transform_0, window_bounds = array<i64: 32, 128>}, {transform_indices = @transform_1, window_bounds = array<i64: 8, 128>}, {pipeline_mode = #tpu.pipeline_mode<synchronous>, transform_indices = @transform_2, window_bounds = array<i64: 32, 8>}, {pipeline_mode = #tpu.pipeline_mode<synchronous>, transform_indices = @transform_3, window_bounds = array<i64: 32, 64>}, {pipeline_mode = #tpu.pipeline_mode<synchronous>, transform_indices = @transform_4, window_bounds = array<i64: 32, 256>}, {pipeline_mode = #tpu.pipeline_mode<synchronous>, transform_indices = @transform_5, window_bounds = array<i64: 32, 32>}, {transform_indices = @transform_6, window_bounds = array<i64: 32, 128>}]} {
    %c0 = arith.constant 0 : index
    %c0_0 = arith.constant 0 : index
    %0 = vector.load %arg3[%c0, %c0_0] : memref<32x8xf32, #tpu.memory_space<vmem>>, vector<32x8xf32>
    %1 = vector.extract_strided_slice %0 {offsets = [0, 0], sizes = [32, 1], strides = [1, 1]} : vector<32x8xf32> to vector<32x1xf32>
    %2 = vector.extract_strided_slice %0 {offsets = [0, 1], sizes = [32, 1], strides = [1, 1]} : vector<32x8xf32> to vector<32x1xf32>
    %3 = vector.extract_strided_slice %0 {offsets = [0, 2], sizes = [32, 1], strides = [1, 1]} : vector<32x8xf32> to vector<32x1xf32>
    %4 = vector.extract_strided_slice %0 {offsets = [0, 3], sizes = [32, 1], strides = [1, 1]} : vector<32x8xf32> to vector<32x1xf32>
    %5 = vector.extract_strided_slice %0 {offsets = [0, 4], sizes = [32, 1], strides = [1, 1]} : vector<32x8xf32> to vector<32x1xf32>
    %6 = vector.extract_strided_slice %0 {offsets = [0, 5], sizes = [32, 1], strides = [1, 1]} : vector<32x8xf32> to vector<32x1xf32>
    %7 = vector.extract_strided_slice %0 {offsets = [0, 6], sizes = [32, 1], strides = [1, 1]} : vector<32x8xf32> to vector<32x1xf32>
    %c0_1 = arith.constant 0 : index
    %c0_2 = arith.constant 0 : index
    %8 = vector.load %arg2[%c0_1, %c0_2] : memref<8x128xf32, #tpu.memory_space<vmem>>, vector<1x128xf32>
    %c1 = arith.constant 1 : index
    %c0_3 = arith.constant 0 : index
    %9 = vector.load %arg2[%c1, %c0_3] : memref<8x128xf32, #tpu.memory_space<vmem>>, vector<1x128xf32>
    %c2 = arith.constant 2 : index
    %c0_4 = arith.constant 0 : index
    %10 = vector.load %arg2[%c2, %c0_4] : memref<8x128xf32, #tpu.memory_space<vmem>>, vector<1x128xf32>
    %c3 = arith.constant 3 : index
    %c0_5 = arith.constant 0 : index
    %11 = vector.load %arg2[%c3, %c0_5] : memref<8x128xf32, #tpu.memory_space<vmem>>, vector<1x128xf32>
    %c4 = arith.constant 4 : index
    %c0_6 = arith.constant 0 : index
    %12 = vector.load %arg2[%c4, %c0_6] : memref<8x128xf32, #tpu.memory_space<vmem>>, vector<1x128xf32>
    %c5 = arith.constant 5 : index
    %c0_7 = arith.constant 0 : index
    %13 = vector.load %arg2[%c5, %c0_7] : memref<8x128xf32, #tpu.memory_space<vmem>>, vector<1x128xf32>
    %14 = arith.subf %8, %11 : vector<1x128xf32>
    %15 = arith.subf %9, %12 : vector<1x128xf32>
    %16 = arith.subf %10, %13 : vector<1x128xf32>
    %17 = arith.mulf %14, %14 : vector<1x128xf32>
    %18 = arith.mulf %15, %15 : vector<1x128xf32>
    %19 = arith.addf %17, %18 : vector<1x128xf32>
    %20 = arith.mulf %16, %16 : vector<1x128xf32>
    %21 = arith.addf %19, %20 : vector<1x128xf32>
    %22 = math.sqrt %21 : vector<1x128xf32>
    %23 = vector.broadcast %1 : vector<32x1xf32> to vector<32x128xf32>
    %24 = vector.broadcast %22 : vector<1x128xf32> to vector<32x128xf32>
    %25 = arith.mulf %23, %24 : vector<32x128xf32>
    %26 = math.sin %25 : vector<32x128xf32>
    %27 = math.cos %25 : vector<32x128xf32>
    %28 = tpu.concatenate %26, %27 in 0 : vector<32x128xf32>, vector<32x128xf32> -> vector<64x128xf32>
    %c0_8 = arith.constant 0 : index
    %c0_9 = arith.constant 0 : index
    %29 = vector.load %arg4[%c0_8, %c0_9] : memref<32x64xbf16, #tpu.memory_space<vmem>>, vector<32x64xbf16>
    %30 = arith.truncf %28 : vector<64x128xf32> to vector<64x128xbf16>
    %cst = arith.constant dense<0.000000e+00> : vector<32x128xf32>
    %31 = tpu.matmul %29, %30, %cst {dimension_numbers = #tpu.dot_dimension_numbers<[1], [0], [0], [1], [0, 0, 1, 1], [], []>} : vector<32x64xbf16>, vector<64x128xbf16>, vector<32x128xf32> -> vector<32x128xf32>
    %32 = vector.broadcast %3 : vector<32x1xf32> to vector<32x128xf32>
    %33 = arith.addf %31, %32 : vector<32x128xf32>
    %c0_10 = arith.constant 0 : index
    %c0_11 = arith.constant 0 : index
    %34 = vector.load %arg1[%c0_10, %c0_11] : memref<32x128xf32, #tpu.memory_space<vmem>>, vector<32x128xf32>
    %35 = arith.mulf %33, %34 : vector<32x128xf32>
    %36 = arith.mulf %9, %13 : vector<1x128xf32>
    %37 = arith.mulf %10, %12 : vector<1x128xf32>
    %38 = arith.subf %36, %37 : vector<1x128xf32>
    %39 = arith.mulf %10, %11 : vector<1x128xf32>
    %40 = arith.mulf %8, %13 : vector<1x128xf32>
    %41 = arith.subf %39, %40 : vector<1x128xf32>
    %42 = arith.mulf %8, %12 : vector<1x128xf32>
    %43 = arith.mulf %9, %11 : vector<1x128xf32>
    %44 = arith.subf %42, %43 : vector<1x128xf32>
    %cst_12 = arith.constant 1.000000e+00 : f32
    %45 = vector.broadcast %cst_12 : f32 to vector<1x128xf32>
    %46 = arith.addf %22, %45 : vector<1x128xf32>
    %cst_13 = arith.constant 1.000000e+00 : f32
    %47 = vector.broadcast %cst_13 : f32 to vector<1x128xf32>
    %48 = arith.divf %47, %46 : vector<1x128xf32>
    %49 = arith.mulf %14, %48 : vector<1x128xf32>
    %50 = arith.mulf %15, %48 : vector<1x128xf32>
    %51 = arith.mulf %16, %48 : vector<1x128xf32>
    %52 = arith.mulf %38, %38 : vector<1x128xf32>
    %53 = arith.mulf %41, %41 : vector<1x128xf32>
    %54 = arith.addf %52, %53 : vector<1x128xf32>
    %55 = arith.mulf %44, %44 : vector<1x128xf32>
    %56 = arith.addf %54, %55 : vector<1x128xf32>
    %57 = math.sqrt %56 : vector<1x128xf32>
    %cst_14 = arith.constant 1.000000e+00 : f32
    %58 = vector.broadcast %cst_14 : f32 to vector<1x128xf32>
    %59 = arith.addf %57, %58 : vector<1x128xf32>
    %cst_15 = arith.constant 1.000000e+00 : f32
    %60 = vector.broadcast %cst_15 : f32 to vector<1x128xf32>
    %61 = arith.divf %60, %59 : vector<1x128xf32>
    %62 = arith.mulf %38, %61 : vector<1x128xf32>
    %63 = arith.mulf %41, %61 : vector<1x128xf32>
    %64 = arith.mulf %44, %61 : vector<1x128xf32>
    %65 = arith.mulf %50, %64 : vector<1x128xf32>
    %66 = arith.mulf %51, %63 : vector<1x128xf32>
    %67 = arith.subf %65, %66 : vector<1x128xf32>
    %68 = arith.mulf %51, %62 : vector<1x128xf32>
    %69 = arith.mulf %49, %64 : vector<1x128xf32>
    %70 = arith.subf %68, %69 : vector<1x128xf32>
    %71 = arith.mulf %49, %63 : vector<1x128xf32>
    %72 = arith.mulf %50, %62 : vector<1x128xf32>
    %73 = arith.subf %71, %72 : vector<1x128xf32>
    %74 = arith.mulf %49, %8 : vector<1x128xf32>
    %75 = arith.mulf %50, %9 : vector<1x128xf32>
    %76 = arith.addf %74, %75 : vector<1x128xf32>
    %77 = arith.mulf %51, %10 : vector<1x128xf32>
    %78 = arith.addf %76, %77 : vector<1x128xf32>
    %79 = arith.mulf %62, %8 : vector<1x128xf32>
    %80 = arith.mulf %63, %9 : vector<1x128xf32>
    %81 = arith.addf %79, %80 : vector<1x128xf32>
    %82 = arith.mulf %64, %10 : vector<1x128xf32>
    %83 = arith.addf %81, %82 : vector<1x128xf32>
    %84 = arith.mulf %67, %8 : vector<1x128xf32>
    %85 = arith.mulf %70, %9 : vector<1x128xf32>
    %86 = arith.addf %84, %85 : vector<1x128xf32>
    %87 = arith.mulf %73, %10 : vector<1x128xf32>
    %88 = arith.addf %86, %87 : vector<1x128xf32>
    %89 = arith.mulf %49, %11 : vector<1x128xf32>
    %90 = arith.mulf %50, %12 : vector<1x128xf32>
    %91 = arith.addf %89, %90 : vector<1x128xf32>
    %92 = arith.mulf %51, %13 : vector<1x128xf32>
    %93 = arith.addf %91, %92 : vector<1x128xf32>
    %94 = arith.mulf %62, %11 : vector<1x128xf32>
    %95 = arith.mulf %63, %12 : vector<1x128xf32>
    %96 = arith.addf %94, %95 : vector<1x128xf32>
    %97 = arith.mulf %64, %13 : vector<1x128xf32>
    %98 = arith.addf %96, %97 : vector<1x128xf32>
    %99 = arith.mulf %67, %11 : vector<1x128xf32>
    %100 = arith.mulf %70, %12 : vector<1x128xf32>
    %101 = arith.addf %99, %100 : vector<1x128xf32>
    %102 = arith.mulf %73, %13 : vector<1x128xf32>
    %103 = arith.addf %101, %102 : vector<1x128xf32>
    %104 = arith.mulf %78, %93 : vector<1x128xf32>
    %105 = arith.mulf %83, %98 : vector<1x128xf32>
    %106 = arith.addf %104, %105 : vector<1x128xf32>
    %107 = arith.mulf %88, %103 : vector<1x128xf32>
    %108 = arith.addf %106, %107 : vector<1x128xf32>
    %109 = arith.mulf %78, %78 : vector<1x128xf32>
    %110 = arith.mulf %83, %83 : vector<1x128xf32>
    %111 = arith.addf %109, %110 : vector<1x128xf32>
    %112 = arith.mulf %88, %88 : vector<1x128xf32>
    %113 = arith.addf %111, %112 : vector<1x128xf32>
    %114 = math.sqrt %113 : vector<1x128xf32>
    %115 = arith.mulf %93, %93 : vector<1x128xf32>
    %116 = arith.mulf %98, %98 : vector<1x128xf32>
    %117 = arith.addf %115, %116 : vector<1x128xf32>
    %118 = arith.mulf %103, %103 : vector<1x128xf32>
    %119 = arith.addf %117, %118 : vector<1x128xf32>
    %120 = math.sqrt %119 : vector<1x128xf32>
    %cst_16 = arith.constant 9.99999974E-6 : f32
    %121 = vector.broadcast %cst_16 : f32 to vector<1x128xf32>
    %122 = arith.addf %114, %121 : vector<1x128xf32>
    %123 = arith.divf %108, %122 : vector<1x128xf32>
    %cst_17 = arith.constant 9.99999974E-6 : f32
    %124 = vector.broadcast %cst_17 : f32 to vector<1x128xf32>
    %125 = arith.addf %120, %124 : vector<1x128xf32>
    %126 = arith.divf %123, %125 : vector<1x128xf32>
    %cst_18 = arith.constant -1.000000e+00 : f32
    %127 = vector.broadcast %cst_18 : f32 to vector<1x128xf32>
    %128 = arith.maximumf %126, %127 : vector<1x128xf32>
    %cst_19 = arith.constant 1.000000e+00 : f32
    %129 = vector.broadcast %cst_19 : f32 to vector<1x128xf32>
    %130 = arith.minimumf %128, %129 : vector<1x128xf32>
    %131 = arith.mulf %130, %130 : vector<1x128xf32>
    %cst_20 = arith.constant 1.000000e+00 : f32
    %132 = vector.broadcast %cst_20 : f32 to vector<1x128xf32>
    %133 = arith.subf %132, %131 : vector<1x128xf32>
    %cst_21 = arith.constant 0.000000e+00 : f32
    %134 = vector.broadcast %cst_21 : f32 to vector<1x128xf32>
    %135 = arith.maximumf %133, %134 : vector<1x128xf32>
    %136 = math.sqrt %135 : vector<1x128xf32>
    %137 = vector.broadcast %2 : vector<32x1xf32> to vector<32x128xf32>
    %138 = vector.broadcast %78 : vector<1x128xf32> to vector<32x128xf32>
    %139 = arith.mulf %137, %138 : vector<32x128xf32>
    %140 = vector.broadcast %2 : vector<32x1xf32> to vector<32x128xf32>
    %141 = vector.broadcast %88 : vector<1x128xf32> to vector<32x128xf32>
    %142 = arith.mulf %140, %141 : vector<32x128xf32>
    %143 = vector.broadcast %2 : vector<32x1xf32> to vector<32x128xf32>
    %144 = vector.broadcast %93 : vector<1x128xf32> to vector<32x128xf32>
    %145 = arith.mulf %143, %144 : vector<32x128xf32>
    %146 = vector.broadcast %2 : vector<32x1xf32> to vector<32x128xf32>
    %147 = vector.broadcast %103 : vector<1x128xf32> to vector<32x128xf32>
    %148 = arith.mulf %146, %147 : vector<32x128xf32>
    %149 = tpu.concatenate %139, %142, %145, %148 in 0 : vector<32x128xf32>, vector<32x128xf32>, vector<32x128xf32>, vector<32x128xf32> -> vector<128x128xf32>
    %150 = math.sin %149 : vector<128x128xf32>
    %151 = math.cos %149 : vector<128x128xf32>
    %152 = tpu.concatenate %150, %151 in 0 : vector<128x128xf32>, vector<128x128xf32> -> vector<256x128xf32>
    %c0_22 = arith.constant 0 : index
    %c0_23 = arith.constant 0 : index
    %153 = vector.load %arg5[%c0_22, %c0_23] : memref<32x256xbf16, #tpu.memory_space<vmem>>, vector<32x256xbf16>
    %154 = arith.truncf %152 : vector<256x128xf32> to vector<256x128xbf16>
    %cst_24 = arith.constant dense<0.000000e+00> : vector<32x128xf32>
    %155 = tpu.matmul %153, %154, %cst_24 {dimension_numbers = #tpu.dot_dimension_numbers<[1], [0], [0], [1], [0, 0, 1, 1], [], []>} : vector<32x256xbf16>, vector<256x128xbf16>, vector<32x128xf32> -> vector<32x128xf32>
    %156 = vector.broadcast %6 : vector<32x1xf32> to vector<32x128xf32>
    %157 = vector.broadcast %136 : vector<1x128xf32> to vector<32x128xf32>
    %158 = arith.mulf %156, %157 : vector<32x128xf32>
    %159 = arith.addf %155, %158 : vector<32x128xf32>
    %160 = vector.broadcast %7 : vector<32x1xf32> to vector<32x128xf32>
    %161 = vector.broadcast %130 : vector<1x128xf32> to vector<32x128xf32>
    %162 = arith.mulf %160, %161 : vector<32x128xf32>
    %163 = arith.addf %159, %162 : vector<32x128xf32>
    %164 = vector.broadcast %4 : vector<32x1xf32> to vector<32x128xf32>
    %165 = arith.addf %163, %164 : vector<32x128xf32>
    %cst_25 = arith.constant 0.000000e+00 : f32
    %166 = vector.broadcast %cst_25 : f32 to vector<32x128xf32>
    %167 = arith.maximumf %165, %166 : vector<32x128xf32>
    %c0_26 = arith.constant 0 : index
    %c0_27 = arith.constant 0 : index
    %168 = vector.load %arg6[%c0_26, %c0_27] : memref<32x32xbf16, #tpu.memory_space<vmem>>, vector<32x32xbf16>
    %169 = arith.truncf %167 : vector<32x128xf32> to vector<32x128xbf16>
    %cst_28 = arith.constant dense<0.000000e+00> : vector<32x128xf32>
    %170 = tpu.matmul %168, %169, %cst_28 {dimension_numbers = #tpu.dot_dimension_numbers<[1], [0], [0], [1], [0, 0, 1, 1], [], []>} : vector<32x32xbf16>, vector<32x128xbf16>, vector<32x128xf32> -> vector<32x128xf32>
    %171 = vector.broadcast %5 : vector<32x1xf32> to vector<32x128xf32>
    %172 = arith.addf %170, %171 : vector<32x128xf32>
    %173 = arith.addf %35, %172 : vector<32x128xf32>
    %c0_29 = arith.constant 0 : index
    %c0_30 = arith.constant 0 : index
    %174 = vector.load %arg7[%c0_29, %c0_30] : memref<32x128xf32, #tpu.memory_space<vmem>>, vector<32x128xf32>
    tpu.vector_store %arg7[%c0_29, %c0_30], %173 {strides = array<i32>} : memref<32x128xf32, #tpu.memory_space<vmem>>, vector<32x128xf32>,
    return
  }
  func.func @transform_0(%arg0: i32) -> (i32, i32) {
    %c0_i32 = arith.constant 0 : i32
    %c0_i32_0 = arith.constant 0 : i32
    return %c0_i32, %arg0 : i32, i32
  }
  func.func @transform_1(%arg0: i32) -> (i32, i32) {
    %c0_i32 = arith.constant 0 : i32
    %c0_i32_0 = arith.constant 0 : i32
    return %c0_i32, %arg0 : i32, i32
  }
  func.func @transform_2(%arg0: i32) -> (i32, i32) {
    %c0_i32 = arith.constant 0 : i32
    %c0_i32_0 = arith.constant 0 : i32
    %c0_i32_1 = arith.constant 0 : i32
    return %c0_i32, %c0_i32_0 : i32, i32
  }
  func.func @transform_3(%arg0: i32) -> (i32, i32) {
    %c0_i32 = arith.constant 0 : i32
    %c0_i32_0 = arith.constant 0 : i32
    %c0_i32_1 = arith.constant 0 : i32
    return %c0_i32, %c0_i32_0 : i32, i32
  }
  func.func @transform_4(%arg0: i32) -> (i32, i32) {
    %c0_i32 = arith.constant 0 : i32
    %c0_i32_0 = arith.constant 0 : i32
    %c0_i32_1 = arith.constant 0 : i32
    return %c0_i32, %c0_i32_0 : i32, i32
  }
  func.func @transform_5(%arg0: i32) -> (i32, i32) {
    %c0_i32 = arith.constant 0 : i32
    %c0_i32_0 = arith.constant 0 : i32
    %c0_i32_1 = arith.constant 0 : i32
    return %c0_i32, %c0_i32_0 : i32, i32
  }
  func.func @transform_6(%arg0: i32) -> (i32, i32) {
    %c0_i32 = arith.constant 0 : i32
    %c0_i32_0 = arith.constant 0 : i32
    return %c0_i32, %arg0 : i32, i32
  }
}

</mosaic_0001>

<bundles_post_ra>
// kernel: tpu_custom_call.1
= control target key start
LH: loop header
LB: loop body
LE: loop exit
PB: predicated region body
PF: predicated region fallthrough
CT: control target
= control target key end

     0   :  { %11 = vsyncpa [#allocation3], 0  ;;  %s8878_s0 = inlined_call_operand.hbm [shape: f32[32,256], index: 0, kind: input, shape index: {}]   ;;  %s8879_s1 = inlined_call_operand.vmem [shape: f32[8,256], index: 1, kind: input, shape index: {}]   ;;  %s8880_s2 = inlined_call_operand.vmem [shape: f32[32,8], index: 2, kind: input, shape index: {}]   ;;  %s8881_s3 = inlined_call_operand.hbm [shape: bf16[32,64], index: 3, kind: input, shape index: {}]   ;;  %s8882_s4 = inlined_call_operand.vmem [shape: bf16[32,256], index: 4, kind: input, shape index: {}]   ;;  %s8883_s5 = inlined_call_operand.hbm [shape: bf16[32,32], index: 5, kind: input, shape index: {}]   ;;  %s8884_s6 = inlined_call_operand.hbm [shape: f32[32,256], index: 6, kind: output, shape index: {}]  }
   0x1   :  { %13 = vsyncpa [#allocation3 + $0x1], 0 }
   0x2   :  { %14 = vsyncpa [#allocation6], 0 }
   0x3   :  { %15 = vsyncpa [#allocation4], 0 }
   0x4   :  { %17 = vsyncpa [#allocation4 + $0x1], 0  ;;  %s5920_s21 = smov 0   ;;  %s5922_s22 = smov 0  }
   0x5   :  { %s5924_s23 = smov 0   ;;  %s5926_s24 = smov 0  }
   0x6 LB: > { %s5941_s25 = sadd.s32 4294967295, %s5858_s24   ;;  %s5152_s26 = sadd.s32 4294967294, %s5858_s24   ;;  %s5858_s24 = sphi %s5926_s24, %s9214_s24   ;;  %s5854_s23 = sphi %s5924_s23, %s9213_s23   ;;  %s5850_s22 = sphi %s5922_s22, %s9212_s22   ;;  %s5846_s21 = sphi %s5920_s21, %s9211_s21  }
   0x7   : > { %s5945_s27 = sadd.s32 1, %s5858_s24   ;;  %s30_s28 = sadd.s32 1, %s5854_s23 }
   0x8   : > { %s27_s29 = ssub.s32 %s5858_s24, %s5945_s27  ;;  %p37_p0 = scmp.ne.s32.totalorder %s5854_s23, %s5850_s22 }
   0x9   : > { %p28_p1 = scmp.eq.s32.totalorder %s27_s29, 0  ;;  %p38_p2 = scmp.eq.s32.totalorder %s5858_s24, 0 }
   0xa   : > { %p43_p3 = scmp.ne.s32.totalorder %s5850_s22, %s5846_s21  ;;  %p8885_p4 = scmp.eq.s32.totalorder %s5941_s25, 0 }
   0xb   : > { %s5957_s30 = scalar_select %p28_p1, %s5854_s23, %s30_s28  }
   0xc   : > { %p5959_p5 = por %p38_p2, %p37_p0  ;;  %p5965_p6 = por %p8885_p4, %p43_p3 }
   0xd   : > { %8999 = sst [smem:[#allocation12_spill]] %s5957_s30  ;;  %p177_p7 = scmp.eq.s32.totalorder %s5941_s25, 1 }
   0xe   : > { %s9000_s7 = scalar_select %p5959_p5, 1, 0 }
   0xf   : > { %s9001_s8 = scalar_select %p5965_p6, 1, 0 }
  0x10   : > { %p183_p8 = scmp.eq.s32.totalorder %s5152_s26, 1  ;;  %p5153_p9 = scmp.ge.s32.totalorder %s5858_s24, 1 }
  0x11   : > { %p190_p10 = scmp.lt.s32.totalorder %s5858_s24, 3  ;;  %p5972_p11 = por %p177_p7, %p37_p0 }
  0x12   : > { %p5976_p12 = por %p183_p8, %p43_p3  ;;  %s5860_s12 = smov [#allocation5]  }
  0x13   : > { %s9002_s9 = scalar_select %p5972_p11, 1, 0 }
  0x14   : > { %s9003_s10 = scalar_select %p5976_p12, 1, 0 }
  0x15   : > { %p5980_p13 = pnand %p5153_p9, %p190_p10  ;;  %s205_s13 = sshll.u32 %s5860_s12, 4  ;;  %s206_s13 = int_to_ptr.vmem [resolvable:$true] %s205_s13 }
  0x16   : > { %s5861_s15 = smov [#allocation7]   ;;  %s5702_s19 = scalar_lea.hbm %s8881_s3, 256 }
  0x17   : > { %s9004_s11 = scalar_select %p5980_p13, 1, 0 }
  0x18   : > { %p5492_p1 = pneg %p5980_p13  ;;  %s221_s16 = sshll.u32 %s5861_s15, 4  ;;  %s222_s16 = int_to_ptr.vmem [resolvable:$true] %s221_s16 }
  0x19   : > { %p5703_p7 = scmp.ne.s32.totalorder %s8881_s3, %s5702_s19 }
  0x1a   : > { %p5988_p2 = pnand %p5492_p1, %p8885_p4  ;;  %p5709_p1 = scmp.lt.u32.totalorder %s5702_s19, %s8881_s3 }
  0x1c   : > { %p5704_p8 = pneg %p5988_p2 }
  0x1e   : > { %p5705_p9 = pnand %p5704_p8, %p5703_p7 }
  0x20   : > { %p5706_p10 = pneg %p5705_p9 }
  0x22   : > { %p5711_p0 = pnand %p5709_p1, %p5706_p10 }
  0x24   : > { %5714 = shalt.err (!%p5711_p0)
}
  0x25   : > { %s5715_s12 = scalar_lea.vmem %s206_s13, 256  ;;  %p5723_p11 = scmp.lt.s32.totalorder %s206_s13, %s206_s13 }
  0x26   : > { %p5716_p4 = scmp.ne.s32.totalorder %s206_s13, %s5715_s12  ;;  %p5724_p6 = scmp.lt.s32.totalorder %s5715_s12, %s5715_s12 }
  0x28   : > { %p5718_p3 = pnand %p5716_p4, %p5704_p8  ;;  %p5725_p13 = por %p5724_p6, %p5723_p11 }
  0x2a   : > { %p5719_p12 = pneg %p5718_p3 }
  0x2c   : > { %p5726_p5 = pnand %p5725_p13, %p5719_p12 }
  0x2e   : > { %5729 = shalt.err (!%p5726_p5)
}
  0x2f   : > { %s5862_s15 = smov 64   ;;  %s5863_s17 = smov 4  }
  0x30   : > { %5495 = dma.hbm_to_vmem [thread:$0]  (!%p5988_p2), %s8881_s3, 256, %s206_s13, [#allocation6], %s5862_s15, %s5862_s15, %s5863_s17  }
  0x31   : > { %p9006_p0 = scmp.ne.s32.totalorder %s9000_s7, 0  ;;  %p9007_p7 = scmp.lt.s32.totalorder %s5858_s24, 2 }
  0x32   : > { %s5730_s29 = scalar_lea.hbm %s8883_s5, 256 }
  0x33   : > { %p6020_p4 = pnand %p9007_p7, %p9006_p0  ;;  %p5731_p5 = scmp.ne.s32.totalorder %s8883_s5, %s5730_s29 }
  0x34   : > { %p5737_p12 = scmp.lt.u32.totalorder %s5730_s29, %s8883_s5 }
  0x35   : > { %s9008_s20 = scalar_select %p6020_p4, 1, 0 }
  0x36   : > { %p5733_p6 = pnand %p5731_p5, %p5704_p8 }
  0x38   : > { %p5734_p11 = pneg %p5733_p6 }
  0x3a   : > { %p5739_p13 = pnand %p5737_p12, %p5734_p11 }
  0x3c   : > { %5742 = shalt.err (!%p5739_p13)
}
  0x3d   : > { %s5743_s18 = scalar_lea.vmem %s222_s16, 256  ;;  %p5751_p1 = scmp.lt.s32.totalorder %s222_s16, %s222_s16 }
  0x3e   : > { %p5744_p3 = scmp.ne.s32.totalorder %s222_s16, %s5743_s18  ;;  %p5752_p0 = scmp.lt.s32.totalorder %s5743_s18, %s5743_s18 }
  0x40   : > { %p5746_p9 = pnand %p5744_p3, %p5704_p8  ;;  %p5753_p7 = por %p5752_p0, %p5751_p1 }
  0x42   : > { %p5747_p10 = pneg %p5746_p9 }
  0x44   : > { %p5754_p4 = pnand %p5753_p7, %p5747_p10 }
  0x46   : > { %5757 = shalt.err (!%p5754_p4)
}
  0x47   : > { %5498 = dma.hbm_to_vmem [thread:$0]  (!%p5988_p2), %s8883_s5, 256, %s222_s16, [#allocation6], %s5862_s15, %s5862_s15, %s5863_s17  }
  0x48   : > { %s235_s26 = sand.u32 1, %s5854_s23   ;;  %s5158_s29 = sshll.u32 %s5858_s24, 7 }
  0x49   : > { %s5157_s28 = sshll.u32 %s235_s26, 5  ;;  %s6049_s7 = scalar_lea.hbm %s8878_s0, %s5158_s29 }
  0x4a   : > { %s239_s14 = scalar_lea.vmem [#allocation2], %s5157_s28  ;;  %s6053_s30 = scalar_lea.sflag [#allocation3], %s235_s26 }
  0x4b   : > { %s245_s18 = sshll.u32 %s239_s14, 4  ;;  %s5758_s19 = scalar_lea.hbm %s6049_s7, 512  ;;  %s6051_s18 = int_to_ptr.vmem [resolvable:$true] %s245_s18 }
  0x4c   : > { %p5759_p2 = scmp.ne.s32.totalorder %s6049_s7, %s5758_s19  ;;  %p9009_p8 = scmp.ne.s32.totalorder %s9008_s20, 0 }
  0x4d   : > { %s5763_s17 = scalar_lea.hbm %s8878_s0, 1024  ;;  %p5764_p11 = scmp.lt.u32.totalorder %s6049_s7, %s8878_s0 }
  0x4e   : > { %p5760_p4 = pneg %p9009_p8  ;;  %p5765_p12 = scmp.lt.u32.totalorder %s5763_s17, %s5758_s19 }
  0x4f   : > { %p5767_p3 = scmp.lt.u32.totalorder %s5758_s19, %s6049_s7 }
  0x50   : > { %p5761_p5 = pnand %p5760_p4, %p5759_p2  ;;  %p5766_p13 = por %p5765_p12, %p5764_p11 }
  0x52   : > { %p5762_p6 = pneg %p5761_p5  ;;  %p5768_p9 = por %p5767_p3, %p5766_p13 }
  0x54   : > { %p5769_p10 = pnand %p5768_p9, %p5762_p6 }
  0x56   : > { %5772 = shalt.err (!%p5769_p10)
}
  0x57   : > { %s5773_s26 = scalar_lea.vmem %s6051_s18, 512  ;;  %s5864_s28 = smov [#allocation2]  }
  0x58   : > { %p5774_p1 = scmp.ne.s32.totalorder %s6051_s18, %s5773_s26  ;;  %s5778_s13 = sshll.u32 %s5864_s28, 4  ;;  %s5779_s13 = int_to_ptr.vmem [resolvable:$false] %s5778_s13 }
  0x59   : > { %s5780_s14 = scalar_lea.vmem %s5779_s13, 1024  ;;  %p5781_p2 = scmp.lt.s32.totalorder %s6051_s18, %s5779_s13 }
  0x5a   : > { %p5776_p0 = pnand %p5774_p1, %p5760_p4  ;;  %p5782_p5 = scmp.lt.s32.totalorder %s5780_s14, %s5773_s26 }
  0x5c   : > { %p5777_p7 = pneg %p5776_p0  ;;  %p5783_p11 = por %p5782_p5, %p5781_p2 }
  0x5e   : > { %p5784_p12 = pnand %p5783_p11, %p5777_p7 }
  0x60   : > { %5787 = shalt.err (!%p5784_p12)
}
  0x61   : > { %s5865_s19 = smov 256   ;;  %s5866_s16 = smov 128  }
  0x62   : > { %s5867_s15 = smov 8   ;;  %p9010_p4 = scmp.ne.s32.totalorder %s9004_s11, 0 }
  0x63   : > { %5502 = dma.hbm_to_vmem [thread:$0]  (!%p9009_p8), %s6049_s7, 512, %s6051_s18, %s6053_s30, %s5865_s19, %s5866_s16, %s5867_s15  }
  0x64   : > { %264 = sbr.rel (%p9010_p4) target bundleno = 1192 (0x4a8), region = 44 }
  0x6b   : > { %s6084_s17 = sand.u32 1, %s5850_s22   ;;  %p9011_p6 = scmp.ne.s32.totalorder %s9001_s8, 0 }
  0x6c   : > { %s5160_s29 = sshll.u32 %s6084_s17, 5  ;;  %s267_s12 = scalar_lea.sflag [#allocation3], %s6084_s17 }
  0x6d   : > { %s6090_s26 = scalar_lea.vmem [#allocation2], %s5160_s29 }
  0x6e   : > { %5833 = dma.done.wait (%p9011_p6), %s267_s12, 512  }
  0x6f   : > { %5835 = vsyncadd (%p9011_p6), %s267_s12, 4294966784  ;;  %p9012_p8 = scmp.eq.s32.totalorder %s5941_s25, 0 }
  0x71   : > { %5837 = dma.done.wait (%p9012_p8), [#allocation6], 512   ;;  %p9013_p13 = pmov %p9012_p8 }
  0x72   : > { %p311_p3 = scmp.lt.s32.totalorder %s5941_s25, 1  ;;  %v5868_v0 = vmov 1   ;;  %v6110_v1 = vld [vmem:[%s8880_s2 + $0x10] sm:$0xff]  ;;  %v6115_v2 = vld [vmem:[%s8880_s2] sm:$0xff]  ;;  %v6120_v3 = vld [vmem:[%s8880_s2 + $0x18] sm:$0xff]  ;;  %s5339_s28 = sshll.u32 %s5941_s25, 7 }
  0x73   : > { %5839 = vsyncadd (%p9013_p13), [#allocation6], 4294966784  ;;  %5569 = vset.pattern.permute.xlu1 %v5868_v0  ;;  %5568 = vset.pattern.permute.xlu0 %v5868_v0  ;;  %v6127_v4 = vld [vmem:[%s8880_s2 + $0x8] sm:$0xff]  ;;  %s5036_s13 = scalar_lea.sflag [#allocation4], %s6084_s17  ;;  %p9207_p10 = scmp.ne.s32.totalorder %s9002_s9, 0 }
  0x74   : > { %s312_s11 = scalar_select %p311_p3, %s5941_s25, 1  ;;  %1423 = vperm.xlu1 %5569, %v6110_v1   ;;  %1415 = vperm.xlu0 %5568, %v6115_v2  }
  0x75   : > { %s8834_s25 = scalar_lea.hbm %s8884_s6, %s5339_s28  ;;  %s5881_s19 = smov [#allocation8]  }
  0x76   : > { %s5164_s20 = sshll.u32 %s312_s11, 3  ;;  %s5792_s16 = sshll.u32 %s5881_s19, 4  ;;  %s5793_s16 = int_to_ptr.vmem [resolvable:$false] %s5792_s16 }
  0x77   : > { %s6105_s30 = scalar_lea.vmem %s8879_s1, %s5164_s20  ;;  %s5794_s15 = scalar_lea.vmem %s5793_s16, 1024 }
  0x78   : > { %v6130_v5 = vld [vmem:[%s6105_s30] sm:$0x1]  ;;  %v6133_v6 = vld [vmem:[%s6105_s30 + $0x1] sm:$0x1]  ;;  %v6136_v7 = vld [vmem:[%s6105_s30 + $0x2] sm:$0x1]  ;;  %1427 = vperm.xlu1 %5569, %v6120_v3   ;;  %1419 = vperm.xlu0 %5568, %v6127_v4  }
  0x79   : > { %v6139_v8 = vld [vmem:[%s6105_s30 + $0x3] sm:$0x1]  ;;  %v6142_v9 = vld [vmem:[%s6105_s30 + $0x4] sm:$0x1]  ;;  %v6145_v10 = vld [vmem:[%s6105_s30 + $0x5] sm:$0x1] }
  0x7a   : > { %v326_v11 = vsub.f32 %v6130_v5, %v6139_v8  ;;  %v327_v12 = vsub.f32 %v6133_v6, %v6142_v9  ;;  %v1296_v13 = vmul.f32 %v6142_v9, %v6136_v7  ;;  %v1298_v14 = vmul.f32 %v6139_v8, %v6136_v7 }
  0x7b   : > { %v328_v15 = vsub.f32 %v6136_v7, %v6145_v10  ;;  %v1295_v16 = vmul.f32 %v6145_v10, %v6133_v6  ;;  %v1299_v17 = vmul.f32 %v6145_v10, %v6130_v5  ;;  %v1301_v18 = vmul.f32 %v6142_v9, %v6130_v5 }
  0x7c   : > { %v329_v19 = vmul.f32 %v326_v11, %v326_v11  ;;  %v330_v20 = vmul.f32 %v327_v12, %v327_v12  ;;  %v1302_v21 = vmul.f32 %v6139_v8, %v6133_v6 }
  0x7d   : > { %v332_v22 = vmul.f32 %v328_v15, %v328_v15  ;;  %v1297_v23 = vsub.f32 %v1295_v16, %v1296_v13  ;;  %v1300_v24 = vsub.f32 %v1298_v14, %v1299_v17 }
  0x7e   : > { %v331_v25 = vadd.f32 %v330_v20, %v329_v19  ;;  %v1303_v26 = vsub.f32 %v1301_v18, %v1302_v21 }
  0x7f   : > { %v1310_v27 = vmul.f32 %v1297_v23, %v1297_v23  ;;  %v1311_v28 = vmul.f32 %v1300_v24, %v1300_v24 }
  0x80   : > { %v333_v29 = vadd.f32 %v332_v22, %v331_v25  ;;  %v1313_v30 = vmul.f32 %v1303_v26, %v1303_v26 }
  0x81   : > { %v1312_v31 = vadd.f32 %v1311_v28, %v1310_v27 }
  0x82   : > { %5594 = vrsqrt.f32 %v333_v29  ;;  %vm336_vm0 = vcmp.eq.f32.partialorder %v333_v29, inf  ;;  %v339_v34 = vand.u32 2147483648, %v333_v29  ;;  %vm338_vm1 = vcmp.eq.f32.partialorder %v333_v29, 0.0 }
  0x83   : > { %v1314_v32 = vadd.f32 %v1313_v30, %v1312_v31 }
  0x85   : > { %5596 = vrsqrt.f32 %v1314_v32  ;;  %vm1317_vm2 = vcmp.eq.f32.partialorder %v1314_v32, inf  ;;  %v1320_v38 = vand.u32 2147483648, %v1314_v32  ;;  %vm1319_vm3 = vcmp.eq.f32.partialorder %v1314_v32, 0.0 }
  0x8c   : > { %v5595_v33 = vpop.eup %5594 }
  0x8d   : > { %v335_v35 = vmul.f32 %v5595_v33, %v333_v29 }
  0x8f   : > { %v5597_v36 = vpop.eup %5596  ;;  %v337_v37 = vsel %vm336_vm0, %v333_v29, %v335_v35 }
  0x90   : > { %v6167_v39 = vsel %vm338_vm1, %v339_v34, %v337_v37  ;;  %v1316_v40 = vmul.f32 %v5597_v36, %v1314_v32 }
  0x91   : > { %9014 = vst [vmem:[#allocation13_spill] sm:$0xff] %v6167_v39  ;;  %v1304_v41 = vadd.f32 1.0, %v6167_v39  ;;  %v9056_v39 = vmov 920167782  }
  0x92   : > { %v1318_v42 = vsel %vm1317_vm2, %v1314_v32, %v1316_v40 }
  0x93   : > { %5598 = vrcp.f32 %v1304_v41  ;;  %v1321_v43 = vsel %vm1319_vm3, %v1320_v38, %v1318_v42 }
  0x94   : > { %v1322_v44 = vadd.f32 1.0, %v1321_v43 }
  0x96   : > { %5600 = vrcp.f32 %v1322_v44 }
  0x9d   : > { %v5599_v45 = vpop.eup %5598 }
  0x9e   : > { %v1307_v46 = vmul.f32 %v5599_v45, %v326_v11  ;;  %v1308_v47 = vmul.f32 %v5599_v45, %v327_v12  ;;  %v1309_v48 = vmul.f32 %v5599_v45, %v328_v15 }
  0xa0   : > { %v5601_v49 = vpop.eup %5600  ;;  %v1337_v50 = vmul.f32 %v1307_v46, %v6130_v5  ;;  %v1338_v51 = vmul.f32 %v1308_v47, %v6133_v6  ;;  %v1352_v52 = vmul.f32 %v1307_v46, %v6139_v8  ;;  %v1353_v56 = vmul.f32 %v1308_v47, %v6142_v9 }
  0xa1   : > { %v6173_v53 = vmul.f32 %v5601_v49, %v1297_v23  ;;  %v6175_v54 = vmul.f32 %v5601_v49, %v1300_v24  ;;  %v6177_v55 = vmul.f32 %v5601_v49, %v1303_v26  ;;  %v1340_v58 = vmul.f32 %v1309_v48, %v6136_v7 }
  0xa2   : > { %v1339_v57 = vadd.f32 %v1338_v51, %v1337_v50  ;;  %v1355_v59 = vmul.f32 %v1309_v48, %v6145_v10  ;;  %v1354_v12 = vadd.f32 %v1353_v56, %v1352_v52 }
  0xa3   : > { %9015 = vst [vmem:[#allocation14_spill] sm:$0xff] %v6173_v53  ;;  %9016 = vst [vmem:[#allocation15_spill] sm:$0xff] %v6175_v54  ;;  %v1328_v60 = vmul.f32 %v6177_v55, %v1308_v47  ;;  %v1329_v61 = vmul.f32 %v6175_v54, %v1309_v48  ;;  %v1331_v62 = vmul.f32 %v6173_v53, %v1309_v48 }
  0xa4   : > { %9017 = vst [vmem:[#allocation16_spill] sm:$0xff] %v6177_v55  ;;  %v1332_v63 = vmul.f32 %v6177_v55, %v1307_v46  ;;  %v1334_v0 = vmul.f32 %v6175_v54, %v1307_v46  ;;  %v1335_v11 = vmul.f32 %v6173_v53, %v1308_v47  ;;  %v6188_v16 = vadd.f32 %v1340_v58, %v1339_v57 }
  0xa5   : > { %v1330_v13 = vsub.f32 %v1328_v60, %v1329_v61  ;;  %v6190_v17 = vadd.f32 %v1355_v59, %v1354_v12 }
  0xa6   : > { %v1333_v14 = vsub.f32 %v1331_v62, %v1332_v63  ;;  %v1336_v15 = vsub.f32 %v1334_v0, %v1335_v11  ;;  %9018 = vst [vmem:[#allocation17_spill] sm:$0xff] %v6188_v16 }
  0xa7   : > { %9019 = vst [vmem:[#allocation18_spill] sm:$0xff] %v6190_v17  ;;  %v1347_v18 = vmul.f32 %v1330_v13, %v6130_v5  ;;  %v1362_v20 = vmul.f32 %v1330_v13, %v6139_v8  ;;  %v6200_v24 = vmul.f32 %v6190_v17, %v6188_v16  ;;  %v5869_v5 = vmov 0  }
  0xa8   : > { %v1348_v19 = vmul.f32 %v1333_v14, %v6133_v6  ;;  %v1363_v21 = vmul.f32 %v1333_v14, %v6142_v9  ;;  %v1350_v22 = vmul.f32 %v1336_v15, %v6136_v7  ;;  %v1365_v23 = vmul.f32 %v1336_v15, %v6145_v10  ;;  %5571 = vset.pattern.permute.xlu1 %v5869_v5 }
  0xa9   : > { %9020 = vst [vmem:[#allocation19_spill] sm:$0xff] %v6200_v24  ;;  %5570 = vset.pattern.permute.xlu0 %v5869_v5  ;;  %348 = vperm.xlu1 %5571, %v6127_v4   ;;  %v361_v6 = vlaneseq }
  0xaa   : > { %v1349_v25 = vadd.f32 %v1348_v19, %v1347_v18  ;;  %v1364_v26 = vadd.f32 %v1363_v21, %v1362_v20  ;;  %343 = vperm.xlu0 %5570, %v6115_v2  }
  0xab   : > { %v362_v7 = vshrl.u32 %v361_v6, 7 }
  0xac   : > { %v6202_v27 = vadd.f32 %v1350_v22, %v1349_v25  ;;  %v6204_v28 = vadd.f32 %v1365_v23, %v1364_v26 }
  0xad   : > { %353 = vperm.xlu1 %5571, %v6110_v1   ;;  %v6210_v8 = vsub.s32 0, %v362_v7 }
  0xae   : > { %9021 = vst [vmem:[#allocation20_spill] sm:$0xff] %v6202_v27  ;;  %9022 = vst [vmem:[#allocation21_spill] sm:$0xff] %v6204_v28  ;;  %358 = vperm.xlu0 %5570, %v6120_v3  }
  0xaf   : > { %9023 = vst [vmem:[#allocation22_spill] sm:$0xff] %v6210_v8  ;;  %v6214_v9 = vrot.slane %v6188_v16, %v6210_v8  ;;  %v6218_v10 = vrot.slane %v6202_v27, %v6210_v8  ;;  %v6222_v4 = vrot.slane %v6190_v17, %v6210_v8  ;;  %v6235_v31 = vrot.slane %v6204_v28, %v6210_v8 }
  0xf3   : > { %v1424_v2 = vpop.permute.xlu1 %1423  ;;  %v1416_v1 = vpop.permute.xlu0 %1415 }
  0xf4   : > { %v6225_v3 = vmul.f32 %v6214_v9, %v1424_v2  ;;  %v6228_v29 = vmul.f32 %v6218_v10, %v1424_v2  ;;  %v6231_v30 = vmul.f32 %v6222_v4, %v1424_v2  ;;  %v6238_v32 = vmul.f32 %v6222_v4, %v1416_v1 }
  0xf5   : > { %v6243_v35 = vmul.f32 %v6235_v31, %v1424_v2  ;;  %v6248_v44 = vmul.f32 %v6214_v9, %v1416_v1  ;;  %v6251_v46 = vmul.f32 %v6218_v10, %v1416_v1  ;;  %v6254_v49 = vmul.f32 %v6235_v31, %v1416_v1 }
  0xf6   : > { %9024 = vst [vmem:[#allocation23_spill] sm:$0xff] %v6228_v29  ;;  %9025 = vst [vmem:[#allocation24_spill] sm:$0xff] %v6231_v30  ;;  %v1673_v33 = vand.u32 2139095040, %v6225_v3  ;;  %v2089_v34 = vand.u32 2139095040, %v6228_v29  ;;  %v2505_v37 = vand.u32 2139095040, %v6231_v30  ;;  %v2297_v57 = vand.u32 2139095040, %v6238_v32 }
  0xf7   : > { %9026 = vst [vmem:[#allocation25_spill] sm:$0xff] %v6238_v32  ;;  %9027 = vst [vmem:[#allocation26_spill] sm:$0xff] %v6243_v35  ;;  %v2921_v40 = vand.u32 2139095040, %v6243_v35  ;;  %v1465_v51 = vand.u32 2139095040, %v6248_v44  ;;  %v1881_v56 = vand.u32 2139095040, %v6251_v46  ;;  %v2713_v59 = vand.u32 2139095040, %v6254_v49  ;;  %v6269_v26 = vpop.permute.xlu1 %1427  ;;  %v6364_v54 = vpop.permute.xlu0 %1419 }
  0xf8   : > { %v1674_v36 = vshrl.u32 %v1673_v33, 23  ;;  %v2090_v38 = vshrl.u32 %v2089_v34, 23  ;;  %v2506_v42 = vshrl.u32 %v2505_v37, 23  ;;  %9028 = vst [vmem:[#allocation27_spill] sm:$0xff] %v6254_v49  ;;  %v2298_v0 = vshrl.u32 %v2297_v57, 23 }
  0xf9   : > { %v2922_v45 = vshrl.u32 %v2921_v40, 23  ;;  %v1466_v60 = vshrl.u32 %v1465_v51, 23  ;;  %v1882_v63 = vshrl.u32 %v1881_v56, 23  ;;  %v2714_v11 = vshrl.u32 %v2713_v59, 23 }
  0xfa   : > { %v5210_v41 = vadd.s32 4294967169, %v1674_v36  ;;  %v5226_v43 = vadd.s32 4294967169, %v2090_v38  ;;  %v5242_v48 = vadd.s32 4294967169, %v2506_v42  ;;  %v5234_v19 = vadd.s32 4294967169, %v2298_v0 }
  0xfb   : > { %v5258_v52 = vadd.s32 4294967169, %v2922_v45  ;;  %v5202_v14 = vadd.s32 4294967169, %v1466_v60  ;;  %v5218_v18 = vadd.s32 4294967169, %v1882_v63  ;;  %v5250_v21 = vadd.s32 4294967169, %v2714_v11 }
  0xfc   : > { %v1680_v47 = vadd.s32 1, %v5210_v41  ;;  %v2096_v50 = vadd.s32 1, %v5226_v43  ;;  %v2512_v58 = vadd.s32 1, %v5242_v48  ;;  %v2304_v2 = vadd.s32 1, %v5234_v19 }
  0xfd   : > { %v2928_v62 = vadd.s32 1, %v5258_v52  ;;  %v1472_v6 = vadd.s32 1, %v5202_v14  ;;  %v1888_v7 = vadd.s32 1, %v5218_v18  ;;  %v2720_v36 = vadd.s32 1, %v5250_v21 }
  0xfe   : > { %vm1681_vm4 = vcmp.gt.s32.totalorder %v1680_v47, 0  ;;  %vm2097_vm5 = vcmp.gt.s32.totalorder %v2096_v50, 0  ;;  %vm2513_vm6 = vcmp.gt.s32.totalorder %v2512_v58, 0  ;;  %v8890_v37 = vmov 2102212464  }
  0xff   : > { %v1682_v61 = vsel %vm1681_vm4, %v1680_v47, 0  ;;  %v2098_v12 = vsel %vm2097_vm5, %v2096_v50, 0  ;;  %v2514_v15 = vsel %vm2513_vm6, %v2512_v58, 0  ;;  %vm2929_vm7 = vcmp.gt.s32.totalorder %v2928_v62, 0 }
 0x100   : > { %v6260_v13 = vand.u32 31, %v1682_v61  ;;  %v6262_v20 = vand.u32 31, %v2098_v12  ;;  %v6267_v23 = vand.u32 31, %v2514_v15  ;;  %v2930_v25 = vsel %vm2929_vm7, %v2928_v62, 0 }
 0x101   : > { %v6271_v5 = vshrl.u32 %v1682_v61, 5  ;;  %v6273_v1 = vshrl.u32 %v2098_v12, 5  ;;  %v6278_v34 = vshrl.u32 %v2514_v15, 5  ;;  %v8894_v40 = vmov 920167782  }
 0x102   : > { %9029 = vst [vmem:[#allocation28_spill] sm:$0xff] %v6262_v20  ;;  %v6265_v22 = vsub.s32 32, %v6260_v13  ;;  %9030 = vst [vmem:[#allocation29_spill] sm:$0xff] %v6267_v23  ;;  %v6276_v33 = vsub.s32 32, %v6262_v20  ;;  %v1696_v38 = vshll.u32 %v8890_v37, %v6260_v13  ;;  %v1699_v41 = vshll.u32 %v8894_v40, %v6260_v13 }
 0x103   : > { %9031 = vst [vmem:[#allocation30_spill] sm:$0xff] %v6273_v1  ;;  %9033 = vst [vmem:[#allocation32_spill] sm:$0xff] %v6278_v34  ;;  %v6284_v42 = vand.u32 31, %v2930_v25  ;;  %v6288_v43 = vmul.f32 %v6214_v9, %v6269_v26  ;;  %v8900_v47 = vmov 1326507024   ;;  %v6295_v50 = vsub.s32 32, %v6267_v23 }
 0x104   : > { %9032 = vst [vmem:[#allocation31_spill] sm:$0xff] %v6276_v33  ;;  %v1697_v45 = vshrl.u32 %v8894_v40, %v6265_v22  ;;  %v1700_v48 = vshrl.u32 %v8900_v47, %v6265_v22  ;;  %v6299_v51 = vmul.f32 %v6218_v10, %v6269_v26  ;;  %vm1705_vm8 = vcmp.lt.s32.totalorder %v6271_v5, 4 }
 0x105   : > { %9034 = vst [vmem:[#allocation33_spill] sm:$0xff] %v6284_v42  ;;  %9035 = vst [vmem:[#allocation34_spill] sm:$0xff] %v6295_v50  ;;  %v2112_v52 = vshll.u32 %v8890_v37, %v6262_v20  ;;  %v6304_v56 = vshrl.u32 %v2930_v25, 5  ;;  %v6308_v57 = vmul.f32 %v6222_v4, %v6269_v26  ;;  %v2113_v58 = vshrl.u32 %v8894_v40, %v6276_v33 }
 0x106   : > { %9036 = vst [vmem:[#allocation35_spill] sm:$0xff] %v6299_v51  ;;  %v2115_v59 = vshll.u32 %v8894_v40, %v6262_v20  ;;  %v2116_v60 = vshrl.u32 %v8900_v47, %v6276_v33  ;;  %vm8998_vm9 = vcmp.lt.s32.totalorder %v6273_v1, 4  ;;  %v2528_v61 = vshll.u32 %v8890_v37, %v6267_v23 }
 0x107   : > { %9037 = vst [vmem:[#allocation36_spill] sm:$0xff] %v6304_v56  ;;  %9038 = vst [vmem:[#allocation37_spill] sm:$0xff] %v6308_v57  ;;  %v2531_v62 = vshll.u32 %v8894_v40, %v6267_v23  ;;  %v6322_v63 = vsub.s32 32, %v6284_v42  ;;  %v1777_v0 = vand.u32 2139095040, %v6288_v43  ;;  %v6325_v11 = vor.u32 %v1697_v45, %v1696_v38 }
 0x108   : > { %v1701_v12 = vor.u32 %v1700_v48, %v1699_v41  ;;  %v2529_v14 = vshrl.u32 %v8894_v40, %v6295_v50  ;;  %v2193_v15 = vand.u32 2139095040, %v6299_v51  ;;  %v2532_v18 = vshrl.u32 %v8900_v47, %v6295_v50 }
 0x109   : > { %9039 = vst [vmem:[#allocation38_spill] sm:$0xff] %v6322_v63  ;;  %vm8995_vm10 = vcmp.lt.s32.totalorder %v6278_v34, 4  ;;  %vm1889_vm11 = vcmp.gt.s32.totalorder %v1888_v7, 0  ;;  %v1778_v19 = vshrl.u32 %v1777_v0, 23  ;;  %v2609_v21 = vand.u32 2139095040, %v6308_v57 }
 0x10a   : > { %v6334_v25 = vor.u32 %v2113_v58, %v2112_v52  ;;  %v2117_v37 = vor.u32 %v2116_v60, %v2115_v59  ;;  %v9041_v38 = vmov 2102212464   ;;  %v2194_v45 = vshrl.u32 %v2193_v15, 23 }
 0x10b   : > { %v2944_v41 = vshll.u32 %v9041_v38, %v6284_v42  ;;  %v2945_v48 = vshrl.u32 %v8894_v40, %v6322_v63  ;;  %v2947_v24 = vshll.u32 %v8894_v40, %v6284_v42  ;;  %vm2305_vm12 = vcmp.gt.s32.totalorder %v2304_v2, 0 }
 0x10c   : > { %9040 = vst [vmem:[#allocation39_spill] sm:$0xff] %v6334_v25  ;;  %vm2721_vm13 = vcmp.gt.s32.totalorder %v2720_v36, 0  ;;  %v2948_v0 = vshrl.u32 %v8900_v47, %v6322_v63  ;;  %vm1473_vm14 = vcmp.gt.s32.totalorder %v1472_v6, 0  ;;  %v1890_v28 = vsel %vm1889_vm11, %v1888_v7, 0 }
 0x10d   : > { %v5214_v52 = vadd.s32 4294967169, %v1778_v19  ;;  %v6347_v58 = vsel %vm1705_vm8, %v6325_v11, 920167782  ;;  %v6351_v59 = vsel %vm1705_vm8, %v1701_v12, 1326507024  ;;  %v5230_v60 = vadd.s32 4294967169, %v2194_v45 }
 0x10e   : > { %v2610_v15 = vshrl.u32 %v2609_v21, 23  ;;  %v6353_v40 = vor.u32 %v2529_v14, %v2528_v61  ;;  %v2533_v17 = vor.u32 %v2532_v18, %v2531_v62  ;;  %v2306_v27 = vsel %vm2305_vm12, %v2304_v2, 0 }
 0x10f   : > { %v2722_v16 = vsel %vm2721_vm13, %v2720_v36, 0  ;;  %v6358_v7 = vsel %vm8998_vm9, %v6334_v25, 920167782  ;;  %v6360_v19 = vor.u32 %v2945_v48, %v2944_v41  ;;  %v1474_v47 = vsel %vm1473_vm14, %v1472_v6, 0 }
 0x110   : > { %9042 = vst [vmem:[#allocation40_spill] sm:$0xff] %v6353_v40  ;;  %9043 = vst [vmem:[#allocation41_spill] sm:$0xff] %v6358_v7  ;;  %v6362_v55 = vand.u32 31, %v1890_v28  ;;  %v6368_v12 = vsel %vm8998_vm9, %v2117_v37, 1326507024  ;;  %v2949_v61 = vor.u32 %v2948_v0, %v2947_v24  ;;  %v6372_v2 = vmul.f32 %v6235_v31, %v6269_v26 }
 0x111   : > { %9044 = vst [vmem:[#allocation42_spill] sm:$0xff] %v6360_v19  ;;  %9045 = vst [vmem:[#allocation43_spill] sm:$0xff] %v6368_v12  ;;  %v1784_v36 = vadd.s32 1, %v5214_v52  ;;  %v6374_v62 = vand.u32 31, %v2306_v27  ;;  %v6376_v14 = vand.u32 31, %v2722_v16  ;;  %v2200_v18 = vadd.s32 1, %v5230_v60 }
 0x112   : > { %9046 = vst [vmem:[#allocation44_spill] sm:$0xff] %v6372_v2  ;;  %v5246_v6 = vadd.s32 4294967169, %v2610_v15  ;;  %v6381_v21 = vsel %vm8995_vm10, %v6353_v40, 920167782  ;;  %vm8992_vm15 = vcmp.lt.s32.totalorder %v6304_v56, 4  ;;  %v6384_v37 = vand.u32 31, %v1474_v47 }
 0x113   : > { %9047 = vst [vmem:[#allocation45_spill] sm:$0xff] %v6374_v62  ;;  %9048 = vst [vmem:[#allocation46_spill] sm:$0xff] %v6376_v14  ;;  %v6388_v24 = vmul.f32 %v6214_v9, %v6364_v54  ;;  %v6392_v26 = vsel %vm8995_vm10, %v2533_v17, 1326507024  ;;  %v6397_v41 = vsel %vm8992_vm15, %v6360_v19, 920167782  ;;  %v2739_v50 = vshll.u32 %v9056_v39, %v6376_v14 }
 0x114   : > { %9049 = vst [vmem:[#allocation47_spill] sm:$0xff] %v6381_v21  ;;  %9050 = vst [vmem:[#allocation48_spill] sm:$0xff] %v6392_v26  ;;  %v6399_v45 = vshrl.u32 %v1890_v28, 5  ;;  %v6402_v48 = vsub.s32 32, %v6362_v55  ;;  %v6406_v0 = vsel %vm8992_vm15, %v2949_v61, 1326507024  ;;  %v1904_v61 = vshll.u32 %v9041_v38, %v6362_v55 }
 0x115   : > { %9051 = vst [vmem:[#allocation49_spill] sm:$0xff] %v6397_v41  ;;  %9052 = vst [vmem:[#allocation50_spill] sm:$0xff] %v6406_v0  ;;  %v6408_v9 = vshrl.u32 %v1474_v47, 5  ;;  %vm1785_vm0 = vcmp.gt.s32.totalorder %v1784_v36, 0  ;;  %v3025_v17 = vand.u32 2139095040, %v6372_v2  ;;  %v6412_v52 = vsub.s32 32, %v6374_v62 }
 0x116   : > { %v6415_v60 = vsub.s32 32, %v6376_v14  ;;  %vm2201_vm1 = vcmp.gt.s32.totalorder %v2200_v18, 0  ;;  %v2616_v28 = vadd.s32 1, %v5246_v6  ;;  %v6418_v15 = vsub.s32 32, %v6384_v37 }
 0x117   : > { %9053 = vst [vmem:[#allocation51_spill] sm:$0xff] %v6412_v52  ;;  %v6422_v53 = vshrl.u32 %v2306_v27, 5  ;;  %v1569_v47 = vand.u32 2139095040, %v6388_v24  ;;  %v1905_v8 = vshrl.u32 %v9056_v39, %v6402_v48  ;;  %v1907_v2 = vshll.u32 %v9056_v39, %v6362_v55 }
 0x118   : > { %9054 = vst [vmem:[#allocation52_spill] sm:$0xff] %v6415_v60  ;;  %v9057_v19 = vmov 1326507024   ;;  %vm1913_vm2 = vcmp.lt.s32.totalorder %v6399_v45, 4  ;;  %v1786_v6 = vsel %vm1785_vm0, %v1784_v36, 0  ;;  %v2320_v41 = vshll.u32 %v9041_v38, %v6374_v62 }
 0x119   : > { %9055 = vst [vmem:[#allocation53_spill] sm:$0xff] %v6422_v53  ;;  %v1908_v0 = vshrl.u32 %v9057_v19, %v6402_v48  ;;  %v2323_v27 = vshll.u32 %v9056_v39, %v6374_v62  ;;  %v2202_v56 = vsel %vm2201_vm1, %v2200_v18, 0  ;;  %v3026_v63 = vshrl.u32 %v3025_v17, 23 }
 0x11a   : > { %v2321_v42 = vshrl.u32 %v9056_v39, %v6412_v52  ;;  %v2324_v35 = vshrl.u32 %v9057_v19, %v6412_v52  ;;  %v2737_v49 = vshrl.u32 %v9056_v39, %v6415_v60  ;;  %vm2617_vm3 = vcmp.gt.s32.totalorder %v2616_v28, 0 }
 0x11b   : > { %v6442_v57 = vshrl.u32 %v2722_v16, 5  ;;  %v2740_v36 = vshrl.u32 %v9057_v19, %v6415_v60  ;;  %v6446_v40 = vand.u32 31, %v1786_v6  ;;  %v1570_v26 = vshrl.u32 %v1569_v47, 23 }
 0x11c   : > { %v6448_v18 = vor.u32 %v1905_v8, %v1904_v61  ;;  %v1909_v17 = vor.u32 %v1908_v0, %v1907_v2  ;;  %v2736_v21 = vshll.u32 %v9041_v38, %v6376_v14  ;;  %v6452_v34 = vand.u32 31, %v2202_v56 }
 0x11d   : > { %9058 = vst [vmem:[#allocation54_spill] sm:$0xff] %v6442_v57  ;;  %v2618_v23 = vsel %vm2617_vm3, %v2616_v28, 0  ;;  %v5262_v16 = vadd.s32 4294967169, %v3026_v63  ;;  %v6458_v30 = vmul.f32 %v6218_v10, %v6364_v54  ;;  %v6460_v60 = vor.u32 %v2321_v42, %v2320_v41 }
 0x11e   : > { %9059 = vst [vmem:[#allocation55_spill] sm:$0xff] %v6448_v18  ;;  %9060 = vst [vmem:[#allocation56_spill] sm:$0xff] %v6452_v34  ;;  %v2325_v47 = vor.u32 %v2324_v35, %v2323_v27  ;;  %vm8996_vm4 = vcmp.lt.s32.totalorder %v6422_v53, 4  ;;  %v6463_v8 = vor.u32 %v2737_v49, %v2736_v21  ;;  %v2741_v2 = vor.u32 %v2740_v36, %v2739_v50 }
 0x11f   : > { %9061 = vst [vmem:[#allocation57_spill] sm:$0xff] %v6458_v30  ;;  %9062 = vst [vmem:[#allocation58_spill] sm:$0xff] %v6460_v60  ;;  %v6466_v0 = vsub.s32 32, %v6446_v40  ;;  %v6470_v61 = vmul.f32 %v6222_v4, %v6364_v54  ;;  %v5206_v63 = vadd.s32 4294967169, %v1570_v26  ;;  %vm8993_vm5 = vcmp.lt.s32.totalorder %v6442_v57, 4 }
 0x120   : > { %9063 = vst [vmem:[#allocation59_spill] sm:$0xff] %v6463_v8  ;;  %v6474_v10 = vsub.s32 32, %v6452_v34  ;;  %v6476_v42 = vand.u32 31, %v2618_v23  ;;  %v6480_v35 = vmul.f32 %v6235_v31, %v6364_v54  ;;  %v6485_v49 = vsel %vm1913_vm2, %v6448_v18, 920167782 }
 0x121   : > { %9064 = vst [vmem:[#allocation60_spill] sm:$0xff] %v6470_v61  ;;  %9068 = vst [vmem:[#allocation64_spill] sm:$0xff] %v6485_v49  ;;  %v6489_v4 = vsel %vm1913_vm2, %v1909_v17, 1326507024  ;;  %v3032_v50 = vadd.s32 1, %v5262_v16  ;;  %v1985_v21 = vand.u32 2139095040, %v6458_v30  ;;  %v1801_v28 = vshrl.u32 %v9056_v39, %v6466_v0 }
 0x122   : > { %9065 = vst [vmem:[#allocation61_spill] sm:$0xff] %v6474_v10  ;;  %9066 = vst [vmem:[#allocation62_spill] sm:$0xff] %v6476_v42  ;;  %v6495_v26 = vsel %vm8996_vm4, %v6460_v60, 920167782  ;;  %v6499_v54 = vsel %vm8996_vm4, %v2325_v47, 1326507024  ;;  %v1804_v17 = vshrl.u32 %v9057_v19, %v6466_v0  ;;  %v2217_v16 = vshrl.u32 %v9056_v39, %v6474_v10 }
 0x123   : > { %9067 = vst [vmem:[#allocation63_spill] sm:$0xff] %v6480_v35  ;;  %9069 = vst [vmem:[#allocation65_spill] sm:$0xff] %v6489_v4  ;;  %v6504_v31 = vsel %vm8993_vm5, %v6463_v8, 920167782  ;;  %v6508_v41 = vsel %vm8993_vm5, %v2741_v2, 1326507024  ;;  %v1800_v2 = vshll.u32 %v9041_v38, %v6446_v40  ;;  %v1803_v57 = vshll.u32 %v9056_v39, %v6446_v40 }
 0x124   : > { %9070 = vst [vmem:[#allocation66_spill] sm:$0xff] %v6495_v26  ;;  %9071 = vst [vmem:[#allocation67_spill] sm:$0xff] %v6499_v54  ;;  %v1576_v27 = vadd.s32 1, %v5206_v63  ;;  %v2401_v36 = vand.u32 2139095040, %v6470_v61  ;;  %v6518_v47 = vsub.s32 32, %v6476_v42  ;;  %v2817_v8 = vand.u32 2139095040, %v6480_v35 }
 0x125   : > { %9072 = vst [vmem:[#allocation68_spill] sm:$0xff] %v6504_v31  ;;  %9073 = vst [vmem:[#allocation69_spill] sm:$0xff] %v6508_v41  ;;  %v2220_v41 = vshrl.u32 %v9057_v19, %v6474_v10  ;;  %vm3033_vm6 = vcmp.gt.s32.totalorder %v3032_v50, 0  ;;  %v1986_v63 = vshrl.u32 %v1985_v21, 23  ;;  %v6525_v31 = vshrl.u32 %v1786_v6, 5 }
 0x126   : > { %9074 = vst [vmem:[#allocation70_spill] sm:$0xff] %v6518_v47  ;;  %v6529_v14 = vshrl.u32 %v2202_v56, 5  ;;  %v2216_v61 = vshll.u32 %v9041_v38, %v6452_v34  ;;  %v6533_v60 = vor.u32 %v1801_v28, %v1800_v2  ;;  %v2219_v35 = vshll.u32 %v9056_v39, %v6452_v34 }
 0x127   : > { %vm1577_vm7 = vcmp.gt.s32.totalorder %v1576_v27, 0  ;;  %v8953_v54 = vand.u32 2147483647, %v6248_v44  ;;  %v1805_v26 = vor.u32 %v1804_v17, %v1803_v57  ;;  %v2633_v6 = vshrl.u32 %v9056_v39, %v6518_v47 }
 0x128   : > { %9075 = vst [vmem:[#allocation71_spill] sm:$0xff] %v6529_v14  ;;  %v6538_v21 = vor.u32 %v2217_v16, %v2216_v61  ;;  %v6544_v56 = vshrl.u32 %v9057_v19, %v6518_v47  ;;  %v2221_v53 = vor.u32 %v2220_v41, %v2219_v35  ;;  %v6546_v52 = vshrl.u32 %v2618_v23, 5 }
 0x129   : > { %v2402_v28 = vshrl.u32 %v2401_v36, 23  ;;  %v6548_v2 = vshrl.u32 %v2817_v8, 23  ;;  %vm1809_vm11 = vcmp.lt.s32.totalorder %v6525_v31, 4  ;;  %v2632_v57 = vshll.u32 %v9041_v38, %v6476_v42 }
 0x12a   : > { %9076 = vst [vmem:[#allocation72_spill] sm:$0xff] %v6538_v21  ;;  %v6555_v61 = vshll.u32 %v9056_v39, %v6476_v42  ;;  %v1578_v17 = vsel %vm1577_vm7, %v1576_v27, 0  ;;  %v6560_v16 = vsel %vm1809_vm11, %v6533_v60, 920167782  ;;  %vm8997_vm12 = vcmp.lt.s32.totalorder %v6529_v14, 4 }
 0x12b   : > { %v6564_v23 = vsel %vm3033_vm6, %v3032_v50, 0  ;;  %v1469_v8 = vand.u32 8388607, %v8953_v54  ;;  %v6570_v35 = vsel %vm1809_vm11, %v1805_v26, 1326507024  ;;  %v6577_v27 = vor.u32 %v2633_v6, %v2632_v57 }
 0x12c   : > { %v6575_v41 = vsel %vm8997_vm12, %v6538_v21, 920167782  ;;  %v6583_v50 = vsel %vm8997_vm12, %v2221_v53, 1326507024  ;;  %v6585_v42 = vand.u32 31, %v1578_v17  ;;  %v5222_v32 = vadd.s32 4294967169, %v1986_v63 }
 0x12d   : > { %9077 = vst [vmem:[#allocation73_spill] sm:$0xff] %v6575_v41  ;;  %9078 = vst [vmem:[#allocation74_spill] sm:$0xff] %v6577_v27  ;;  %v8961_v54 = vmov 683565275   ;;  %v8965_v47 = vmov 2475754826   ;;  %v1489_v63 = vshrl.u32 %v9056_v39, %v6418_v15 }
 0x12e   : > { %9079 = vst [vmem:[#allocation75_spill] sm:$0xff] %v6583_v50  ;;  %v1479_v26 = vshll.u32 %v8961_v54, %v6384_v37  ;;  %v1480_v62 = vshrl.u32 %v8965_v47, %v6418_v15  ;;  %v1470_v6 = vor.u32 8388608, %v1469_v8  ;;  %v1482_v57 = vshll.u32 %v8965_v47, %v6384_v37 }
 0x12f   : > { %v8967_v36 = vmov 2131351028   ;;  %v1486_v54 = vshrl.u32 %v9041_v38, %v6418_v15  ;;  %v1488_v50 = vshll.u32 %v9041_v38, %v6384_v37  ;;  %v1491_v8 = vshll.u32 %v9056_v39, %v6384_v37 }
 0x130   : > { %v1483_v53 = vshrl.u32 %v8967_v36, %v6418_v15  ;;  %v1481_v41 = vor.u32 %v1480_v62, %v1479_v26  ;;  %v1485_v21 = vshll.u32 %v8967_v36, %v6384_v37  ;;  %v1492_v47 = vshrl.u32 %v9057_v19, %v6418_v15 }
 0x131   : > { %v1581_v62 = vsub.s32 32, %v6585_v42  ;;  %v9080_v26 = vmov 683565275   ;;  %vm1494_vm13 = vcmp.lt.s32.totalorder %v6408_v9, 1  ;;  %v1490_v10 = vor.u32 %v1489_v63, %v1488_v50 }
 0x132   : > { %v1484_v14 = vor.u32 %v1483_v53, %v1482_v57  ;;  %v1478_v36 = vshrl.u32 %v9080_v26, %v6418_v15  ;;  %v1487_v34 = vor.u32 %v1486_v54, %v1485_v21  ;;  %v1493_v51 = vor.u32 %v1492_v47, %v1491_v8 }
 0x133   : > { %vm1495_vm14 = vcmp.lt.s32.totalorder %v6408_v9, 2  ;;  %vm1497_vm0 = vcmp.lt.s32.totalorder %v6408_v9, 4  ;;  %vm1496_vm1 = vcmp.lt.s32.totalorder %v6408_v9, 3  ;;  %v1510_v1 = vshll.u32 %v1470_v6, 8 }
 0x134   : > { %v1499_v37 = vsel %vm1497_vm0, %v1487_v34, 2102212464  ;;  %v1502_v57 = vsel %vm1494_vm13, %v1481_v41, %v1484_v14  ;;  %v1506_v53 = vsel %vm1494_vm13, %v1484_v14, %v1487_v34  ;;  %v1498_v25 = vsel %vm1494_vm13, %v1478_v36, %v1481_v41 }
 0x135   : > { %v1503_v12 = vsel %vm1497_vm0, %v1490_v10, 920167782  ;;  %v1507_v7 = vsel %vm1497_vm0, %v1493_v51, 1326507024  ;;  %v1500_v33 = vsel %vm1496_vm1, %v1484_v14, %v1499_v37  ;;  %v8982_v21 = vand.u32 2147483647, %v6388_v24 }
 0x136   : > { %v1504_v15 = vsel %vm1496_vm1, %v1487_v34, %v1503_v12  ;;  %v1508_v54 = vsel %vm1496_vm1, %v1490_v10, %v1507_v7  ;;  %v6616_v47 = vand.u32 31, %v6564_v23  ;;  %v1992_v50 = vadd.s32 1, %v5222_v32 }
 0x137   : > { %v1505_v63 = vsel %vm1495_vm14, %v1502_v57, %v1504_v15  ;;  %v1509_v8 = vsel %vm1495_vm14, %v1506_v53, %v1508_v54  ;;  %v1579_v34 = vshrl.u32 %v1578_v17, 5  ;;  %v5238_v7 = vadd.s32 4294967169, %v2402_v28 }
 0x138   : > { %v6622_v20 = vmul.u32.u64.low %v1510_v1, %v1509_v8  ;;  %v6623_v41 = vmul.u32.u64.high %v1510_v1, %v1509_v8, %v6622_v20  ;;  %v6625_v51 = vmul.u32.u64.low %v1510_v1, %v1505_v63  ;;  %v6626_v36 = vmul.u32.u64.high %v1510_v1, %v1505_v63, %v6625_v51 }
 0x139   : > { %v1501_v12 = vsel %vm1495_vm14, %v1498_v25, %v1500_v33  ;;  %v1573_v32 = vand.u32 8388607, %v8982_v21  ;;  %v1583_v14 = vshll.u32 %v9080_v26, %v6585_v42  ;;  %v9081_v10 = vmov 2475754826  }
 0x13a   : > { %v1584_v6 = vshrl.u32 %v9081_v10, %v1581_v62  ;;  %v1586_v20 = vshll.u32 %v9081_v10, %v6585_v42  ;;  %v9082_v37 = vmov 2131351028   ;;  %v1590_v28 = vshrl.u32 %v9041_v38, %v1581_v62 }
 0x13b   : > { %v1587_v57 = vshrl.u32 %v9082_v37, %v1581_v62  ;;  %v1589_v17 = vshll.u32 %v9082_v37, %v6585_v42  ;;  %v1592_v33 = vshll.u32 %v9041_v38, %v6585_v42  ;;  %v1593_v25 = vshrl.u32 %v9056_v39, %v1581_v62 }
 0x13c   : > { %v1517_v9 = vmul.u32 %v1510_v1, %v1501_v12  ;;  %vm1519_vm3 = vc.u32 %v6623_v41, %v6625_v51  ;;  %v1520_v53 = vadd.s32 1, %v6626_v36  ;;  %v1585_v15 = vor.u32 %v1584_v6, %v1583_v14 }
 0x13d   : > { %vm8994_vm6 = vcmp.lt.s32.totalorder %v6546_v52, 4  ;;  %v1582_v54 = vshrl.u32 %v9080_v26, %v1581_v62  ;;  %v1588_v63 = vor.u32 %v1587_v57, %v1586_v20  ;;  %v1591_v8 = vor.u32 %v1590_v28, %v1589_v17 }
 0x13e   : > { %v1594_v21 = vor.u32 %v1593_v25, %v1592_v33  ;;  %v1521_v29 = vsel %vm1519_vm3, %v1520_v53, %v6626_v36  ;;  %v1574_v30 = vor.u32 8388608, %v1573_v32  ;;  %v1595_v18 = vshll.u32 %v9056_v39, %v6585_v42 }
 0x13f   : > { %v1596_v1 = vshrl.u32 %v9057_v19, %v1581_v62  ;;  %v1522_v12 = vadd.s32 %v1521_v29, %v1517_v9  ;;  %vm1598_vm7 = vcmp.lt.s32.totalorder %v1579_v34, 1  ;;  %vm1600_vm13 = vcmp.lt.s32.totalorder %v1579_v34, 3 }
 0x140   : > { %vm1601_vm14 = vcmp.lt.s32.totalorder %v1579_v34, 4  ;;  %v1606_v4 = vsel %vm1598_vm7, %v1585_v15, %v1588_v63  ;;  %vm1599_vm0 = vcmp.lt.s32.totalorder %v1579_v34, 2  ;;  %v1610_v36 = vsel %vm1598_vm7, %v1588_v63, %v1591_v8 }
 0x141   : > { %v1597_v14 = vor.u32 %v1596_v1, %v1595_v18  ;;  %v1603_v6 = vsel %vm1601_vm14, %v1591_v8, 2102212464  ;;  %v1607_v49 = vsel %vm1601_vm14, %v1594_v21, 920167782  ;;  %v1523_v20 = vadd.s32 536870912, %v1522_v12 }
 0x142   : > { %v1608_v57 = vsel %vm1600_vm13, %v1591_v8, %v1607_v49  ;;  %vm1993_vm1 = vcmp.gt.s32.totalorder %v1992_v50, 0  ;;  %v1614_v62 = vshll.u32 %v1574_v30, 8  ;;  %v1602_v17 = vsel %vm1598_vm7, %v1582_v54, %v1585_v15 }
 0x143   : > { %v1609_v42 = vsel %vm1599_vm0, %v1606_v4, %v1608_v57  ;;  %v1611_v32 = vsel %vm1601_vm14, %v1597_v14, 1326507024  ;;  %v6658_v29 = vshrl.u32 %v1523_v20, 30  ;;  %v1604_v18 = vsel %vm1600_vm13, %v1588_v63, %v1603_v6 }
 0x144   : > { %v1612_v28 = vsel %vm1600_vm13, %v1594_v21, %v1611_v32  ;;  %v2408_v33 = vadd.s32 1, %v5238_v7  ;;  %v6664_v9 = vmul.u32.u64.low %v1614_v62, %v1609_v42  ;;  %v6665_v49 = vmul.u32.u64.high %v1614_v62, %v1609_v42, %v6664_v9 }
 0x145   : > { %v1613_v25 = vsel %vm1599_vm0, %v1610_v36, %v1612_v28  ;;  %v6668_v53 = vsel %vm1993_vm1, %v1992_v50, 0  ;;  %v1525_v4 = vshll.u32 %v6658_v29, 30  ;;  %v6677_v15 = vsel %vm8994_vm6, %v6577_v27, 920167782 }
 0x146   : > { %v6671_v30 = vmul.u32.u64.low %v1614_v62, %v1613_v25  ;;  %v6672_v8 = vmul.u32.u64.high %v1614_v62, %v1613_v25, %v6671_v30  ;;  %9083 = vst [vmem:[#allocation76_spill] sm:$0xff] %v6677_v15  ;;  %v9084_v21 = vor.u32 %v6544_v56, %v6555_v61  ;;  %v6687_v50 = vshrl.u32 %v6564_v23, 5 }
 0x147   : > { %v1605_v54 = vsel %vm1599_vm0, %v1602_v17, %v1604_v18  ;;  %v6691_v63 = vsub.s32 32, %v6616_v47  ;;  %v6695_v1 = vshll.u32 %v9041_v38, %v6616_v47  ;;  %v6697_v14 = vsub.s32 %v1522_v12, %v1525_v4 }
 0x148   : > { %v6684_v7 = vsel %vm8994_vm6, %v9084_v21, 1326507024  ;;  %9086 = vst [vmem:[#allocation78_spill] sm:$0xff] %v6687_v50  ;;  %v8988_v56 = vand.u32 2147483647, %v6225_v3  ;;  %v6701_v61 = vand.u32 31, %v6668_v53  ;;  %v1621_v20 = vmul.u32 %v1614_v62, %v1605_v54 }
 0x149   : > { %9085 = vst [vmem:[#allocation77_spill] sm:$0xff] %v6684_v7  ;;  %9087 = vst [vmem:[#allocation79_spill] sm:$0xff] %v6691_v63  ;;  %vm2409_vm3 = vcmp.gt.s32.totalorder %v2408_v33, 0  ;;  %v5254_v23 = vadd.s32 4294967169, %v6548_v2  ;;  %v1624_v34 = vadd.s32 1, %v6665_v49  ;;  %v1528_v6 = vsub.s32 0, %v6697_v14 }
 0x14a   : > { %9088 = vst [vmem:[#allocation80_spill] sm:$0xff] %v6695_v1  ;;  %vm1623_vm7 = vc.u32 %v6672_v8, %v6664_v9  ;;  %v1687_v12 = vshll.u32 %v9080_v26, %v6260_v13  ;;  %v1688_v36 = vshrl.u32 %v9081_v10, %v6265_v22  ;;  %v1690_v42 = vshll.u32 %v9081_v10, %v6260_v13 }
 0x14b   : > { %v1625_v57 = vsel %vm1623_vm7, %v1624_v34, %v6665_v49  ;;  %v1691_v2 = vshrl.u32 %v9082_v37, %v6265_v22  ;;  %v6717_v32 = vsel %vm2409_vm3, %v2408_v33, 0  ;;  %v5203_v62 = vmin.u32 %v1528_v6, %v6697_v14 }
 0x14c   : > { %v1626_v17 = vadd.s32 %v1625_v57, %v1621_v20  ;;  %v1677_v18 = vand.u32 8388607, %v8988_v56  ;;  %v6723_v28 = vsub.s32 32, %v6701_v61  ;;  %v6727_v25 = vshll.u32 %v9041_v38, %v6701_v61 }
 0x14d   : > { %v6729_v49 = vadd.s32 1, %v5254_v23  ;;  %v1693_v4 = vshll.u32 %v9082_v37, %v6260_v13  ;;  %v6735_v33 = vshll.u32 %v9056_v39, %v6701_v61  ;;  %v1530_v30 = vclz %v5203_v62 }
 0x14e   : > { %v1627_v21 = vadd.s32 536870912, %v1626_v17  ;;  %v1694_v54 = vshrl.u32 %v9041_v38, %v6265_v22  ;;  %v6740_v34 = vand.u32 31, %v6717_v32  ;;  %vm1464_vm13 = vcmp.lt.s32.totalorder %v6248_v44, 0 }
 0x14f   : > { %v1689_v6 = vor.u32 %v1688_v36, %v1687_v12  ;;  %v1692_v23 = vor.u32 %v1691_v2, %v1690_v42  ;;  %v5204_v20 = vadd.s32 4294967294, %v1530_v30  ;;  %v1678_v56 = vor.u32 8388608, %v1677_v18 }
 0x150   : > { %v1628_v57 = vshrl.u32 %v1627_v21, 30  ;;  %v1695_v13 = vor.u32 %v1694_v54, %v1693_v4  ;;  %v9089_v1 = vand.u32 2147483647, %v6248_v44  ;;  %v1518_v62 = vadd.s32 %v6625_v51, %v6623_v41 }
 0x151   : > { %v1548_v63 = vsub.s32 4, %v6658_v29  ;;  %v1686_v27 = vshrl.u32 %v9080_v26, %v6265_v22  ;;  %vm1704_vm0 = vcmp.lt.s32.totalorder %v6271_v5, 3  ;;  %vm5205_vm1 = vcmp.lt.s32.totalorder %v5204_v20, 0 }
 0x152   : > { %vm6745_vm14 = vcmp.le.f32.partialorder %v9089_v1, 0.7853982  ;;  %v1629_v12 = vshll.u32 %v1628_v57, 30  ;;  %vm1702_vm3 = vcmp.lt.s32.totalorder %v6271_v5, 1  ;;  %v1716_v1 = vsel %vm1704_vm0, %v6325_v11, %v6351_v59 }
 0x153   : > { %v1533_v36 = vsel %vm5205_vm1, 0, %v5204_v20  ;;  %vm1703_vm7 = vcmp.lt.s32.totalorder %v6271_v5, 2  ;;  %v1710_v41 = vsel %vm1702_vm3, %v1689_v6, %v1692_v23  ;;  %v1714_v22 = vsel %vm1702_vm3, %v1692_v23, %v1695_v13 }
 0x154   : > { %v1534_v51 = vsub.s32 32, %v1533_v36  ;;  %v1538_v42 = vsub.s32 4294967266, %v1533_v36  ;;  %v6765_v2 = vsub.s32 %v1626_v17, %v1629_v12  ;;  %v6767_v18 = vshll.u32 %v1678_v56, 8 }
 0x155   : > { %v1652_v4 = vsub.s32 4, %v1628_v57  ;;  %v1707_v30 = vsel %vm1705_vm8, %v1695_v13, 2102212464  ;;  %v1712_v11 = vsel %vm1704_vm0, %v1695_v13, %v6347_v58  ;;  %v1717_v59 = vsel %vm1703_vm7, %v1714_v22, %v1716_v1 }
 0x156   : > { %v1535_v21 = vshll.u32 %v6697_v14, %v1533_v36  ;;  %v1536_v54 = vshrl.u32 %v1518_v62, %v1534_v51  ;;  %v1539_v20 = vadd.s32 127, %v1538_v42  ;;  %v1632_v17 = vsub.s32 0, %v6765_v2 }
 0x157   : > { %v1549_v56 = vsel %vm1464_vm13, %v1548_v63, %v6658_v29  ;;  %v1706_v12 = vsel %vm1702_vm3, %v1686_v27, %v1689_v6  ;;  %v6784_v7 = vmul.u32.u64.low %v6767_v18, %v1717_v59  ;;  %v6785_v15 = vmul.u32.u64.high %v6767_v18, %v1717_v59, %v6784_v7 }
 0x158   : > { %v1537_v58 = vor.u32 %v1536_v54, %v1535_v21  ;;  %v1540_v13 = vshll.u32 %v1539_v20, 23  ;;  %v5207_v1 = vmin.u32 %v1632_v17, %v6765_v2  ;;  %v1708_v14 = vsel %vm1704_vm0, %v1692_v23, %v1707_v30 }
 0x159   : > { %v6792_v62 = vshrl.u32 %v9056_v39, %v6723_v28  ;;  %v6796_v29 = vshrl.u32 %v9057_v19, %v6723_v28  ;;  %vm1568_vm8 = vcmp.lt.s32.totalorder %v6388_v24, 0  ;;  %v1713_v27 = vsel %vm1703_vm7, %v1710_v41, %v1712_v11 }
 0x15a   : > { %v1541_v7 = vor.u32 4788187, %v1540_v13  ;;  %v1551_v63 = vsel %vm6745_vm14, 0, %v1549_v56  ;;  %v1634_v6 = vclz %v5207_v1  ;;  %v1653_v23 = vsel %vm1568_vm8, %v1652_v4, %v1628_v57 }
 0x15b   : > { %v1544_v36 = vcvt.s32.f32 %v1537_v58  ;;  %v9092_v22 = vand.u32 2147483647, %v6388_v24  ;;  %v1709_v42 = vsel %vm1703_vm7, %v1706_v12, %v1708_v14  ;;  %v1774_v41 = vand.u32 2147483647, %v6288_v43 }
 0x15c   : > { %v1542_v30 = vand.u32 2147483647, %v1541_v7  ;;  %v5208_v11 = vadd.s32 4294967294, %v1634_v6  ;;  %v6815_v59 = vmul.u32.u64.low %v6767_v18, %v1713_v27  ;;  %v6816_v21 = vmul.u32.u64.high %v6767_v18, %v1713_v27, %v6815_v59 }
 0x15d   : > { %vm6807_vm0 = vcmp.le.f32.partialorder %v9092_v22, 0.7853982  ;;  %v1622_v57 = vadd.s32 %v6664_v9, %v6672_v8  ;;  %v6825_v54 = vand.u32 3, %v1551_v63  ;;  %v6827_v5 = vadd.s32 3, %v1551_v63 }
 0x15e   : > { %v6823_v4 = vsel %vm6807_vm0, 0, %v1653_v23  ;;  %v1545_v20 = vmul.f32 %v1544_v36, %v1542_v30  ;;  %vm5209_vm1 = vcmp.lt.s32.totalorder %v5208_v11, 0  ;;  %v1725_v17 = vmul.u32 %v6767_v18, %v1709_v42 }
 0x15f   : > { %v1781_v56 = vand.u32 8388607, %v1774_v41  ;;  %v1637_v12 = vsel %vm5209_vm1, 0, %v5208_v11  ;;  %vm1727_vm3 = vc.u32 %v6785_v15, %v6815_v59  ;;  %v1791_v9 = vshll.u32 %v9080_v26, %v6446_v40 }
 0x160   : > { %v1792_v8 = vshrl.u32 %v9081_v10, %v6466_v0  ;;  %v1546_v58 = vxor.u32 2147483648, %v1545_v20  ;;  %v1638_v13 = vsub.s32 32, %v1637_v12  ;;  %v1639_v1 = vshll.u32 %v6765_v2, %v1637_v12 }
 0x161   : > { %v1642_v14 = vsub.s32 4294967266, %v1637_v12  ;;  %v1728_v18 = vadd.s32 1, %v6816_v21  ;;  %v1794_v7 = vshll.u32 %v9081_v10, %v6446_v40  ;;  %v1795_v63 = vshrl.u32 %v9082_v37, %v6466_v0 }
 0x162   : > { %v1793_v27 = vor.u32 %v1792_v8, %v1791_v9  ;;  %v1547_v6 = vsel %vm1464_vm13, %v1546_v58, %v1545_v20  ;;  %v1640_v23 = vshrl.u32 %v1622_v57, %v1638_v13  ;;  %v1797_v22 = vshll.u32 %v9082_v37, %v6446_v40 }
 0x163   : > { %v1643_v36 = vadd.s32 127, %v1642_v14  ;;  %v1550_v2 = vsel %vm6745_vm14, %v6248_v44, %v1547_v6  ;;  %v1729_v42 = vsel %vm1727_vm3, %v1728_v18, %v6816_v21  ;;  %v1796_v30 = vor.u32 %v1795_v63, %v1794_v7 }
 0x164   : > { %v1798_v11 = vshrl.u32 %v9041_v38, %v6466_v0  ;;  %5602 = vcosq.f32 %v1550_v2  ;;  %v1641_v20 = vor.u32 %v1640_v23, %v1639_v1  ;;  %v1730_v12 = vadd.s32 %v1729_v42, %v1725_v17 }
 0x165   : > { %v1644_v57 = vshll.u32 %v1643_v36, 23  ;;  %5604 = vsinq.f32 %v1550_v2  ;;  %v1782_v9 = vor.u32 8388608, %v1781_v56  ;;  %v1790_v40 = vshrl.u32 %v9080_v26, %v6466_v0 }
 0x166   : > { %v1799_v50 = vor.u32 %v1798_v11, %v1797_v22  ;;  %v1731_v58 = vadd.s32 536870912, %v1730_v12  ;;  %vm1806_vm13 = vcmp.lt.s32.totalorder %v6525_v31, 1  ;;  %vm1808_vm14 = vcmp.lt.s32.totalorder %v6525_v31, 3 }
 0x167   : > { %v1645_v8 = vor.u32 4788187, %v1644_v57  ;;  %vm1807_vm7 = vcmp.lt.s32.totalorder %v6525_v31, 2  ;;  %v1814_v13 = vsel %vm1806_vm13, %v1793_v27, %v1796_v30  ;;  %v1648_v56 = vcvt.s32.f32 %v1641_v20 }
 0x168   : > { %v1811_v21 = vsel %vm1809_vm11, %v1799_v50, 2102212464  ;;  %v1816_v17 = vsel %vm1808_vm14, %v1799_v50, %v6560_v16  ;;  %v6865_v14 = vshrl.u32 %v1731_v58, 30  ;;  %v1810_v18 = vsel %vm1806_vm13, %v1790_v40, %v1793_v27 }
 0x169   : > { %v1646_v1 = vand.u32 2147483647, %v1645_v8  ;;  %v1817_v0 = vsel %vm1807_vm7, %v1814_v13, %v1816_v17  ;;  %v1818_v7 = vsel %vm1806_vm13, %v1796_v30, %v1799_v50  ;;  %v1820_v63 = vsel %vm1808_vm14, %v6533_v60, %v6570_v35 }
 0x16a   : > { %v1822_v6 = vshll.u32 %v1782_v9, 8  ;;  %v1733_v36 = vshll.u32 %v6865_v14, 30  ;;  %v1812_v22 = vsel %vm1808_vm14, %v1796_v30, %v1811_v21  ;;  %v1821_v16 = vsel %vm1807_vm7, %v1818_v7, %v1820_v63 }
 0x16b   : > { %v1649_v23 = vmul.f32 %v1648_v56, %v1646_v1  ;;  %v6882_v27 = vshrl.u32 %v6668_v53, 5  ;;  %v6885_v60 = vshrl.u32 %v6717_v32, 5  ;;  %v6891_v30 = vor.u32 %v6792_v62, %v6727_v25 }
 0x16c   : > { %v6874_v2 = vmul.u32.u64.low %v1822_v6, %v1821_v16  ;;  %v6875_v42 = vmul.u32.u64.high %v1822_v6, %v1821_v16, %v6874_v2  ;;  %v6877_v11 = vmul.u32.u64.low %v1822_v6, %v1817_v0  ;;  %v6878_v20 = vmul.u32.u64.high %v1822_v6, %v1817_v0, %v6877_v11 }
 0x16d   : > { %v1650_v35 = vxor.u32 2147483648, %v1649_v23  ;;  %v6887_v57 = vsub.s32 %v1730_v12, %v1733_v36  ;;  %v2013_v9 = vor.u32 %v6796_v29, %v6735_v33  ;;  %v6896_v40 = vsub.s32 32, %v6740_v34 }
 0x16e   : > { %vm1672_vm11 = vcmp.lt.s32.totalorder %v6225_v3, 0  ;;  %v5603_v53 = vpop.eup %5602  ;;  %vm3220_vm1 = vcmp.lt.s32.totalorder %v6825_v54, 2  ;;  %v1659_v12 = vadd.s32 3, %v6823_v4  ;;  %v1813_v25 = vsel %vm1807_vm7, %v1810_v18, %v1812_v22 }
 0x16f   : > { %v1651_v32 = vsel %vm1568_vm8, %v1650_v35, %v1649_v23  ;;  %v1736_v50 = vsub.s32 0, %v6887_v57  ;;  %v5605_v62 = vpop.eup %5604  ;;  %v1562_v8 = vxor.u32 2147483648, %v5603_v53  ;;  %v1556_v21 = vand.u32 3, %v6827_v5 }
 0x170   : > { %v1654_v58 = vsel %vm6807_vm0, %v6388_v24, %v1651_v32  ;;  %vm1831_vm8 = vc.u32 %v6875_v42, %v6877_v11  ;;  %v1559_v13 = vxor.u32 2147483648, %v5605_v62  ;;  %v9095_v17 = vand.u32 2147483647, %v6225_v3 }
 0x171   : > { %5606 = vcosq.f32 %v1654_v58  ;;  %v5211_v31 = vmin.u32 %v1736_v50, %v6887_v57  ;;  %v1832_v56 = vadd.s32 1, %v6878_v20  ;;  %vm1554_vm13 = vweird.f32 %v6248_v44 }
 0x172   : > { %vm6914_vm3 = vcmp.le.f32.partialorder %v9095_v17, 0.7853982  ;;  %5608 = vsinq.f32 %v1654_v58  ;;  %vm3221_vm0 = vcmp.eq.s32.totalorder %v6825_v54, 0  ;;  %v3322_v51 = vand.u32 3, %v6823_v4 }
 0x173   : > { %v1829_v5 = vmul.u32 %v1822_v6, %v1813_v25  ;;  %v1660_v0 = vand.u32 3, %v1659_v12  ;;  %v1738_v18 = vclz %v5211_v31  ;;  %v1756_v7 = vsub.s32 4, %v6865_v14 }
 0x174   : > { %v1833_v63 = vsel %vm1831_vm8, %v1832_v56, %v6878_v20  ;;  %vm3224_vm14 = vcmp.eq.s32.totalorder %v6825_v54, 2  ;;  %vm1557_vm7 = vcmp.lt.s32.totalorder %v1556_v21, 2  ;;  %vm1558_vm15 = vcmp.eq.s32.totalorder %v1556_v21, 0 }
 0x175   : > { %v1834_v23 = vadd.s32 %v1833_v63, %v1829_v5  ;;  %v3223_v36 = vsel %vm3221_vm0, %v5603_v53, %v1559_v13  ;;  %v3226_v22 = vsel %vm3224_vm14, %v1562_v8, %v5605_v62  ;;  %vm1561_vm5 = vcmp.eq.s32.totalorder %v1556_v21, 2 }
 0x176   : > { %v5212_v16 = vadd.s32 4294967294, %v1738_v18  ;;  %vm3324_vm6 = vcmp.eq.s32.totalorder %v3322_v51, 0  ;;  %v1560_v2 = vsel %vm1558_vm15, %v5603_v53, %v1559_v13  ;;  %v1563_v35 = vsel %vm1561_vm5, %v1562_v8, %v5605_v62 }
 0x177   : > { %v1835_v4 = vadd.s32 536870912, %v1834_v23  ;;  %vm3323_vm10 = vcmp.lt.s32.totalorder %v3322_v51, 2  ;;  %vm3327_vm4 = vcmp.eq.s32.totalorder %v3322_v51, 2  ;;  %vm1661_vm12 = vcmp.lt.s32.totalorder %v1660_v0, 2 }
 0x178   : > { %vm5213_vm9 = vcmp.lt.s32.totalorder %v5212_v16, 0  ;;  %v1757_v6 = vsel %vm1672_vm11, %v1756_v7, %v6865_v14  ;;  %vm1658_vm8 = vweird.f32 %v6388_v24  ;;  %v3227_v20 = vsel %vm3220_vm1, %v3223_v36, %v3226_v22 }
 0x179   : > { %v1741_v32 = vsel %vm5213_vm9, 0, %v5212_v16  ;;  %v1836_v12 = vshrl.u32 %v1835_v4, 30  ;;  %v1878_v50 = vand.u32 2147483647, %v6251_v46  ;;  %v1564_v53 = vsel %vm1557_vm7, %v1560_v2, %v1563_v35 }
 0x17a   : > { %v1726_v25 = vadd.s32 %v6815_v59, %v6785_v15  ;;  %v1742_v62 = vsub.s32 32, %v1741_v32  ;;  %v1746_v8 = vsub.s32 4294967266, %v1741_v32  ;;  %vm1662_vm15 = vcmp.eq.s32.totalorder %v1660_v0, 0 }
 0x17b   : > { %vm1665_vm5 = vcmp.eq.s32.totalorder %v1660_v0, 2  ;;  %v6938_v14 = vsel %vm6914_vm3, 0, %v1757_v6  ;;  %v1837_v58 = vshll.u32 %v1836_v12, 30  ;;  %v5607_v54 = vpop.eup %5606  ;;  %v3228_v13 = vsel %vm1554_vm13, nan, %v3227_v20 }
 0x17c   : > { %v1743_v17 = vshll.u32 %v6887_v57, %v1741_v32  ;;  %v1744_v21 = vshrl.u32 %v1726_v25, %v1742_v62  ;;  %v1747_v31 = vadd.s32 127, %v1746_v8  ;;  %v5609_v56 = vpop.eup %5608  ;;  %v1666_v5 = vxor.u32 2147483648, %v5607_v54 }
 0x17d   : > { %v1565_v15 = vsel %vm1554_vm13, nan, %v1564_v53  ;;  %v6945_v59 = vsub.s32 %v1834_v23, %v1837_v58  ;;  %v6949_v18 = vand.u32 8388607, %v1878_v50  ;;  %v1663_v7 = vxor.u32 2147483648, %v5609_v56 }
 0x17e   : > { %v1745_v63 = vor.u32 %v1744_v21, %v1743_v17  ;;  %v1748_v36 = vshll.u32 %v1747_v31, 23  ;;  %v1895_v22 = vshll.u32 %v9080_v26, %v6362_v55  ;;  %v3329_v57 = vsel %vm3327_vm4, %v1666_v5, %v5609_v56 }
 0x17f   : > { %v1667_v16 = vsel %vm1665_vm5, %v1666_v5, %v5609_v56  ;;  %v1840_v2 = vsub.s32 0, %v6945_v59  ;;  %v1896_v44 = vshrl.u32 %v9081_v10, %v6402_v48  ;;  %v3326_v23 = vsel %vm3324_vm6, %v5607_v54, %v1663_v7 }
 0x180   : > { %v1664_v35 = vsel %vm1662_vm15, %v5607_v54, %v1663_v7  ;;  %v1749_v4 = vor.u32 4788187, %v1748_v36  ;;  %v1860_v6 = vsub.s32 4, %v1836_v12  ;;  %v3330_v20 = vsel %vm3323_vm10, %v3326_v23, %v3329_v57  ;;  %v9100_v23 = vld [vmem:[#allocation64_spill] sm:$0xff] }
 0x181   : > { %v1668_v32 = vsel %vm1661_vm12, %v1664_v35, %v1667_v16  ;;  %v5215_v53 = vmin.u32 %v1840_v2, %v6945_v59  ;;  %v1899_v25 = vshrl.u32 %v9082_v37, %v6402_v48  ;;  %v3331_v62 = vsel %vm1658_vm8, nan, %v3330_v20 }
 0x182   : > { %v1669_v8 = vsel %vm1658_vm8, nan, %v1668_v32  ;;  %v1750_v58 = vand.u32 2147483647, %v1749_v4  ;;  %v1752_v17 = vcvt.s32.f32 %v1745_v63  ;;  %v4786_v54 = vpack.c.bf16 %v3331_v62, %v3228_v13  ;;  %v9101_v4 = vld [vmem:[#allocation65_spill] sm:$0xff] }
 0x183   : > { %v4778_v21 = vpack.c.bf16 %v1669_v8, %v1565_v15  ;;  %v1842_v31 = vclz %v5215_v53  ;;  %v1898_v51 = vshll.u32 %v9081_v10, %v6362_v55  ;;  %vm1776_vm9 = vcmp.lt.s32.totalorder %v6288_v43, 0 }
 0x184   : > { %v1753_v0 = vmul.f32 %v1752_v17, %v1750_v58  ;;  %v1901_v56 = vshll.u32 %v9082_v37, %v6362_v55  ;;  %v1902_v5 = vshrl.u32 %v9041_v38, %v6402_v48  ;;  %5348 = vmatprep.subr.bf16.mxu1 %v4786_v54  ;;  %v1763_v7 = vadd.s32 3, %v6938_v14 }
 0x185   : > { %v5216_v24 = vadd.s32 4294967294, %v1842_v31  ;;  %v1897_v63 = vor.u32 %v1896_v44, %v1895_v22  ;;  %v1900_v13 = vor.u32 %v1899_v25, %v1898_v51  ;;  %vm2017_vm10 = vcmp.lt.s32.totalorder %v6882_v27, 4  ;;  %5349 = vmatpush3.bf16.msra.mxu1 %v4778_v21 }
 0x186   : > { %v1754_v15 = vxor.u32 2147483648, %v1753_v0  ;;  %vm6980_vm4 = vcmp.le.f32.partialorder %v1774_v41, 0.7853982  ;;  %v1830_v55 = vadd.s32 %v6877_v11, %v6875_v42  ;;  %v1894_v57 = vshrl.u32 %v9080_v26, %v6402_v48 }
 0x187   : > { %v1903_v16 = vor.u32 %v1902_v5, %v1901_v56  ;;  %vm5217_vm12 = vcmp.lt.s32.totalorder %v5216_v24, 0  ;;  %v1861_v22 = vsel %vm1776_vm9, %v1860_v6, %v1836_v12  ;;  %v1886_v2 = vor.u32 8388608, %v6949_v18  ;;  %v9102_v6 = vld [vmem:[#allocation55_spill] sm:$0xff] }
 0x188   : > { %vm1910_vm6 = vcmp.lt.s32.totalorder %v6399_v45, 1  ;;  %v1755_v41 = vsel %vm1672_vm11, %v1754_v15, %v1753_v0  ;;  %v1845_v44 = vsel %vm5217_vm12, 0, %v5216_v24  ;;  %vm1911_vm1 = vcmp.lt.s32.totalorder %v6399_v45, 2 }
 0x189   : > { %vm1912_vm13 = vcmp.lt.s32.totalorder %v6399_v45, 3  ;;  %v1758_v48 = vsel %vm6914_vm3, %v6225_v3, %v1755_v41  ;;  %v1846_v42 = vsub.s32 32, %v1845_v44  ;;  %v1850_v11 = vsub.s32 4294967266, %v1845_v44 }
 0x18a   : > { %v1918_v12 = vsel %vm1910_vm6, %v1897_v63, %v1900_v13  ;;  %5610 = vcosq.f32 %v1758_v48  ;;  %v1915_v18 = vsel %vm1913_vm2, %v1903_v16, 2102212464  ;;  %v1920_v35 = vsel %vm1912_vm13, %v1903_v16, %v9100_v23 }
 0x18b   : > { %v1924_v20 = vsel %vm1912_vm13, %v9102_v6, %v9101_v4  ;;  %v1847_v1 = vshll.u32 %v6945_v59, %v1845_v44  ;;  %v1848_v32 = vshrl.u32 %v1830_v55, %v1846_v42  ;;  %v1851_v53 = vadd.s32 127, %v1850_v11 }
 0x18c   : > { %v1914_v25 = vsel %vm1910_vm6, %v1894_v57, %v1897_v63  ;;  %5612 = vsinq.f32 %v1758_v48  ;;  %v1921_v62 = vsel %vm1911_vm1, %v1918_v12, %v1920_v35  ;;  %v1922_v8 = vsel %vm1910_vm6, %v1900_v13, %v1903_v16  ;;  %v9103_v57 = vld [vmem:[#allocation57_spill] sm:$0xff] }
 0x18d   : > { %v1926_v58 = vshll.u32 %v1886_v2, 8  ;;  %v1849_v17 = vor.u32 %v1848_v32, %v1847_v1  ;;  %v1852_v54 = vshll.u32 %v1851_v53, 23  ;;  %v1916_v21 = vsel %vm1912_vm13, %v1900_v13, %v1915_v18 }
 0x18e   : > { %v1925_v59 = vsel %vm1911_vm1, %v1922_v8, %v1924_v20  ;;  %v2023_v5 = vsel %vm2017_vm10, %v6891_v30, 920167782  ;;  %v1863_v63 = vsel %vm6980_vm4, 0, %v1861_v22  ;;  %v7034_v13 = vand.u32 3, %v6938_v14 }
 0x18f   : > { %v7021_v31 = vmul.u32.u64.low %v1926_v58, %v1925_v59  ;;  %v7022_v51 = vmul.u32.u64.high %v1926_v58, %v1925_v59, %v7021_v31  ;;  %v7024_v0 = vmul.u32.u64.low %v1926_v58, %v1921_v62  ;;  %v7025_v56 = vmul.u32.u64.high %v1926_v58, %v1921_v62, %v7024_v0 }
 0x190   : > { %v1853_v24 = vor.u32 4788187, %v1852_v54  ;;  %v2027_v15 = vsel %vm2017_vm10, %v2013_v9, 1326507024  ;;  %v1917_v55 = vsel %vm1911_vm1, %v1914_v25, %v1916_v21  ;;  %v1982_v16 = vand.u32 2147483647, %v9103_v57 }
 0x191   : > { %v2000_v2 = vshrl.u32 %v9081_v10, %v6723_v28  ;;  %v1856_v44 = vcvt.s32.f32 %v1849_v17  ;;  %v7046_v22 = vand.u32 3, %v1763_v7  ;;  %v2003_v14 = vshrl.u32 %v9082_v37, %v6723_v28 }
 0x192   : > { %v1854_v41 = vand.u32 2147483647, %v1853_v24  ;;  %v1867_v48 = vadd.s32 3, %v1863_v63  ;;  %vm1935_vm2 = vc.u32 %v7022_v51, %v7024_v0  ;;  %v1936_v33 = vadd.s32 1, %v7025_v56 }
 0x193   : > { %v1999_v45 = vshll.u32 %v9080_v26, %v6701_v61  ;;  %vm3430_vm11 = vcmp.eq.s32.totalorder %v7034_v13, 2  ;;  %v1933_v9 = vmul.u32 %v1926_v58, %v1917_v55  ;;  %v2002_v7 = vshll.u32 %v9081_v10, %v6701_v61 }
 0x194   : > { %v1857_v29 = vmul.f32 %v1856_v44, %v1854_v41  ;;  %v5611_v42 = vpop.eup %5610  ;;  %vm3427_vm3 = vcmp.eq.s32.totalorder %v7034_v13, 0  ;;  %v1937_v11 = vsel %vm1935_vm2, %v1936_v33, %v7025_v56  ;;  %v1989_v12 = vand.u32 8388607, %v1982_v16 }
 0x195   : > { %v2001_v18 = vor.u32 %v2000_v2, %v1999_v45  ;;  %v2006_v23 = vshrl.u32 %v9041_v38, %v6723_v28  ;;  %v1938_v4 = vadd.s32 %v1937_v11, %v1933_v9  ;;  %v2004_v6 = vor.u32 %v2003_v14, %v2002_v7 }
 0x196   : > { %v1858_v35 = vxor.u32 2147483648, %v1857_v29  ;;  %v2005_v20 = vshll.u32 %v9082_v37, %v6701_v61  ;;  %v5613_v1 = vpop.eup %5612  ;;  %v7066_v32 = vand.u32 3, %v1863_v63  ;;  %vm1766_vm0 = vcmp.eq.s32.totalorder %v7046_v22, 0 }
 0x197   : > { %vm1769_vm14 = vcmp.eq.s32.totalorder %v7046_v22, 2  ;;  %v7070_v53 = vand.u32 3, %v1867_v48  ;;  %v1770_v25 = vxor.u32 2147483648, %v5611_v42  ;;  %v1939_v8 = vadd.s32 536870912, %v1938_v4 }
 0x198   : > { %v1859_v62 = vsel %vm1776_vm9, %v1858_v35, %v1857_v29  ;;  %v2007_v58 = vor.u32 %v2006_v23, %v2005_v20  ;;  %v1990_v61 = vor.u32 8388608, %v1989_v12  ;;  %v1998_v54 = vshrl.u32 %v9080_v26, %v6723_v28 }
 0x199   : > { %v1862_v17 = vsel %vm6980_vm4, %v6288_v43, %v1859_v62  ;;  %vm2014_vm7 = vcmp.lt.s32.totalorder %v6882_v27, 1  ;;  %v1767_v21 = vxor.u32 2147483648, %v5613_v1  ;;  %v7080_v59 = vshrl.u32 %v1939_v8, 30 }
 0x19a   : > { %5614 = vcosq.f32 %v1862_v17  ;;  %v2022_v31 = vsel %vm2014_vm7, %v2001_v18, %v2004_v6  ;;  %vm2015_vm8 = vcmp.lt.s32.totalorder %v6882_v27, 2  ;;  %vm2016_vm15 = vcmp.lt.s32.totalorder %v6882_v27, 3 }
 0x19b   : > { %5616 = vsinq.f32 %v1862_v17  ;;  %v2018_v56 = vsel %vm2014_vm7, %v1998_v54, %v2001_v18  ;;  %v3432_v36 = vsel %vm3430_vm11, %v1770_v25, %v5613_v1  ;;  %v1941_v24 = vshll.u32 %v7080_v59, 30  ;;  %v9104_v17 = vld [vmem:[#allocation23_spill] sm:$0xff] }
 0x19c   : > { %v2019_v28 = vsel %vm2017_vm10, %v2007_v58, 2102212464  ;;  %v2024_v63 = vsel %vm2016_vm15, %v2007_v58, %v2023_v5  ;;  %v2026_v2 = vsel %vm2014_vm7, %v2004_v6, %v2007_v58  ;;  %v2028_v41 = vsel %vm2016_vm15, %v6891_v30, %v2027_v15 }
 0x19d   : > { %v2025_v55 = vsel %vm2015_vm8, %v2022_v31, %v2024_v63  ;;  %v2030_v44 = vshll.u32 %v1990_v61, 8  ;;  %v3429_v14 = vsel %vm3427_vm3, %v5611_v42, %v1767_v21  ;;  %v1771_v48 = vsel %vm1769_vm14, %v1770_v25, %v5613_v1 }
 0x19e   : > { %v7096_v33 = vsub.s32 %v1938_v4, %v1941_v24  ;;  %v2029_v45 = vsel %vm2015_vm8, %v2026_v2, %v2028_v41  ;;  %v1768_v5 = vsel %vm1766_vm0, %v5611_v42, %v1767_v21  ;;  %v2020_v29 = vsel %vm2016_vm15, %v2004_v6, %v2019_v28  ;;  %v9105_v21 = vld [vmem:[#allocation28_spill] sm:$0xff] }
 0x19f   : > { %v7102_v9 = vmul.u32.u64.low %v2030_v44, %v2029_v45  ;;  %v7103_v7 = vmul.u32.u64.high %v2030_v44, %v2029_v45, %v7102_v9  ;;  %vm1762_vm5 = vweird.f32 %v6225_v3  ;;  %vm1866_vm9 = vweird.f32 %v6288_v43 }
 0x1a0   : > { %v1944_v30 = vsub.s32 0, %v7096_v33  ;;  %v7107_v15 = vmul.u32.u64.low %v2030_v44, %v2025_v55  ;;  %v7108_v11 = vmul.u32.u64.high %v2030_v44, %v2025_v55, %v7107_v15  ;;  %vm3426_vm10 = vcmp.lt.s32.totalorder %v7034_v13, 2 }
 0x1a1   : > { %vm3529_vm4 = vcmp.lt.s32.totalorder %v7066_v32, 2  ;;  %vm3530_vm12 = vcmp.eq.s32.totalorder %v7066_v32, 0  ;;  %vm1765_vm6 = vcmp.lt.s32.totalorder %v7046_v22, 2  ;;  %vm2825_vm1 = vcmp.gt.s32.totalorder %v6729_v49, 0 }
 0x1a2   : > { %v3433_v42 = vsel %vm3426_vm10, %v3429_v14, %v3432_v36  ;;  %v1772_v12 = vsel %vm1765_vm6, %v1768_v5, %v1771_v48  ;;  %v5219_v18 = vmin.u32 %v1944_v30, %v7096_v33  ;;  %v2021_v23 = vsel %vm2015_vm8, %v2018_v56, %v2020_v29  ;;  %v9106_v36 = vld [vmem:[#allocation31_spill] sm:$0xff] }
 0x1a3   : > { %vm3533_vm13 = vcmp.eq.s32.totalorder %v7066_v32, 2  ;;  %vm1869_vm2 = vcmp.lt.s32.totalorder %v7070_v53, 2  ;;  %vm1870_vm11 = vcmp.eq.s32.totalorder %v7070_v53, 0  ;;  %vm2039_vm3 = vc.u32 %v7103_v7, %v7107_v15 }
 0x1a4   : > { %v5615_v13 = vpop.eup %5614  ;;  %vm1873_vm0 = vcmp.eq.s32.totalorder %v7070_v53, 2  ;;  %v1934_v22 = vadd.s32 %v7024_v0, %v7022_v51  ;;  %v1946_v35 = vclz %v5219_v18  ;;  %v2040_v4 = vadd.s32 1, %v7108_v11 }
 0x1a5   : > { %v5617_v27 = vpop.eup %5616  ;;  %v1874_v6 = vxor.u32 2147483648, %v5615_v13  ;;  %v3434_v20 = vsel %vm1762_vm5, nan, %v3433_v42  ;;  %v1773_v1 = vsel %vm1762_vm5, nan, %v1772_v12  ;;  %v2037_v25 = vmul.u32 %v2030_v44, %v2021_v23 }
 0x1a6   : > { %v1871_v62 = vxor.u32 2147483648, %v5617_v27  ;;  %v5220_v8 = vadd.s32 4294967294, %v1946_v35  ;;  %v2041_v58 = vsel %vm2039_vm3, %v2040_v4, %v7108_v11  ;;  %v2086_v61 = vand.u32 2147483647, %v9104_v17 }
 0x1a7   : > { %v3535_v51 = vsel %vm3533_vm13, %v1874_v6, %v5617_v27  ;;  %v1875_v0 = vsel %vm1873_vm0, %v1874_v6, %v5617_v27  ;;  %v2042_v54 = vadd.s32 %v2041_v58, %v2037_v25  ;;  %v2103_v31 = vshll.u32 %v9080_v26, %v9105_v21 }
 0x1a8   : > { %v3532_v56 = vsel %vm3530_vm12, %v5615_v13, %v1871_v62  ;;  %v1872_v3 = vsel %vm1870_vm11, %v5615_v13, %v1871_v62  ;;  %vm5221_vm14 = vcmp.lt.s32.totalorder %v5220_v8, 0  ;;  %v2104_v24 = vshrl.u32 %v9081_v10, %v9106_v36 }
 0x1a9   : > { %v3536_v28 = vsel %vm3529_vm4, %v3532_v56, %v3535_v51  ;;  %v1876_v63 = vsel %vm1869_vm2, %v1872_v3, %v1875_v0  ;;  %v1949_v55 = vsel %vm5221_vm14, 0, %v5220_v8  ;;  %v2043_v2 = vadd.s32 536870912, %v2042_v54 }
 0x1aa   : > { %v3537_v41 = vsel %vm1866_vm9, nan, %v3536_v28  ;;  %v1877_v44 = vsel %vm1866_vm9, nan, %v1876_v63  ;;  %v1950_v14 = vsub.s32 32, %v1949_v55  ;;  %v2106_v48 = vshll.u32 %v9081_v10, %v9105_v21 }
 0x1ab   : > { %v4787_v45 = vpack.c.bf16 %v3537_v41, %v3434_v20  ;;  %v1951_v5 = vshll.u32 %v7096_v33, %v1949_v55  ;;  %v1954_v32 = vsub.s32 4294967266, %v1949_v55  ;;  %v7156_v29 = vshrl.u32 %v2043_v2, 30  ;;  %v9112_v41 = vld [vmem:[#allocation43_spill] sm:$0xff] }
 0x1ac   : > { %v4779_v53 = vpack.c.bf16 %v1877_v44, %v1773_v1  ;;  %v1952_v9 = vshrl.u32 %v1934_v22, %v1950_v14  ;;  %v2107_v30 = vshrl.u32 %v9082_v37, %v9106_v36  ;;  %v2109_v11 = vshll.u32 %v9082_v37, %v9105_v21  ;;  %v9109_v21 = vld [vmem:[#allocation30_spill] sm:$0xff]  ;;  %v9113_v44 = vld [vmem:[#allocation39_spill] sm:$0xff] }
 0x1ad   : > { %v7165_v43 = vsel %vm2825_vm1, %v6729_v49, 0  ;;  %5350 = vmatprep.subr.bf16.mxu1 %v4787_v45  ;;  %v1955_v42 = vadd.s32 127, %v1954_v32  ;;  %v2045_v33 = vshll.u32 %v7156_v29, 30  ;;  %v2110_v12 = vshrl.u32 %v9041_v38, %v9106_v36 }
 0x1ae   : > { %v2424_v18 = vshll.u32 %v9041_v38, %v6740_v34  ;;  %5351 = vmatpush3.bf16.msra.mxu1 %v4779_v53  ;;  %v1953_v23 = vor.u32 %v1952_v9, %v1951_v5  ;;  %v1964_v13 = vsub.s32 4, %v7080_v59  ;;  %v2093_v22 = vand.u32 8388607, %v2086_v61 }
 0x1af   : > { %v1956_v35 = vshll.u32 %v1955_v42, 23  ;;  %v7175_v49 = vsub.s32 %v2042_v54, %v2045_v33  ;;  %v2108_v4 = vor.u32 %v2107_v30, %v2106_v48  ;;  %v2111_v27 = vor.u32 %v2110_v12, %v2109_v11  ;;  %v9114_v12 = vld [vmem:[#allocation35_spill] sm:$0xff] }
 0x1b0   : > { %v2425_v6 = vshrl.u32 %v9056_v39, %v6896_v40  ;;  %v7181_v20 = vshll.u32 %v9056_v39, %v6740_v34  ;;  %v7185_v1 = vshrl.u32 %v9057_v19, %v6896_v40  ;;  %v2105_v25 = vor.u32 %v2104_v24, %v2103_v31 }
 0x1b1   : > { %vm7189_vm7 = vcmp.le.f32.partialorder %v1878_v50, 0.7853982  ;;  %vm1880_vm8 = vcmp.lt.s32.totalorder %v6251_v46, 0  ;;  %v1957_v8 = vor.u32 4788187, %v1956_v35  ;;  %v2048_v58 = vsub.s32 0, %v7175_v49 }
 0x1b2   : > { %v1960_v51 = vcvt.s32.f32 %v1953_v23  ;;  %v1965_v0 = vsel %vm1880_vm8, %v1964_v13, %v7080_v59  ;;  %v2094_v54 = vor.u32 8388608, %v2093_v22  ;;  %vm2118_vm15 = vcmp.lt.s32.totalorder %v9109_v21, 1  ;;  %v9110_v59 = vld [vmem:[#allocation41_spill] sm:$0xff] }
 0x1b3   : > { %v1958_v31 = vand.u32 2147483647, %v1957_v8  ;;  %v5223_v56 = vmin.u32 %v2048_v58, %v7175_v49  ;;  %vm2120_vm5 = vcmp.lt.s32.totalorder %v9109_v21, 3  ;;  %v2130_v50 = vsel %vm2118_vm15, %v2108_v4, %v2111_v27 }
 0x1b4   : > { %v2102_v3 = vshrl.u32 %v9080_v26, %v9106_v36  ;;  %vm2119_vm9 = vcmp.lt.s32.totalorder %v9109_v21, 2  ;;  %v2126_v24 = vsel %vm2118_vm15, %v2105_v25, %v2108_v4  ;;  %v2128_v28 = vsel %vm2120_vm5, %v2111_v27, %v9110_v59 }
 0x1b5   : > { %v1961_v63 = vmul.f32 %v1960_v51, %v1958_v31  ;;  %v2050_v55 = vclz %v5223_v56  ;;  %vm9111_vm10 = vcmp.lt.s32.totalorder %v9109_v21, 4  ;;  %v2132_v14 = vsel %vm2120_vm5, %v9113_v44, %v9112_v41  ;;  %v9115_v56 = vld [vmem:[#allocation61_spill] sm:$0xff] }
 0x1b6   : > { %v2123_v2 = vsel %vm9111_vm10, %v2111_v27, 2102212464  ;;  %v7217_v36 = vor.u32 %v2425_v6, %v2424_v18  ;;  %v1967_v48 = vsel %vm7189_vm7, 0, %v1965_v0  ;;  %v2038_v45 = vadd.s32 %v7107_v15, %v7103_v7 }
 0x1b7   : > { %v2133_v5 = vsel %vm2119_vm9, %v2130_v50, %v2132_v14  ;;  %v1962_v32 = vxor.u32 2147483648, %v1961_v63  ;;  %v5224_v53 = vadd.s32 4294967294, %v2050_v55  ;;  %v2129_v9 = vsel %vm2119_vm9, %v2126_v24, %v2128_v28  ;;  %v9116_v24 = vld [vmem:[#allocation56_spill] sm:$0xff] }
 0x1b8   : > { %v2134_v30 = vshll.u32 %v2094_v54, 8  ;;  %v2068_v11 = vsub.s32 4, %v7156_v29  ;;  %v2122_v42 = vsel %vm2118_vm15, %v2102_v3, %v2105_v25  ;;  %v2124_v33 = vsel %vm2120_vm5, %v2108_v4, %v2123_v2 }
 0x1b9   : > { %v2190_v18 = vand.u32 2147483647, %v9114_v12  ;;  %v1963_v7 = vsel %vm1880_vm8, %v1962_v32, %v1961_v63  ;;  %vm5225_vm4 = vcmp.lt.s32.totalorder %v5224_v53, 0  ;;  %v2125_v25 = vsel %vm2119_vm9, %v2122_v42, %v2124_v33  ;;  %v9118_v42 = vld [vmem:[#allocation75_spill] sm:$0xff]  ;;  %v9119_v33 = vld [vmem:[#allocation72_spill] sm:$0xff] }
 0x1ba   : > { %v7235_v15 = vmul.u32.u64.low %v2134_v30, %v2133_v5  ;;  %v7236_v23 = vmul.u32.u64.high %v2134_v30, %v2133_v5, %v7235_v15  ;;  %v1966_v13 = vsel %vm7189_vm7, %v6251_v46, %v1963_v7  ;;  %v2053_v22 = vsel %vm5225_vm4, 0, %v5224_v53  ;;  %v9117_v53 = vld [vmem:[#allocation71_spill] sm:$0xff] }
 0x1bb   : > { %v7241_v35 = vmul.u32.u64.low %v2134_v30, %v2129_v9  ;;  %v7242_v27 = vmul.u32.u64.high %v2134_v30, %v2129_v9, %v7241_v35  ;;  %5618 = vcosq.f32 %v1966_v13  ;;  %v2054_v4 = vsub.s32 32, %v2053_v22 }
 0x1bc   : > { %v2058_v6 = vsub.s32 4294967266, %v2053_v22  ;;  %5620 = vsinq.f32 %v1966_v13  ;;  %vm1984_vm12 = vcmp.lt.s32.totalorder %v9103_v57, 0  ;;  %v2055_v8 = vshll.u32 %v7175_v49, %v2053_v22 }
 0x1bd   : > { %v1971_v58 = vadd.s32 3, %v1967_v48  ;;  %v2056_v51 = vshrl.u32 %v2038_v45, %v2054_v4  ;;  %vm2143_vm6 = vc.u32 %v7236_v23, %v7241_v35  ;;  %v2197_v0 = vand.u32 8388607, %v2190_v18 }
 0x1be   : > { %v2059_v62 = vadd.s32 127, %v2058_v6  ;;  %v2069_v54 = vsel %vm1984_vm12, %v2068_v11, %v7156_v29  ;;  %v2141_v21 = vmul.u32 %v2134_v30, %v2125_v25  ;;  %v2144_v31 = vadd.s32 1, %v7242_v27 }
 0x1bf   : > { %v2208_v50 = vshrl.u32 %v9081_v10, %v9115_v56  ;;  %v2057_v49 = vor.u32 %v2056_v51, %v2055_v8  ;;  %v2210_v59 = vshll.u32 %v9081_v10, %v9116_v24  ;;  %v2211_v28 = vshrl.u32 %v9082_v37, %v9115_v56 }
 0x1c0   : > { %v2060_v3 = vshll.u32 %v2059_v62, 23  ;;  %v2145_v63 = vsel %vm2143_vm6, %v2144_v31, %v7242_v27  ;;  %v2207_v55 = vshll.u32 %v9080_v26, %v9116_v24  ;;  %v2213_v29 = vshll.u32 %v9082_v37, %v9116_v24  ;;  %v9122_v62 = vld [vmem:[#allocation73_spill] sm:$0xff] }
 0x1c1   : > { %v2214_v2 = vshrl.u32 %v9041_v38, %v9115_v56  ;;  %v2146_v44 = vadd.s32 %v2145_v63, %v2141_v21  ;;  %v2198_v14 = vor.u32 8388608, %v2197_v0  ;;  %v2212_v45 = vor.u32 %v2211_v28, %v2210_v59 }
 0x1c2   : > { %v2061_v41 = vor.u32 4788187, %v2060_v3  ;;  %v2209_v5 = vor.u32 %v2208_v50, %v2207_v55  ;;  %vm2222_vm1 = vcmp.lt.s32.totalorder %v9117_v53, 1  ;;  %vm2224_vm13 = vcmp.lt.s32.totalorder %v9117_v53, 3 }
 0x1c3   : > { %v2215_v32 = vor.u32 %v2214_v2, %v2213_v29  ;;  %v2064_v30 = vcvt.s32.f32 %v2057_v49  ;;  %v2147_v11 = vadd.s32 536870912, %v2146_v44  ;;  %v2236_v7 = vsel %vm2224_vm13, %v9119_v33, %v9118_v42 }
 0x1c4   : > { %v2062_v9 = vand.u32 2147483647, %v2061_v41  ;;  %vm7278_vm2 = vcmp.le.f32.partialorder %v1982_v16, 0.7853982  ;;  %v3631_v13 = vand.u32 3, %v1967_v48  ;;  %v1972_v22 = vand.u32 3, %v1971_v58 }
 0x1c5   : > { %v2234_v27 = vsel %vm2222_vm1, %v2212_v45, %v2215_v32  ;;  %v5619_v4 = vpop.eup %5618  ;;  %v2071_v25 = vsel %vm7278_vm2, 0, %v2069_v54  ;;  %v7286_v8 = vshrl.u32 %v2147_v11, 30  ;;  %vm2223_vm11 = vcmp.lt.s32.totalorder %v9117_v53, 2 }
 0x1c6   : > { %v2065_v6 = vmul.f32 %v2064_v30, %v2062_v9  ;;  %v5621_v51 = vpop.eup %5620  ;;  %v2230_v16 = vsel %vm2222_vm1, %v2209_v5, %v2212_v45  ;;  %v2232_v48 = vsel %vm2224_vm13, %v2215_v32, %v9122_v62  ;;  %v2237_v58 = vsel %vm2223_vm11, %v2234_v27, %v2236_v7 }
 0x1c7   : > { %v2238_v0 = vshll.u32 %v2198_v14, 8  ;;  %v2149_v31 = vshll.u32 %v7286_v8, 30  ;;  %v2206_v54 = vshrl.u32 %v9080_v26, %v9115_v56  ;;  %vm9123_vm3 = vcmp.lt.s32.totalorder %v9117_v53, 4 }
 0x1c8   : > { %v2066_v21 = vxor.u32 2147483648, %v2065_v6  ;;  %v2227_v50 = vsel %vm9123_vm3, %v2215_v32, 2102212464  ;;  %vm3632_vm0 = vcmp.lt.s32.totalorder %v3631_v13, 2  ;;  %vm3633_vm14 = vcmp.eq.s32.totalorder %v3631_v13, 0 }
 0x1c9   : > { %v2075_v49 = vadd.s32 3, %v2071_v25  ;;  %v7301_v3 = vmul.u32.u64.low %v2238_v0, %v2237_v58  ;;  %v7302_v24 = vmul.u32.u64.high %v2238_v0, %v2237_v58, %v7301_v3  ;;  %v7306_v28 = vsub.s32 %v2146_v44, %v2149_v31 }
 0x1ca   : > { %v2067_v59 = vsel %vm1984_vm12, %v2066_v21, %v2065_v6  ;;  %v2226_v63 = vsel %vm2222_vm1, %v2206_v54, %v2209_v5  ;;  %v2233_v56 = vsel %vm2223_vm11, %v2230_v16, %v2232_v48  ;;  %v1975_v55 = vxor.u32 2147483648, %v5621_v51  ;;  %v9125_v3 = vld [vmem:[#allocation45_spill] sm:$0xff] }
 0x1cb   : > { %v1978_v29 = vxor.u32 2147483648, %v5619_v4  ;;  %v2070_v2 = vsel %vm7278_vm2, %v9103_v57, %v2067_v59  ;;  %vm2088_vm7 = vcmp.lt.s32.totalorder %v9104_v17, 0  ;;  %v2228_v41 = vsel %vm2224_vm13, %v2212_v45, %v2227_v50 }
 0x1cc   : > { %vm1970_vm8 = vweird.f32 %v6251_v46  ;;  %5622 = vcosq.f32 %v2070_v2  ;;  %vm3636_vm15 = vcmp.eq.s32.totalorder %v3631_v13, 2  ;;  %vm1974_vm5 = vcmp.eq.s32.totalorder %v1972_v22, 0 }
 0x1cd   : > { %v2152_v44 = vsub.s32 0, %v7306_v28  ;;  %5624 = vsinq.f32 %v2070_v2  ;;  %v3734_v14 = vand.u32 3, %v2071_v25  ;;  %vm1977_vm9 = vcmp.eq.s32.totalorder %v1972_v22, 2  ;;  %v9124_v25 = vld [vmem:[#allocation25_spill] sm:$0xff] }
 0x1ce   : > { %v7320_v5 = vmul.u32.u64.low %v2238_v0, %v2233_v56  ;;  %v7321_v32 = vmul.u32.u64.high %v2238_v0, %v2233_v56, %v7320_v5  ;;  %v2076_v9 = vand.u32 3, %v2075_v49  ;;  %v2229_v45 = vsel %vm2223_vm11, %v2226_v63, %v2228_v41 }
 0x1cf   : > { %v5227_v30 = vmin.u32 %v2152_v44, %v7306_v28  ;;  %v3635_v11 = vsel %vm3633_vm14, %v5619_v4, %v1975_v55  ;;  %v3638_v42 = vsel %vm3636_vm15, %v1978_v29, %v5621_v51  ;;  %v1976_v33 = vsel %vm1974_vm5, %v5619_v4, %v1975_v55  ;;  %v9126_v55 = vld [vmem:[#allocation51_spill] sm:$0xff] }
 0x1d0   : > { %v1979_v7 = vsel %vm1977_vm9, %v1978_v29, %v5621_v51  ;;  %vm1973_vm10 = vcmp.lt.s32.totalorder %v1972_v22, 2  ;;  %v2172_v27 = vsub.s32 4, %v7286_v8  ;;  %vm2247_vm4 = vc.u32 %v7302_v24, %v7320_v5 }
 0x1d1   : > { %v2154_v15 = vclz %v5227_v30  ;;  %vm3736_vm12 = vcmp.eq.s32.totalorder %v3734_v14, 0  ;;  %vm3739_vm6 = vcmp.eq.s32.totalorder %v3734_v14, 2  ;;  %v2248_v6 = vadd.s32 1, %v7321_v32 }
 0x1d2   : > { %v2294_v16 = vand.u32 2147483647, %v9124_v25  ;;  %v3639_v53 = vsel %vm3632_vm0, %v3635_v11, %v3638_v42  ;;  %vm3735_vm1 = vcmp.lt.s32.totalorder %v3734_v14, 2  ;;  %v1980_v62 = vsel %vm1973_vm10, %v1976_v33, %v1979_v7 }
 0x1d3   : > { %v5228_v48 = vadd.s32 4294967294, %v2154_v15  ;;  %v2245_v4 = vmul.u32 %v2238_v0, %v2229_v45  ;;  %vm2074_vm13 = vweird.f32 %v9103_v57  ;;  %vm2077_vm2 = vcmp.lt.s32.totalorder %v2076_v9, 2 }
 0x1d4   : > { %vm2078_vm11 = vcmp.eq.s32.totalorder %v2076_v9, 0  ;;  %vm2081_vm3 = vcmp.eq.s32.totalorder %v2076_v9, 2  ;;  %v2249_v22 = vsel %vm2247_vm4, %v2248_v6, %v7321_v32  ;;  %v2142_v51 = vadd.s32 %v7241_v35, %v7236_v23 }
 0x1d5   : > { %vm5229_vm14 = vcmp.lt.s32.totalorder %v5228_v48, 0  ;;  %v2173_v13 = vsel %vm2088_vm7, %v2172_v27, %v7286_v8  ;;  %v2250_v58 = vadd.s32 %v2249_v22, %v2245_v4  ;;  %v3640_v21 = vsel %vm1970_vm8, nan, %v3639_v53 }
 0x1d6   : > { %v1981_v0 = vsel %vm1970_vm8, nan, %v1980_v62  ;;  %v2157_v31 = vsel %vm5229_vm14, 0, %v5228_v48  ;;  %v7347_v54 = vand.u32 8388607, %v2294_v16  ;;  %v5623_v50 = vpop.eup %5622  ;;  %v2311_v59 = vshll.u32 %v9080_v26, %v9125_v3 }
 0x1d7   : > { %v2158_v49 = vsub.s32 32, %v2157_v31  ;;  %v2162_v23 = vsub.s32 4294967266, %v2157_v31  ;;  %v2251_v35 = vadd.s32 536870912, %v2250_v58  ;;  %v5625_v8 = vpop.eup %5624  ;;  %v2082_v63 = vxor.u32 2147483648, %v5623_v50 }
 0x1d8   : > { %v2159_v56 = vshll.u32 %v7306_v28, %v2157_v31  ;;  %v2312_v46 = vshrl.u32 %v9081_v10, %v9126_v55  ;;  %v2314_v29 = vshll.u32 %v9081_v10, %v9125_v3  ;;  %v2079_v2 = vxor.u32 2147483648, %v5625_v8 }
 0x1d9   : > { %v2160_v41 = vshrl.u32 %v2142_v51, %v2158_v49  ;;  %v2163_v44 = vadd.s32 127, %v2162_v23  ;;  %v7356_v32 = vshrl.u32 %v2251_v35, 30  ;;  %v3741_v30 = vsel %vm3739_vm6, %v2082_v63, %v5625_v8 }
 0x1da   : > { %v2083_v45 = vsel %vm2081_vm3, %v2082_v63, %v5625_v8  ;;  %v2315_v11 = vshrl.u32 %v9082_v37, %v9126_v55  ;;  %v2318_v28 = vshrl.u32 %v9041_v38, %v9126_v55  ;;  %v3738_v42 = vsel %vm3736_vm12, %v5623_v50, %v2079_v2 }
 0x1db   : > { %v2080_v33 = vsel %vm2078_vm11, %v5623_v50, %v2079_v2  ;;  %v2161_v7 = vor.u32 %v2160_v41, %v2159_v56  ;;  %v2164_v15 = vshll.u32 %v2163_v44, 23  ;;  %v3742_v27 = vsel %vm3735_vm1, %v3738_v42, %v3741_v30  ;;  %v9130_v56 = vld [vmem:[#allocation66_spill] sm:$0xff] }
 0x1dc   : > { %v2084_v6 = vsel %vm2077_vm2, %v2080_v33, %v2083_v45  ;;  %v2253_v53 = vshll.u32 %v7356_v32, 30  ;;  %v2317_v62 = vshll.u32 %v9082_v37, %v9125_v3  ;;  %v3743_v48 = vsel %vm2074_vm13, nan, %v3742_v27  ;;  %v9132_v45 = vld [vmem:[#allocation67_spill] sm:$0xff] }
 0x1dd   : > { %v2085_v4 = vsel %vm2074_vm13, nan, %v2084_v6  ;;  %v2165_v22 = vor.u32 4788187, %v2164_v15  ;;  %v2313_v51 = vor.u32 %v2312_v46, %v2311_v59  ;;  %v4788_v31 = vpack.c.bf16 %v3743_v48, %v3640_v21  ;;  %v9129_v59 = vld [vmem:[#allocation53_spill] sm:$0xff] }
 0x1de   : > { %v7375_v50 = vsub.s32 %v2250_v58, %v2253_v53  ;;  %v2316_v14 = vor.u32 %v2315_v11, %v2314_v29  ;;  %v2319_v49 = vor.u32 %v2318_v28, %v2317_v62  ;;  %v4780_v9 = vpack.c.bf16 %v2085_v4, %v1981_v0  ;;  %v9133_v11 = vld [vmem:[#allocation58_spill] sm:$0xff] }
 0x1df   : > { %vm7379_vm0 = vcmp.le.f32.partialorder %v2086_v61, 0.7853982  ;;  %v2166_v35 = vand.u32 2147483647, %v2165_v22  ;;  %v2168_v3 = vcvt.s32.f32 %v2161_v7  ;;  %v2429_v57 = vor.u32 %v7185_v1, %v7181_v20  ;;  %5352 = vmatprep.subr.bf16.mxu1 %v4788_v31 }
 0x1e0   : > { %vm2433_vm8 = vcmp.lt.s32.totalorder %v6885_v60, 4  ;;  %v2175_v58 = vsel %vm7379_vm0, 0, %v2173_v13  ;;  %v2256_v21 = vsub.s32 0, %v7375_v50  ;;  %5353 = vmatpush3.bf16.msra.mxu1 %v4780_v9  ;;  %v2302_v61 = vor.u32 8388608, %v7347_v54 }
 0x1e1   : > { %v2169_v0 = vmul.f32 %v2168_v3, %v2166_v35  ;;  %vm2326_vm15 = vcmp.lt.s32.totalorder %v9129_v59, 1  ;;  %vm2328_vm5 = vcmp.lt.s32.totalorder %v9129_v59, 3  ;;  %v7395_v8 = vsel %vm2433_vm8, %v7217_v36, 920167782  ;;  %v9136_v3 = vld [vmem:[#allocation60_spill] sm:$0xff] }
 0x1e2   : > { %v5231_v63 = vmin.u32 %v2256_v21, %v7375_v50  ;;  %v2334_v13 = vsel %vm2326_vm15, %v2313_v51, %v2316_v14  ;;  %v2336_v46 = vsel %vm2328_vm5, %v2319_v49, %v9130_v56  ;;  %v2179_v54 = vadd.s32 3, %v2175_v58 }
 0x1e3   : > { %v2170_v29 = vxor.u32 2147483648, %v2169_v0  ;;  %v2310_v2 = vshrl.u32 %v9080_v26, %v9126_v55  ;;  %vm2327_vm9 = vcmp.lt.s32.totalorder %v9129_v59, 2  ;;  %vm9131_vm10 = vcmp.lt.s32.totalorder %v9129_v59, 4 }
 0x1e4   : > { %v2258_v41 = vclz %v5231_v63  ;;  %v2331_v44 = vsel %vm9131_vm10, %v2319_v49, 2102212464  ;;  %v2338_v30 = vsel %vm2326_vm15, %v2316_v14, %v2319_v49  ;;  %v2340_v28 = vsel %vm2328_vm5, %v9133_v11, %v9132_v45 }
 0x1e5   : > { %v2171_v42 = vsel %vm2088_vm7, %v2170_v29, %v2169_v0  ;;  %v2276_v33 = vsub.s32 4, %v7356_v32  ;;  %v2337_v55 = vsel %vm2327_vm9, %v2334_v13, %v2336_v46  ;;  %v2342_v7 = vshll.u32 %v2302_v61, 8 }
 0x1e6   : > { %v2174_v15 = vsel %vm7379_vm0, %v9104_v17, %v2171_v42  ;;  %v5232_v27 = vadd.s32 4294967294, %v2258_v41  ;;  %v2330_v6 = vsel %vm2326_vm15, %v2310_v2, %v2313_v51  ;;  %v2341_v53 = vsel %vm2327_vm9, %v2338_v30, %v2340_v28 }
 0x1e7   : > { %5626 = vcosq.f32 %v2174_v15  ;;  %v2332_v62 = vsel %vm2328_vm5, %v2316_v14, %v2331_v44  ;;  %v7428_v48 = vmul.u32.u64.low %v2342_v7, %v2341_v53  ;;  %v7429_v4 = vmul.u32.u64.high %v2342_v7, %v2341_v53, %v7428_v48 }
 0x1e8   : > { %vm2192_vm7 = vcmp.lt.s32.totalorder %v9114_v12, 0  ;;  %vm5233_vm4 = vcmp.lt.s32.totalorder %v5232_v27, 0  ;;  %v7432_v22 = vmul.u32.u64.low %v2342_v7, %v2337_v55  ;;  %v7433_v31 = vmul.u32.u64.high %v2342_v7, %v2337_v55, %v7432_v22 }
 0x1e9   : > { %5628 = vsinq.f32 %v2174_v15  ;;  %vm7438_vm12 = vcmp.le.f32.partialorder %v2190_v18, 0.7853982  ;;  %v2246_v14 = vadd.s32 %v7320_v5, %v7302_v24  ;;  %v2261_v49 = vsel %vm5233_vm4, 0, %v5232_v27 }
 0x1ea   : > { %v2262_v9 = vsub.s32 32, %v2261_v49  ;;  %v2266_v23 = vsub.s32 4294967266, %v2261_v49  ;;  %v2333_v35 = vsel %vm2327_vm9, %v2330_v6, %v2332_v62  ;;  %v2398_v21 = vand.u32 2147483647, %v9136_v3 }
 0x1eb   : > { %v2277_v0 = vsel %vm2192_vm7, %v2276_v33, %v7356_v32  ;;  %v7450_v61 = vand.u32 3, %v2175_v58  ;;  %v7452_v18 = vand.u32 3, %v2179_v54  ;;  %vm2351_vm6 = vc.u32 %v7429_v4, %v7432_v22 }
 0x1ec   : > { %v2263_v24 = vshll.u32 %v7375_v50, %v2261_v49  ;;  %v2264_v5 = vshrl.u32 %v2246_v14, %v2262_v9  ;;  %v2267_v63 = vadd.s32 127, %v2266_v23  ;;  %v2352_v59 = vadd.s32 1, %v7433_v31 }
 0x1ed   : > { %v2349_v13 = vmul.u32 %v2342_v7, %v2333_v35  ;;  %v2415_v56 = vshll.u32 %v9080_v26, %v6740_v34  ;;  %v2416_v32 = vshrl.u32 %v9081_v10, %v6896_v40  ;;  %v2419_v58 = vshrl.u32 %v9082_v37, %v6896_v40 }
 0x1ee   : > { %v2265_v46 = vor.u32 %v2264_v5, %v2263_v24  ;;  %v2268_v29 = vshll.u32 %v2267_v63, 23  ;;  %v2353_v54 = vsel %vm2351_vm6, %v2352_v59, %v7433_v31  ;;  %v2405_v50 = vand.u32 8388607, %v2398_v21 }
 0x1ef   : > { %v2354_v2 = vadd.s32 %v2353_v54, %v2349_v13  ;;  %v2418_v41 = vshll.u32 %v9081_v10, %v6740_v34  ;;  %v2421_v44 = vshll.u32 %v9082_v37, %v6740_v34  ;;  %v2422_v30 = vshrl.u32 %v9041_v38, %v6896_v40 }
 0x1f0   : > { %v2443_v45 = vsel %vm2433_vm8, %v2429_v57, 1326507024  ;;  %v7479_v11 = vand.u32 31, %v7165_v43  ;;  %v2269_v28 = vor.u32 4788187, %v2268_v29  ;;  %v2279_v42 = vsel %vm7438_vm12, 0, %v2277_v0 }
 0x1f1   : > { %v5627_v33 = vpop.eup %5626  ;;  %v2355_v55 = vadd.s32 536870912, %v2354_v2  ;;  %v2417_v7 = vor.u32 %v2416_v32, %v2415_v56  ;;  %v2420_v34 = vor.u32 %v2419_v58, %v2418_v41  ;;  %v2423_v15 = vor.u32 %v2422_v30, %v2421_v44 }
 0x1f2   : > { %v2270_v27 = vand.u32 2147483647, %v2269_v28  ;;  %v2272_v6 = vcvt.s32.f32 %v2265_v46  ;;  %vm3839_vm1 = vcmp.eq.s32.totalorder %v7450_v61, 0  ;;  %vm3842_vm13 = vcmp.eq.s32.totalorder %v7450_v61, 2 }
 0x1f3   : > { %v5629_v20 = vpop.eup %5628  ;;  %v7485_v1 = vand.u32 3, %v2279_v42  ;;  %vm2182_vm2 = vcmp.eq.s32.totalorder %v7452_v18, 0  ;;  %vm2185_vm11 = vcmp.eq.s32.totalorder %v7452_v18, 2  ;;  %v2283_v57 = vadd.s32 3, %v2279_v42 }
 0x1f4   : > { %v7489_v53 = vshrl.u32 %v2355_v55, 30  ;;  %v2406_v62 = vor.u32 8388608, %v2405_v50  ;;  %v2186_v48 = vxor.u32 2147483648, %v5627_v33  ;;  %v2273_v31 = vmul.f32 %v2272_v6, %v2270_v27 }
 0x1f5   : > { %vm2430_vm3 = vcmp.lt.s32.totalorder %v6885_v60, 1  ;;  %vm2432_vm14 = vcmp.lt.s32.totalorder %v6885_v60, 3  ;;  %v2414_v49 = vshrl.u32 %v9080_v26, %v6896_v40  ;;  %v2183_v35 = vxor.u32 2147483648, %v5629_v20 }
 0x1f6   : > { %v2357_v14 = vshll.u32 %v7489_v53, 30  ;;  %v2438_v9 = vsel %vm2430_vm3, %v2417_v7, %v2420_v34  ;;  %v2440_v23 = vsel %vm2432_vm14, %v2423_v15, %v7395_v8  ;;  %v2274_v0 = vxor.u32 2147483648, %v2273_v31 }
 0x1f7   : > { %v2435_v24 = vsel %vm2433_vm8, %v2423_v15, 2102212464  ;;  %v2444_v5 = vsel %vm2432_vm14, %v7217_v36, %v2443_v45  ;;  %vm2431_vm0 = vcmp.lt.s32.totalorder %v6885_v60, 2  ;;  %v2434_v40 = vsel %vm2430_vm3, %v2414_v49, %v2417_v7  ;;  %v9137_v49 = vld [vmem:[#allocation24_spill] sm:$0xff] }
 0x1f8   : > { %v7506_v63 = vsub.s32 %v2354_v2, %v2357_v14  ;;  %v2446_v59 = vshll.u32 %v2406_v62, 8  ;;  %v2275_v8 = vsel %vm2192_vm7, %v2274_v0, %v2273_v31  ;;  %v3844_v13 = vsel %vm3842_vm13, %v2186_v48, %v5629_v20 }
 0x1f9   : > { %v2441_v56 = vsel %vm2431_vm0, %v2438_v9, %v2440_v23  ;;  %v2442_v36 = vsel %vm2430_vm3, %v2420_v34, %v2423_v15  ;;  %v2278_v32 = vsel %vm7438_vm12, %v9114_v12, %v2275_v8  ;;  %v2436_v46 = vsel %vm2432_vm14, %v2420_v34, %v2435_v24  ;;  %v9138_v23 = vld [vmem:[#allocation29_spill] sm:$0xff]  ;;  %v9139_v24 = vld [vmem:[#allocation34_spill] sm:$0xff] }
 0x1fa   : > { %v2360_v58 = vsub.s32 0, %v7506_v63  ;;  %v2445_v29 = vsel %vm2431_vm0, %v2442_v36, %v2444_v5  ;;  %5630 = vcosq.f32 %v2278_v32  ;;  %v3841_v54 = vsel %vm3839_vm1, %v5627_v33, %v2183_v35 }
 0x1fb   : > { %v7529_v50 = vmul.u32.u64.low %v2446_v59, %v2445_v29  ;;  %v7530_v2 = vmul.u32.u64.high %v2446_v59, %v2445_v29, %v7529_v50  ;;  %5632 = vsinq.f32 %v2278_v32  ;;  %vm2178_vm8 = vweird.f32 %v9104_v17 }
 0x1fc   : > { %v5235_v41 = vmin.u32 %v2360_v58, %v7506_v63  ;;  %v7533_v51 = vmul.u32.u64.low %v2446_v59, %v2441_v56  ;;  %v7534_v44 = vmul.u32.u64.high %v2446_v59, %v2441_v56, %v7533_v51  ;;  %v2184_v30 = vsel %vm2182_vm2, %v5627_v33, %v2183_v35 }
 0x1fd   : > { %v2187_v45 = vsel %vm2185_vm11, %v2186_v48, %v5629_v20  ;;  %v2284_v28 = vand.u32 3, %v2283_v57  ;;  %vm3838_vm15 = vcmp.lt.s32.totalorder %v7450_v61, 2  ;;  %vm2296_vm5 = vcmp.lt.s32.totalorder %v9124_v25, 0 }
 0x1fe   : > { %v2362_v42 = vclz %v5235_v41  ;;  %v2437_v55 = vsel %vm2431_vm0, %v2434_v40, %v2436_v46  ;;  %v3845_v7 = vsel %vm3838_vm15, %v3841_v54, %v3844_v13  ;;  %vm2181_vm9 = vcmp.lt.s32.totalorder %v7452_v18, 2 }
 0x1ff   : > { %v2380_v34 = vsub.s32 4, %v7489_v53  ;;  %vm2455_vm10 = vc.u32 %v7530_v2, %v7533_v51  ;;  %vm3942_vm7 = vcmp.eq.s32.totalorder %v7485_v1, 0  ;;  %vm3945_vm4 = vcmp.eq.s32.totalorder %v7485_v1, 2 }
 0x200   : > { %v2188_v33 = vsel %vm2181_vm9, %v2184_v30, %v2187_v45  ;;  %v5236_v61 = vadd.s32 4294967294, %v2362_v42  ;;  %v2456_v15 = vadd.s32 1, %v7534_v44  ;;  %vm3941_vm12 = vcmp.lt.s32.totalorder %v7485_v1, 2 }
 0x201   : > { %vm2285_vm6 = vcmp.lt.s32.totalorder %v2284_v28, 2  ;;  %vm2286_vm1 = vcmp.eq.s32.totalorder %v2284_v28, 0  ;;  %vm2289_vm13 = vcmp.eq.s32.totalorder %v2284_v28, 2  ;;  %v2453_v60 = vmul.u32 %v2446_v59, %v2437_v55 }
 0x202   : > { %vm2282_vm2 = vweird.f32 %v9114_v12  ;;  %v3846_v18 = vsel %vm2178_vm8, nan, %v3845_v7  ;;  %v2350_v27 = vadd.s32 %v7432_v22, %v7429_v4  ;;  %vm5237_vm11 = vcmp.lt.s32.totalorder %v5236_v61, 0 }
 0x203   : > { %v2457_v6 = vsel %vm2455_vm10, %v2456_v15, %v7534_v44  ;;  %v2189_v20 = vsel %vm2178_vm8, nan, %v2188_v33  ;;  %v2365_v57 = vsel %vm5237_vm11, 0, %v5236_v61  ;;  %v2381_v62 = vsel %vm2296_vm5, %v2380_v34, %v7489_v53 }
 0x204   : > { %v2458_v48 = vadd.s32 %v2457_v6, %v2453_v60  ;;  %v2366_v31 = vsub.s32 32, %v2365_v57  ;;  %v2370_v14 = vsub.s32 4294967266, %v2365_v57  ;;  %v2502_v9 = vand.u32 2147483647, %v9137_v49  ;;  %v5631_v4 = vpop.eup %5630 }
 0x205   : > { %v2519_v35 = vshll.u32 %v9080_v26, %v9138_v23  ;;  %v2367_v22 = vshll.u32 %v7506_v63, %v2365_v57  ;;  %v2520_v17 = vshrl.u32 %v9081_v10, %v9139_v24  ;;  %v2522_v5 = vshll.u32 %v9081_v10, %v9138_v23  ;;  %v5633_v40 = vpop.eup %5632 }
 0x206   : > { %v2459_v0 = vadd.s32 536870912, %v2458_v48  ;;  %v2290_v53 = vxor.u32 2147483648, %v5631_v4  ;;  %v2368_v59 = vshrl.u32 %v2350_v27, %v2366_v31  ;;  %v2371_v8 = vadd.s32 127, %v2370_v14 }
 0x207   : > { %v2523_v13 = vshrl.u32 %v9082_v37, %v9139_v24  ;;  %v2287_v56 = vxor.u32 2147483648, %v5633_v40  ;;  %v2525_v63 = vshll.u32 %v9082_v37, %v9138_v23  ;;  %v2526_v32 = vshrl.u32 %v9041_v38, %v9139_v24  ;;  %v9142_v23 = vld [vmem:[#allocation32_spill] sm:$0xff] }
 0x208   : > { %v7575_v36 = vshrl.u32 %v2459_v0, 30  ;;  %v3947_v58 = vsel %vm3945_vm4, %v2290_v53, %v5633_v40  ;;  %v2291_v46 = vsel %vm2289_vm13, %v2290_v53, %v5633_v40  ;;  %v2369_v29 = vor.u32 %v2368_v59, %v2367_v22  ;;  %v9143_v0 = vld [vmem:[#allocation47_spill] sm:$0xff] }
 0x209   : > { %v2372_v54 = vshll.u32 %v2371_v8, 23  ;;  %v3944_v50 = vsel %vm3942_vm7, %v5631_v4, %v2287_v56  ;;  %v2288_v41 = vsel %vm2286_vm1, %v5631_v4, %v2287_v56  ;;  %v2509_v30 = vand.u32 8388607, %v2502_v9 }
 0x20a   : > { %v2461_v44 = vshll.u32 %v7575_v36, 30  ;;  %v3948_v45 = vsel %vm3941_vm12, %v3944_v50, %v3947_v58  ;;  %v2292_v42 = vsel %vm2285_vm6, %v2288_v41, %v2291_v46  ;;  %v2521_v7 = vor.u32 %v2520_v17, %v2519_v35 }
 0x20b   : > { %v2373_v55 = vor.u32 4788187, %v2372_v54  ;;  %v3949_v34 = vsel %vm2282_vm2, nan, %v3948_v45  ;;  %v2293_v33 = vsel %vm2282_vm2, nan, %v2292_v42  ;;  %v2524_v15 = vor.u32 %v2523_v13, %v2522_v5 }
 0x20c   : > { %v7597_v61 = vsub.s32 %v2458_v48, %v2461_v44  ;;  %v4789_v60 = vpack.c.bf16 %v3949_v34, %v3846_v18  ;;  %v2376_v6 = vcvt.s32.f32 %v2369_v29  ;;  %v2527_v57 = vor.u32 %v2526_v32, %v2525_v63  ;;  %v9145_v63 = vld [vmem:[#allocation48_spill] sm:$0xff] }
 0x20d   : > { %v2374_v27 = vand.u32 2147483647, %v2373_v55  ;;  %v7601_v1 = vshll.u32 %v9056_v39, %v6616_v47  ;;  %v4781_v28 = vpack.c.bf16 %v2293_v33, %v2189_v20  ;;  %vm7605_vm3 = vcmp.le.f32.partialorder %v2294_v16, 0.7853982  ;;  %v9146_v32 = vld [vmem:[#allocation40_spill] sm:$0xff] }
 0x20e   : > { %v2464_v12 = vsub.s32 0, %v7597_v61  ;;  %v7611_v48 = vshrl.u32 %v7165_v43, 5  ;;  %5354 = vmatprep.subr.bf16.mxu1 %v4789_v60  ;;  %v2383_v14 = vsel %vm7605_vm3, 0, %v2381_v62  ;;  %vm2534_vm14 = vcmp.lt.s32.totalorder %v9142_v23, 1 }
 0x20f   : > { %v2377_v18 = vmul.f32 %v2376_v6, %v2374_v27  ;;  %5355 = vmatpush3.bf16.msra.mxu1 %v4781_v28  ;;  %v2510_v35 = vor.u32 8388608, %v2509_v30  ;;  %vm2536_vm0 = vcmp.lt.s32.totalorder %v9142_v23, 3  ;;  %v2542_v16 = vsel %vm2534_vm14, %v2521_v7, %v2524_v15 }
 0x210   : > { %v5239_v20 = vmin.u32 %v2464_v12, %v7597_v61  ;;  %v7621_v4 = vsub.s32 32, %v7479_v11  ;;  %v2518_v22 = vshrl.u32 %v9080_v26, %v9139_v24  ;;  %v2544_v62 = vsel %vm2536_vm0, %v2527_v57, %v9143_v0 }
 0x211   : > { %v2378_v43 = vxor.u32 2147483648, %v2377_v18  ;;  %vm2535_vm8 = vcmp.lt.s32.totalorder %v9142_v23, 2  ;;  %vm9144_vm15 = vcmp.lt.s32.totalorder %v9142_v23, 4  ;;  %v2546_v40 = vsel %vm2534_vm14, %v2524_v15, %v2527_v57 }
 0x212   : > { %v2466_v17 = vclz %v5239_v20  ;;  %v2539_v5 = vsel %vm9144_vm15, %v2527_v57, 2102212464  ;;  %v7635_v53 = vshll.u32 %v9041_v38, %v7479_v11  ;;  %v2387_v59 = vadd.s32 3, %v2383_v14 }
 0x213   : > { %v2379_v24 = vsel %vm2296_vm5, %v2378_v43, %v2377_v18  ;;  %v2545_v8 = vsel %vm2535_vm8, %v2542_v16, %v2544_v62  ;;  %v2548_v58 = vsel %vm2536_vm0, %v9146_v32, %v9145_v63  ;;  %v2550_v46 = vshll.u32 %v2510_v35, 8  ;;  %v9150_v18 = vld [vmem:[#allocation70_spill] sm:$0xff] }
 0x214   : > { %v2382_v13 = vsel %vm7605_vm3, %v9124_v25, %v2379_v24  ;;  %v5240_v56 = vadd.s32 4294967294, %v2466_v17  ;;  %v2538_v29 = vsel %vm2534_vm14, %v2518_v22, %v2521_v7  ;;  %v2540_v54 = vsel %vm2536_vm0, %v2524_v15, %v2539_v5  ;;  %v9151_v43 = vld [vmem:[#allocation62_spill] sm:$0xff] }
 0x215   : > { %5634 = vcosq.f32 %v2382_v13  ;;  %v2549_v50 = vsel %vm2535_vm8, %v2546_v40, %v2548_v58  ;;  %v2484_v45 = vsub.s32 4, %v7575_v36  ;;  %vm2400_vm9 = vcmp.lt.s32.totalorder %v9136_v3, 0 }
 0x216   : > { %5636 = vsinq.f32 %v2382_v13  ;;  %vm5241_vm5 = vcmp.lt.s32.totalorder %v5240_v56, 0  ;;  %v7654_v41 = vmul.u32.u64.low %v2550_v46, %v2549_v50  ;;  %v7655_v44 = vmul.u32.u64.high %v2550_v46, %v2549_v50, %v7654_v41 }
 0x217   : > { %v2469_v30 = vsel %vm5241_vm5, 0, %v5240_v56  ;;  %v7658_v42 = vmul.u32.u64.low %v2550_v46, %v2545_v8  ;;  %v7659_v55 = vmul.u32.u64.high %v2550_v46, %v2545_v8, %v7658_v42  ;;  %v2454_v7 = vadd.s32 %v7533_v51, %v7530_v2  ;;  %v9149_v51 = vld [vmem:[#allocation37_spill] sm:$0xff] }
 0x218   : > { %v2470_v34 = vsub.s32 32, %v2469_v30  ;;  %v2474_v33 = vsub.s32 4294967266, %v2469_v30  ;;  %vm7667_vm10 = vcmp.le.f32.partialorder %v2398_v21, 0.7853982  ;;  %v7671_v60 = vand.u32 3, %v2383_v14 }
 0x219   : > { %v7673_v27 = vand.u32 3, %v2387_v59  ;;  %v2541_v6 = vsel %vm2535_vm8, %v2538_v29, %v2540_v54  ;;  %v2471_v57 = vshll.u32 %v7597_v61, %v2469_v30  ;;  %vm2559_vm7 = vc.u32 %v7655_v44, %v7658_v42 }
 0x21a   : > { %v2472_v28 = vshrl.u32 %v2454_v7, %v2470_v34  ;;  %v2475_v31 = vadd.s32 127, %v2474_v33  ;;  %v2485_v21 = vsel %vm2400_vm9, %v2484_v45, %v7575_v36  ;;  %v2560_v2 = vadd.s32 1, %v7659_v55 }
 0x21b   : > { %v2606_v12 = vand.u32 2147483647, %v9149_v51  ;;  %v2624_v14 = vshrl.u32 %v9081_v10, %v9150_v18  ;;  %v2557_v35 = vmul.u32 %v2550_v46, %v2541_v6  ;;  %v2627_v61 = vshrl.u32 %v9082_v37, %v9150_v18 }
 0x21c   : > { %v2473_v23 = vor.u32 %v2472_v28, %v2471_v57  ;;  %v2476_v20 = vshll.u32 %v2475_v31, 23  ;;  %v2561_v16 = vsel %vm2559_vm7, %v2560_v2, %v7659_v55  ;;  %v2623_v22 = vshll.u32 %v9080_v26, %v9151_v43  ;;  %v9152_v57 = vld [vmem:[#allocation76_spill] sm:$0xff] }
 0x21d   : > { %v2626_v36 = vshll.u32 %v9081_v10, %v9151_v43  ;;  %v2630_v0 = vshrl.u32 %v9041_v38, %v9150_v18  ;;  %v2487_v17 = vsel %vm7667_vm10, 0, %v2485_v21  ;;  %v2562_v5 = vadd.s32 %v2561_v16, %v2557_v35  ;;  %v9154_v35 = vld [vmem:[#allocation77_spill] sm:$0xff] }
 0x21e   : > { %v2477_v62 = vor.u32 4788187, %v2476_v20  ;;  %v2629_v40 = vshll.u32 %v9082_v37, %v9151_v43  ;;  %vm4045_vm4 = vcmp.eq.s32.totalorder %v7671_v60, 0  ;;  %vm4048_vm12 = vcmp.eq.s32.totalorder %v7671_v60, 2 }
 0x21f   : > { %v5635_v24 = vpop.eup %5634  ;;  %v2613_v59 = vand.u32 8388607, %v2606_v12  ;;  %v2625_v8 = vor.u32 %v2624_v14, %v2623_v22  ;;  %v2628_v13 = vor.u32 %v2627_v61, %v2626_v36  ;;  %v2480_v32 = vcvt.s32.f32 %v2473_v23  ;;  %v9155_v61 = vld [vmem:[#allocation74_spill] sm:$0xff] }
 0x220   : > { %v5637_v56 = vpop.eup %5636  ;;  %v2478_v63 = vand.u32 2147483647, %v2477_v62  ;;  %v2563_v58 = vadd.s32 536870912, %v2562_v5  ;;  %v2631_v46 = vor.u32 %v2630_v0, %v2629_v40  ;;  %v7704_v29 = vand.u32 3, %v2487_v17 }
 0x221   : > { %vm2390_vm6 = vcmp.eq.s32.totalorder %v7673_v27, 0  ;;  %vm2393_vm1 = vcmp.eq.s32.totalorder %v7673_v27, 2  ;;  %v2491_v54 = vadd.s32 3, %v2487_v17  ;;  %v2622_v50 = vshrl.u32 %v9080_v26, %v9150_v18 }
 0x222   : > { %v2394_v41 = vxor.u32 2147483648, %v5635_v24  ;;  %v2481_v30 = vmul.f32 %v2480_v32, %v2478_v63  ;;  %v7710_v45 = vshrl.u32 %v2563_v58, 30  ;;  %vm2638_vm13 = vcmp.lt.s32.totalorder %v6546_v52, 1 }
 0x223   : > { %v2391_v55 = vxor.u32 2147483648, %v5637_v56  ;;  %v2614_v7 = vor.u32 8388608, %v2613_v59  ;;  %vm2640_vm2 = vcmp.lt.s32.totalorder %v6546_v52, 3  ;;  %v2646_v34 = vsel %vm2638_vm13, %v2625_v8, %v2628_v13 }
 0x224   : > { %v2482_v33 = vxor.u32 2147483648, %v2481_v30  ;;  %v2565_v6 = vshll.u32 %v7710_v45, 30  ;;  %v2648_v28 = vsel %vm2640_vm2, %v2631_v46, %v9152_v57  ;;  %v2650_v31 = vsel %vm2638_vm13, %v2628_v13, %v2631_v46 }
 0x225   : > { %v7718_v21 = vand.u32 3, %v2491_v54  ;;  %vm2639_vm11 = vcmp.lt.s32.totalorder %v6546_v52, 2  ;;  %v2642_v2 = vsel %vm2638_vm13, %v2622_v50, %v2625_v8  ;;  %vm9153_vm3 = vcmp.lt.s32.totalorder %v6546_v52, 4 }
 0x226   : > { %v2643_v18 = vsel %vm9153_vm3, %v2631_v46, 2102212464  ;;  %v2483_v14 = vsel %vm2400_vm9, %v2482_v33, %v2481_v30  ;;  %v4050_v23 = vsel %vm4048_vm12, %v2394_v41, %v5637_v56  ;;  %v7727_v20 = vsub.s32 %v2562_v5, %v2565_v6  ;;  %v9156_v30 = vld [vmem:[#allocation27_spill] sm:$0xff] }
 0x227   : > { %v2652_v16 = vsel %vm2640_vm2, %v9155_v61, %v9154_v35  ;;  %v2486_v43 = vsel %vm7667_vm10, %v9136_v3, %v2483_v14  ;;  %v2649_v22 = vsel %vm2639_vm11, %v2646_v34, %v2648_v28  ;;  %v2654_v0 = vshll.u32 %v2614_v7, 8  ;;  %v9157_v14 = vld [vmem:[#allocation46_spill] sm:$0xff] }
 0x228   : > { %v2653_v36 = vsel %vm2639_vm11, %v2650_v31, %v2652_v16  ;;  %5638 = vcosq.f32 %v2486_v43  ;;  %v4047_v62 = vsel %vm4045_vm4, %v5635_v24, %v2391_v55  ;;  %v2395_v17 = vsel %vm2393_vm1, %v2394_v41, %v5637_v56 }
 0x229   : > { %v2568_v5 = vsub.s32 0, %v7727_v20  ;;  %5640 = vsinq.f32 %v2486_v43  ;;  %v2644_v15 = vsel %vm2640_vm2, %v2628_v13, %v2643_v18  ;;  %v2392_v8 = vsel %vm2390_vm6, %v5635_v24, %v2391_v55 }
 0x22a   : > { %v7747_v40 = vmul.u32.u64.low %v2654_v0, %v2653_v36  ;;  %v7748_v59 = vmul.u32.u64.high %v2654_v0, %v2653_v36, %v7747_v40  ;;  %v7753_v32 = vmul.u32.u64.low %v2654_v0, %v2649_v22  ;;  %v7754_v58 = vmul.u32.u64.high %v2654_v0, %v2649_v22, %v7753_v32 }
 0x22b   : > { %v5243_v63 = vmin.u32 %v2568_v5, %v7727_v20  ;;  %v7759_v56 = vshrl.u32 %v9056_v39, %v7621_v4  ;;  %v7763_v46 = vshll.u32 %v9056_v39, %v7479_v11  ;;  %v7767_v13 = vshrl.u32 %v9057_v19, %v7621_v4 }
 0x22c   : > { %vm2386_vm14 = vweird.f32 %v9124_v25  ;;  %vm4044_vm0 = vcmp.lt.s32.totalorder %v7671_v60, 2  ;;  %vm2389_vm8 = vcmp.lt.s32.totalorder %v7673_v27, 2  ;;  %v2645_v54 = vsel %vm2639_vm11, %v2642_v2, %v2644_v15 }
 0x22d   : > { %v2570_v24 = vclz %v5243_v63  ;;  %v4051_v50 = vsel %vm4044_vm0, %v4047_v62, %v4050_v23  ;;  %vm4148_vm15 = vcmp.eq.s32.totalorder %v7704_v29, 0  ;;  %v2396_v41 = vsel %vm2389_vm8, %v2392_v8, %v2395_v17  ;;  %v9158_v23 = vld [vmem:[#allocation52_spill] sm:$0xff] }
 0x22e   : > { %vm2663_vm5 = vc.u32 %v7748_v59, %v7753_v32  ;;  %v2710_v55 = vand.u32 2147483647, %v9156_v30  ;;  %vm4147_vm9 = vcmp.lt.s32.totalorder %v7704_v29, 2  ;;  %vm4151_vm10 = vcmp.eq.s32.totalorder %v7704_v29, 2 }
 0x22f   : > { %vm2493_vm7 = vcmp.lt.s32.totalorder %v7718_v21, 2  ;;  %v5244_v60 = vadd.s32 4294967294, %v2570_v24  ;;  %v2664_v27 = vadd.s32 1, %v7754_v58  ;;  %vm2490_vm4 = vweird.f32 %v9136_v3 }
 0x230   : > { %vm2494_vm12 = vcmp.eq.s32.totalorder %v7718_v21, 0  ;;  %vm2497_vm6 = vcmp.eq.s32.totalorder %v7718_v21, 2  ;;  %v2558_v52 = vadd.s32 %v7658_v42, %v7655_v44  ;;  %v2661_v7 = vmul.u32 %v2654_v0, %v2645_v54 }
 0x231   : > { %v4052_v34 = vsel %vm2386_vm14, nan, %v4051_v50  ;;  %v2397_v33 = vsel %vm2386_vm14, nan, %v2396_v41  ;;  %vm5245_vm1 = vcmp.lt.s32.totalorder %v5244_v60, 0  ;;  %v2665_v6 = vsel %vm2663_vm5, %v2664_v27, %v7754_v58 }
 0x232   : > { %vm2504_vm13 = vcmp.lt.s32.totalorder %v9137_v49, 0  ;;  %v2573_v57 = vsel %vm5245_vm1, 0, %v5244_v60  ;;  %v2588_v28 = vsub.s32 4, %v7710_v45  ;;  %v2666_v31 = vadd.s32 %v2665_v6, %v2661_v7  ;;  %v5639_v44 = vpop.eup %5638 }
 0x233   : > { %v7796_v2 = vand.u32 8388607, %v2710_v55  ;;  %v2574_v42 = vsub.s32 32, %v2573_v57  ;;  %v2578_v18 = vsub.s32 4294967266, %v2573_v57  ;;  %v2727_v25 = vshll.u32 %v9080_v26, %v9157_v14  ;;  %v5641_v61 = vpop.eup %5640 }
 0x234   : > { %v2728_v35 = vshrl.u32 %v9081_v10, %v9158_v23  ;;  %v2498_v16 = vxor.u32 2147483648, %v5639_v44  ;;  %v2667_v43 = vadd.s32 536870912, %v2666_v31  ;;  %v2730_v22 = vshll.u32 %v9081_v10, %v9157_v14 }
 0x235   : > { %v2731_v36 = vshrl.u32 %v9082_v37, %v9158_v23  ;;  %v2495_v0 = vxor.u32 2147483648, %v5641_v61  ;;  %v2575_v62 = vshll.u32 %v7727_v20, %v2573_v57  ;;  %v2576_v17 = vshrl.u32 %v2558_v52, %v2574_v42 }
 0x236   : > { %v2579_v5 = vadd.s32 127, %v2578_v18  ;;  %v4153_v15 = vsel %vm4151_vm10, %v2498_v16, %v5641_v61  ;;  %v2499_v40 = vsel %vm2497_vm6, %v2498_v16, %v5641_v61  ;;  %v2668_v8 = vshrl.u32 %v2667_v43, 30 }
 0x237   : > { %v2734_v63 = vshrl.u32 %v9041_v38, %v9158_v23  ;;  %v4150_v58 = vsel %vm4148_vm15, %v5639_v44, %v2495_v0  ;;  %v2496_v24 = vsel %vm2494_vm12, %v5639_v44, %v2495_v0  ;;  %v2577_v54 = vor.u32 %v2576_v17, %v2575_v62 }
 0x238   : > { %v2580_v20 = vshll.u32 %v2579_v5, 23  ;;  %v4154_v50 = vsel %vm4147_vm9, %v4150_v58, %v4153_v15  ;;  %v2500_v41 = vsel %vm2493_vm7, %v2496_v24, %v2499_v40  ;;  %v2669_v60 = vshll.u32 %v2668_v8, 30  ;;  %v9166_v5 = vld [vmem:[#allocation69_spill] sm:$0xff]  ;;  %v9167_v15 = vld [vmem:[#allocation59_spill] sm:$0xff] }
 0x239   : > { %v2733_v27 = vshll.u32 %v9082_v37, %v9157_v14  ;;  %v4155_v52 = vsel %vm2490_vm4, nan, %v4154_v50  ;;  %v2501_v7 = vsel %vm2490_vm4, nan, %v2500_v41  ;;  %v2729_v57 = vor.u32 %v2728_v35, %v2727_v25  ;;  %v9164_v35 = vld [vmem:[#allocation68_spill] sm:$0xff] }
 0x23a   : > { %v2581_v6 = vor.u32 4788187, %v2580_v20  ;;  %v4790_v44 = vpack.c.bf16 %v4155_v52, %v4052_v34  ;;  %v7827_v42 = vsub.s32 %v2666_v31, %v2669_v60  ;;  %v2732_v29 = vor.u32 %v2731_v36, %v2730_v22  ;;  %v9168_v34 = vld [vmem:[#allocation63_spill] sm:$0xff] }
 0x23b   : > { %v2735_v18 = vor.u32 %v2734_v63, %v2733_v27  ;;  %v4782_v61 = vpack.c.bf16 %v2501_v7, %v2397_v33  ;;  %v2584_v16 = vcvt.s32.f32 %v2577_v54  ;;  %v2589_v14 = vsel %vm2504_vm13, %v2588_v28, %v7710_v45  ;;  %v9161_v28 = vld [vmem:[#allocation54_spill] sm:$0xff] }
 0x23c   : > { %v2582_v21 = vand.u32 2147483647, %v2581_v6  ;;  %v7834_v43 = vor.u32 %v7759_v56, %v7635_v53  ;;  %v2845_v3 = vor.u32 %v7767_v13, %v7763_v46  ;;  %5356 = vmatprep.subr.bf16.mxu1 %v4790_v44  ;;  %vm7840_vm2 = vcmp.le.f32.partialorder %v2502_v9, 0.7853982  ;;  %v5586_v7 = vld [vmem:[%s8882_s4 + $0x4] ss:$8 sps:$4 sm:$0xff]  }
 0x23d   : > { %v2672_v33 = vsub.s32 0, %v7827_v42  ;;  %5357 = vmatpush3.bf16.msra.mxu1 %v4782_v61  ;;  %v2718_v45 = vor.u32 8388608, %v7796_v2  ;;  %vm2742_vm11 = vcmp.lt.s32.totalorder %v9161_v28, 1  ;;  %vm2744_vm3 = vcmp.lt.s32.totalorder %v9161_v28, 3  ;;  %4870 = vmatprep.mubr.bf16.mxu1 %v5586_v7 }
 0x23e   : > { %v2585_v31 = vmul.f32 %v2584_v16, %v2582_v21  ;;  %v2591_v53 = vsel %vm7840_vm2, 0, %v2589_v14  ;;  %vm7852_vm14 = vcmp.le.f32.partialorder %v2606_v12, 0.7853982  ;;  %v2750_v25 = vsel %vm2742_vm11, %v2729_v57, %v2732_v29 }
 0x23f   : > { %v5247_v56 = vmin.u32 %v2672_v33, %v7827_v42  ;;  %v2752_v2 = vsel %vm2744_vm3, %v2735_v18, %v9164_v35  ;;  %v2726_v36 = vshrl.u32 %v9080_v26, %v9158_v23  ;;  %vm2743_vm0 = vcmp.lt.s32.totalorder %v9161_v28, 2 }
 0x240   : > { %v2586_v22 = vxor.u32 2147483648, %v2585_v31  ;;  %vm9165_vm8 = vcmp.lt.s32.totalorder %v9161_v28, 4  ;;  %v2692_v62 = vsub.s32 4, %v2668_v8  ;;  %v2754_v17 = vsel %vm2742_vm11, %v2732_v29, %v2735_v18 }
 0x241   : > { %v2747_v12 = vsel %vm9165_vm8, %v2735_v18, 2102212464  ;;  %v2674_v0 = vclz %v5247_v56  ;;  %v2756_v40 = vsel %vm2744_vm3, %v9167_v15, %v9166_v5  ;;  %vm2608_vm15 = vcmp.lt.s32.totalorder %v9149_v51, 0  ;;  %v9169_v5 = vld [vmem:[#allocation79_spill] sm:$0xff] }
 0x242   : > { %v2587_v63 = vsel %vm2504_vm13, %v2586_v22, %v2585_v31  ;;  %v2753_v23 = vsel %vm2743_vm0, %v2750_v25, %v2752_v2  ;;  %v2758_v58 = vshll.u32 %v2718_v45, 8  ;;  %v2746_v54 = vsel %vm2742_vm11, %v2726_v36, %v2729_v57 }
 0x243   : > { %v5248_v24 = vadd.s32 4294967294, %v2674_v0  ;;  %v2748_v20 = vsel %vm2744_vm3, %v2732_v29, %v2747_v12  ;;  %v2757_v50 = vsel %vm2743_vm0, %v2754_v17, %v2756_v40  ;;  %v2590_v41 = vsel %vm7840_vm2, %v9137_v49, %v2587_v63 }
 0x244   : > { %v2595_v60 = vadd.s32 3, %v2591_v53  ;;  %v7887_v27 = vmul.u32.u64.low %v2758_v58, %v2757_v50  ;;  %v7888_v52 = vmul.u32.u64.high %v2758_v58, %v2757_v50, %v7887_v27  ;;  %v2693_v6 = vsel %vm2608_vm15, %v2692_v62, %v2668_v8 }
 0x245   : > { %vm5249_vm5 = vcmp.lt.s32.totalorder %v5248_v24, 0  ;;  %v7895_v57 = vmul.u32.u64.low %v2758_v58, %v2753_v23  ;;  %v7896_v44 = vmul.u32.u64.high %v2758_v58, %v2753_v23, %v7895_v57  ;;  %v2662_v29 = vadd.s32 %v7753_v32, %v7748_v59 }
 0x246   : > { %v2677_v18 = vsel %vm5249_vm5, 0, %v5248_v24  ;;  %v7901_v61 = vand.u32 3, %v2591_v53  ;;  %v2749_v21 = vsel %vm2743_vm0, %v2746_v54, %v2748_v20  ;;  %5642 = vcosq.f32 %v2590_v41 }
 0x247   : > { %v2678_v16 = vsub.s32 32, %v2677_v18  ;;  %v2682_v14 = vsub.s32 4294967266, %v2677_v18  ;;  %v2814_v33 = vand.u32 2147483647, %v9168_v34  ;;  %5644 = vsinq.f32 %v2590_v41 }
 0x248   : > { %v2695_v8 = vsel %vm7852_vm14, 0, %v2693_v6  ;;  %v7908_v31 = vand.u32 3, %v2595_v60  ;;  %vm2767_vm9 = vc.u32 %v7888_v52, %v7895_v57  ;;  %v2679_v59 = vshll.u32 %v7827_v42, %v2677_v18 }
 0x249   : > { %v2680_v32 = vshrl.u32 %v2662_v29, %v2678_v16  ;;  %v2683_v45 = vadd.s32 127, %v2682_v14  ;;  %v2768_v28 = vadd.s32 1, %v7896_v44  ;;  %v2765_v53 = vmul.u32 %v2758_v58, %v2749_v21 }
 0x24a   : > { %v2831_v56 = vshll.u32 %v9080_v26, %v7479_v11  ;;  %v2832_v25 = vshrl.u32 %v9081_v10, %v7621_v4  ;;  %v2835_v35 = vshrl.u32 %v9082_v37, %v7621_v4  ;;  %v2821_v42 = vand.u32 8388607, %v2814_v33 }
 0x24b   : > { %v2681_v2 = vor.u32 %v2680_v32, %v2679_v59  ;;  %v2684_v22 = vshll.u32 %v2683_v45, 23  ;;  %v2769_v36 = vsel %vm2767_vm9, %v2768_v28, %v7896_v44  ;;  %v2834_v0 = vshll.u32 %v9081_v10, %v7479_v11 }
 0x24c   : > { %v2770_v12 = vadd.s32 %v2769_v36, %v2765_v53  ;;  %v2837_v62 = vshll.u32 %v9082_v37, %v7479_v11  ;;  %v2838_v17 = vshrl.u32 %v9041_v38, %v7621_v4  ;;  %v7931_v15 = vshrl.u32 %v9056_v39, %v9169_v5 }
 0x24d   : > { %vm2849_vm10 = vcmp.lt.s32.totalorder %v7611_v48, 4  ;;  %v2685_v40 = vor.u32 4788187, %v2684_v22  ;;  %v2699_v63 = vadd.s32 3, %v2695_v8  ;;  %v2833_v58 = vor.u32 %v2832_v25, %v2831_v56 }
 0x24e   : > { %v2771_v23 = vadd.s32 536870912, %v2770_v12  ;;  %v2836_v24 = vor.u32 %v2835_v35, %v2834_v0  ;;  %v2839_v54 = vor.u32 %v2838_v17, %v2837_v62  ;;  %v2855_v20 = vsel %vm2849_vm10, %v7834_v43, 920167782 }
 0x24f   : > { %v2859_v11 = vsel %vm2849_vm10, %v2845_v3, 1326507024  ;;  %v2686_v50 = vand.u32 2147483647, %v2685_v40  ;;  %v2688_v41 = vcvt.s32.f32 %v2681_v2  ;;  %vm4251_vm7 = vcmp.eq.s32.totalorder %v7901_v61, 0 }
 0x250   : > { %vm4254_vm4 = vcmp.eq.s32.totalorder %v7901_v61, 2  ;;  %vm2598_vm12 = vcmp.eq.s32.totalorder %v7908_v31, 0  ;;  %vm2601_vm6 = vcmp.eq.s32.totalorder %v7908_v31, 2  ;;  %v7946_v60 = vshrl.u32 %v2771_v23, 30  ;;  %v5643_v7 = vpop.eup %5642 }
 0x251   : > { %v2822_v27 = vor.u32 8388608, %v2821_v42  ;;  %v2689_v6 = vmul.f32 %v2688_v41, %v2686_v50  ;;  %v7948_v44 = vand.u32 3, %v2695_v8  ;;  %vm2846_vm1 = vcmp.lt.s32.totalorder %v7611_v48, 1  ;;  %v5645_v46 = vpop.eup %5644 }
 0x252   : > { %vm2848_vm13 = vcmp.lt.s32.totalorder %v7611_v48, 3  ;;  %v7952_v13 = vand.u32 3, %v2699_v63  ;;  %v2773_v3 = vshll.u32 %v7946_v60, 30  ;;  %v2854_v29 = vsel %vm2846_vm1, %v2833_v58, %v2836_v24 }
 0x253   : > { %v2856_v18 = vsel %vm2848_vm13, %v2839_v54, %v2855_v20  ;;  %v2690_v21 = vxor.u32 2147483648, %v2689_v6  ;;  %v2830_v16 = vshrl.u32 %v9080_v26, %v7621_v4  ;;  %vm2847_vm2 = vcmp.lt.s32.totalorder %v7611_v48, 2 }
 0x254   : > { %v2860_v14 = vsel %vm2848_vm13, %v7834_v43, %v2859_v11  ;;  %v2602_v8 = vxor.u32 2147483648, %v5643_v7  ;;  %v7965_v59 = vsub.s32 %v2770_v12, %v2773_v3  ;;  %v2851_v32 = vsel %vm2849_vm10, %v2839_v54, 2102212464 }
 0x255   : > { %v2862_v45 = vshll.u32 %v2822_v27, 8  ;;  %v2599_v28 = vxor.u32 2147483648, %v5645_v46  ;;  %v2691_v53 = vsel %vm2608_vm15, %v2690_v21, %v2689_v6  ;;  %v2857_v4 = vsel %vm2847_vm2, %v2854_v29, %v2856_v18  ;;  %v9170_v18 = vld [vmem:[#allocation26_spill] sm:$0xff] }
 0x256   : > { %v2858_v56 = vsel %vm2846_vm1, %v2836_v24, %v2839_v54  ;;  %v2694_v43 = vsel %vm7852_vm14, %v9149_v51, %v2691_v53  ;;  %v2776_v25 = vsub.s32 0, %v7965_v59  ;;  %v2850_v35 = vsel %vm2846_vm1, %v2830_v16, %v2833_v58 }
 0x257   : > { %v2861_v2 = vsel %vm2847_vm2, %v2858_v56, %v2860_v14  ;;  %5646 = vcosq.f32 %v2694_v43  ;;  %v2852_v22 = vsel %vm2848_vm13, %v2836_v24, %v2851_v32  ;;  %v4253_v62 = vsel %vm4251_vm7, %v5643_v7, %v2599_v28  ;;  %v9172_v32 = vld [vmem:[#allocation38_spill] sm:$0xff] }
 0x258   : > { %v7985_v36 = vmul.u32.u64.low %v2862_v45, %v2861_v2  ;;  %v7986_v42 = vmul.u32.u64.high %v2862_v45, %v2861_v2, %v7985_v36  ;;  %5648 = vsinq.f32 %v2694_v43  ;;  %v5251_v12 = vmin.u32 %v2776_v25, %v7965_v59 }
 0x259   : > { %v7989_v9 = vmul.u32.u64.low %v2862_v45, %v2857_v4  ;;  %v7990_v0 = vmul.u32.u64.high %v2862_v45, %v2857_v4, %v7989_v9  ;;  %v4256_v17 = vsel %vm4254_vm4, %v2602_v8, %v5645_v46  ;;  %v2600_v40 = vsel %vm2598_vm12, %v5643_v7, %v2599_v28 }
 0x25a   : > { %v2603_v63 = vsel %vm2601_vm6, %v2602_v8, %v5645_v46  ;;  %v8003_v23 = vshrl.u32 %v9057_v19, %v9169_v5  ;;  %vm2594_vm11 = vweird.f32 %v9137_v49  ;;  %v2778_v58 = vclz %v5251_v12 }
 0x25b   : > { %v2853_v24 = vsel %vm2847_vm2, %v2850_v35, %v2852_v22  ;;  %vm4250_vm3 = vcmp.lt.s32.totalorder %v7901_v61, 2  ;;  %vm4357_vm14 = vcmp.eq.s32.totalorder %v7948_v44, 2  ;;  %vm2597_vm0 = vcmp.lt.s32.totalorder %v7908_v31, 2 }
 0x25c   : > { %vm2871_vm8 = vc.u32 %v7986_v42, %v7989_v9  ;;  %v4257_v54 = vsel %vm4250_vm3, %v4253_v62, %v4256_v17  ;;  %vm4354_vm15 = vcmp.eq.s32.totalorder %v7948_v44, 0  ;;  %v2604_v20 = vsel %vm2597_vm0, %v2600_v40, %v2603_v63  ;;  %v9173_v62 = vld [vmem:[#allocation78_spill] sm:$0xff] }
 0x25d   : > { %v5252_v11 = vadd.s32 4294967294, %v2778_v58  ;;  %v2872_v50 = vadd.s32 1, %v7990_v0  ;;  %vm4353_vm5 = vcmp.lt.s32.totalorder %v7948_v44, 2  ;;  %vm2701_vm9 = vcmp.lt.s32.totalorder %v7952_v13, 2  ;;  %v9174_v44 = vld [vmem:[#allocation80_spill] sm:$0xff] }
 0x25e   : > { %vm2702_vm10 = vcmp.eq.s32.totalorder %v7952_v13, 0  ;;  %vm2705_vm7 = vcmp.eq.s32.totalorder %v7952_v13, 2  ;;  %v2869_v48 = vmul.u32 %v2862_v45, %v2853_v24  ;;  %vm2698_vm4 = vweird.f32 %v9149_v51 }
 0x25f   : > { %v2766_v61 = vadd.s32 %v7895_v57, %v7888_v52  ;;  %vm5253_vm12 = vcmp.lt.s32.totalorder %v5252_v11, 0  ;;  %v2796_v31 = vsub.s32 4, %v7946_v60  ;;  %v2873_v41 = vsel %vm2871_vm8, %v2872_v50, %v7990_v0  ;;  %v9171_v52 = vld [vmem:[#allocation33_spill] sm:$0xff] }
 0x260   : > { %v4258_v27 = vsel %vm2594_vm11, nan, %v4257_v54  ;;  %v2605_v7 = vsel %vm2594_vm11, nan, %v2604_v20  ;;  %v2781_v6 = vsel %vm5253_vm12, 0, %v5252_v11  ;;  %v2874_v46 = vadd.s32 %v2873_v41, %v2869_v48 }
 0x261   : > { %vm2712_vm6 = vcmp.lt.s32.totalorder %v9156_v30, 0  ;;  %v2782_v3 = vsub.s32 32, %v2781_v6  ;;  %v2786_v29 = vsub.s32 4294967266, %v2781_v6  ;;  %v2918_v21 = vand.u32 2147483647, %v9170_v18  ;;  %v5647_v16 = vpop.eup %5646 }
 0x262   : > { %v2935_v57 = vshll.u32 %v9080_v26, %v9171_v52  ;;  %v2783_v14 = vshll.u32 %v7965_v59, %v2781_v6  ;;  %v2875_v8 = vadd.s32 536870912, %v2874_v46  ;;  %v2936_v45 = vshrl.u32 %v9081_v10, %v9172_v32  ;;  %v5649_v28 = vpop.eup %5648 }
 0x263   : > { %v2938_v49 = vshll.u32 %v9081_v10, %v9171_v52  ;;  %v2706_v53 = vxor.u32 2147483648, %v5647_v16  ;;  %v2784_v4 = vshrl.u32 %v2766_v61, %v2782_v3  ;;  %v2787_v56 = vadd.s32 127, %v2786_v29 }
 0x264   : > { %v2939_v43 = vshrl.u32 %v9082_v37, %v9172_v32  ;;  %v2703_v25 = vxor.u32 2147483648, %v5649_v28  ;;  %v8039_v35 = vshrl.u32 %v2875_v8, 30  ;;  %v2941_v59 = vshll.u32 %v9082_v37, %v9171_v52 }
 0x265   : > { %v2942_v2 = vshrl.u32 %v9041_v38, %v9172_v32  ;;  %v4359_v22 = vsel %vm4357_vm14, %v2706_v53, %v5649_v28  ;;  %v2707_v36 = vsel %vm2705_vm7, %v2706_v53, %v5649_v28  ;;  %v2785_v12 = vor.u32 %v2784_v4, %v2783_v14 }
 0x266   : > { %v2788_v0 = vshll.u32 %v2787_v56, 23  ;;  %vm3057_vm1 = vcmp.lt.s32.totalorder %v9173_v62, 4  ;;  %v4356_v17 = vsel %vm4354_vm15, %v5647_v16, %v2703_v25  ;;  %v2704_v40 = vsel %vm2702_vm10, %v5647_v16, %v2703_v25 }
 0x267   : > { %v2877_v63 = vshll.u32 %v8039_v35, 30  ;;  %v2925_v58 = vand.u32 8388607, %v2918_v21  ;;  %v4360_v24 = vsel %vm4353_vm5, %v4356_v17, %v4359_v22  ;;  %v2708_v54 = vsel %vm2701_vm9, %v2704_v40, %v2707_v36  ;;  %v9180_v22 = vld [vmem:[#allocation50_spill] sm:$0xff] }
 0x268   : > { %v2789_v20 = vor.u32 4788187, %v2788_v0  ;;  %v2937_v11 = vor.u32 %v2936_v45, %v2935_v57  ;;  %v4361_v50 = vsel %vm2698_vm4, nan, %v4360_v24  ;;  %v2709_v48 = vsel %vm2698_vm4, nan, %v2708_v54  ;;  %v9181_v36 = vld [vmem:[#allocation42_spill] sm:$0xff] }
 0x269   : > { %v8065_v61 = vsub.s32 %v2874_v46, %v2877_v63  ;;  %v2940_v41 = vor.u32 %v2939_v43, %v2938_v49  ;;  %v4791_v6 = vpack.c.bf16 %v4361_v50, %v4258_v27  ;;  %v2792_v29 = vcvt.s32.f32 %v2785_v12  ;;  %v9178_v49 = vld [vmem:[#allocation49_spill] sm:$0xff] }
 0x26a   : > { %v2790_v3 = vand.u32 2147483647, %v2789_v20  ;;  %v2943_v52 = vor.u32 %v2942_v2, %v2941_v59  ;;  %v8069_v16 = vor.u32 %v7931_v15, %v9174_v44  ;;  %v4783_v13 = vpack.c.bf16 %v2709_v48, %v2605_v7  ;;  %v9177_v15 = vld [vmem:[#allocation36_spill] sm:$0xff] }
 0x26b   : > { %v2797_v57 = vsel %vm2712_vm6, %v2796_v31, %v7946_v60  ;;  %v2880_v14 = vsub.s32 0, %v8065_v61  ;;  %v3053_v51 = vor.u32 %v8003_v23, %v7601_v1  ;;  %5358 = vmatprep.subr.bf16.mxu1 %v4791_v6  ;;  %vm8079_vm13 = vcmp.le.f32.partialorder %v2710_v55, 0.7853982 }
 0x26c   : > { %v2793_v46 = vmul.f32 %v2792_v29, %v2790_v3  ;;  %vm2950_vm2 = vcmp.lt.s32.totalorder %v9177_v15, 1  ;;  %5359 = vmatpush3.bf16.msra.mxu1 %v4783_v13  ;;  %v2926_v8 = vor.u32 8388608, %v2925_v58  ;;  %vm2952_vm11 = vcmp.lt.s32.totalorder %v9177_v15, 3 }
 0x26d   : > { %v5255_v7 = vmin.u32 %v2880_v14, %v8065_v61  ;;  %v2958_v60 = vsel %vm2950_vm2, %v2937_v11, %v2940_v41  ;;  %v2799_v45 = vsel %vm8079_vm13, 0, %v2797_v57  ;;  %v2934_v55 = vshrl.u32 %v9080_v26, %v9172_v32 }
 0x26e   : > { %v2794_v31 = vxor.u32 2147483648, %v2793_v46  ;;  %v2960_v28 = vsel %vm2952_vm11, %v2943_v52, %v9178_v49  ;;  %vm2951_vm3 = vcmp.lt.s32.totalorder %v9177_v15, 2  ;;  %vm9179_vm14 = vcmp.lt.s32.totalorder %v9177_v15, 4 }
 0x26f   : > { %v2882_v53 = vclz %v5255_v7  ;;  %v2955_v4 = vsel %vm9179_vm14, %v2943_v52, 2102212464  ;;  %v2962_v56 = vsel %vm2950_vm2, %v2940_v41, %v2943_v52  ;;  %v8103_v43 = vsel %vm3057_vm1, %v8069_v16, 920167782 }
 0x270   : > { %v2795_v32 = vsel %vm2712_vm6, %v2794_v31, %v2793_v46  ;;  %vm2816_vm0 = vcmp.lt.s32.totalorder %v9168_v34, 0  ;;  %v2961_v25 = vsel %vm2951_vm3, %v2958_v60, %v2960_v28  ;;  %v2964_v12 = vsel %vm2952_vm11, %v9181_v36, %v9180_v22 }
 0x271   : > { %v2798_v59 = vsel %vm8079_vm13, %v9156_v30, %v2795_v32  ;;  %v5256_v2 = vadd.s32 4294967294, %v2882_v53  ;;  %v2966_v0 = vshll.u32 %v2926_v8, 8  ;;  %v2803_v17 = vadd.s32 3, %v2799_v45 }
 0x272   : > { %v2954_v40 = vsel %vm2950_vm2, %v2934_v55, %v2937_v11  ;;  %v2956_v63 = vsel %vm2952_vm11, %v2940_v41, %v2955_v4  ;;  %v2965_v58 = vsel %vm2951_vm3, %v2962_v56, %v2964_v12  ;;  %5650 = vcosq.f32 %v2798_v59 }
 0x273   : > { %vm5257_vm8 = vcmp.lt.s32.totalorder %v5256_v2, 0  ;;  %v8123_v24 = vmul.u32.u64.low %v2966_v0, %v2965_v58  ;;  %v8124_v54 = vmul.u32.u64.high %v2966_v0, %v2965_v58, %v8123_v24  ;;  %v2900_v50 = vsub.s32 4, %v8039_v35 }
 0x274   : > { %v2885_v20 = vsel %vm5257_vm8, 0, %v5256_v2  ;;  %v8127_v48 = vmul.u32.u64.low %v2966_v0, %v2961_v25  ;;  %v8128_v6 = vmul.u32.u64.high %v2966_v0, %v2961_v25, %v8127_v48  ;;  %5652 = vsinq.f32 %v2798_v59 }
 0x275   : > { %v2870_v11 = vadd.s32 %v7989_v9, %v7986_v42  ;;  %v2886_v41 = vsub.s32 32, %v2885_v20  ;;  %v2890_v3 = vsub.s32 4294967266, %v2885_v20  ;;  %vm8135_vm15 = vcmp.le.f32.partialorder %v2814_v33, 0.7853982  ;;  %v9184_v9 = vld [vmem:[#allocation44_spill] sm:$0xff] }
 0x276   : > { %v8139_v52 = vand.u32 3, %v2799_v45  ;;  %v8141_v44 = vand.u32 3, %v2803_v17  ;;  %v2957_v13 = vsel %vm2951_vm3, %v2954_v40, %v2956_v63  ;;  %v2887_v57 = vshll.u32 %v8065_v61, %v2885_v20 }
 0x277   : > { %v2888_v14 = vshrl.u32 %v2870_v11, %v2886_v41  ;;  %v2891_v27 = vadd.s32 127, %v2890_v3  ;;  %vm2975_vm5 = vc.u32 %v8124_v54, %v8127_v48  ;;  %v2901_v33 = vsel %vm2816_vm0, %v2900_v50, %v8039_v35 }
 0x278   : > { %v2976_v42 = vadd.s32 1, %v8128_v6  ;;  %v3022_v46 = vand.u32 2147483647, %v9184_v9  ;;  %v3040_v7 = vshrl.u32 %v9081_v10, %v9169_v5  ;;  %v2973_v60 = vmul.u32 %v2966_v0, %v2957_v13 }
 0x279   : > { %v2889_v15 = vor.u32 %v2888_v14, %v2887_v57  ;;  %v2892_v8 = vshll.u32 %v2891_v27, 23  ;;  %v3043_v61 = vshrl.u32 %v9082_v37, %v9169_v5  ;;  %v3039_v45 = vshll.u32 %v9080_v26, %v6616_v47 }
 0x27a   : > { %v2977_v31 = vsel %vm2975_vm5, %v2976_v42, %v8128_v6  ;;  %v3042_v35 = vshll.u32 %v9081_v10, %v6616_v47  ;;  %v3046_v55 = vshrl.u32 %v9041_v38, %v9169_v5  ;;  %v2903_v28 = vsel %vm8135_vm15, 0, %v2901_v33 }
 0x27b   : > { %v2893_v49 = vor.u32 4788187, %v2892_v8  ;;  %v2978_v53 = vadd.s32 %v2977_v31, %v2973_v60  ;;  %v3045_v4 = vshll.u32 %v9082_v37, %v6616_v47  ;;  %v3067_v56 = vsel %vm3057_vm1, %v3053_v51, 1326507024 }
 0x27c   : > { %v3029_v32 = vand.u32 8388607, %v3022_v46  ;;  %v3041_v25 = vor.u32 %v3040_v7, %v3039_v45  ;;  %v3044_v59 = vor.u32 %v3043_v61, %v3042_v35  ;;  %v5651_v2 = vpop.eup %5650  ;;  %v2896_v36 = vcvt.s32.f32 %v2889_v15 }
 0x27d   : > { %v2894_v22 = vand.u32 2147483647, %v2893_v49  ;;  %v2979_v12 = vadd.s32 536870912, %v2978_v53  ;;  %v3047_v0 = vor.u32 %v3046_v55, %v3045_v4  ;;  %vm4457_vm9 = vcmp.eq.s32.totalorder %v8139_v52, 0  ;;  %v349_v49 = vpop.permute.xlu1 %348  ;;  %v9187_v4 = vld [vmem:[#allocation22_spill] sm:$0xff] }
 0x27e   : > { %vm4460_vm10 = vcmp.eq.s32.totalorder %v8139_v52, 2  ;;  %v8177_v47 = vand.u32 3, %v2903_v28  ;;  %v2907_v1 = vadd.s32 3, %v2903_v28  ;;  %v5653_v23 = vpop.eup %5652  ;;  %vm2806_vm7 = vcmp.eq.s32.totalorder %v8141_v44, 0 }
 0x27f   : > { %v2897_v17 = vmul.f32 %v2896_v36, %v2894_v22  ;;  %vm2809_vm4 = vcmp.eq.s32.totalorder %v8141_v44, 2  ;;  %v2980_v51 = vshrl.u32 %v2979_v12, 30  ;;  %v3038_v40 = vshrl.u32 %v9080_v26, %v9169_v5 }
 0x280   : > { %vm3054_vm12 = vcmp.lt.s32.totalorder %v9173_v62, 1  ;;  %v2810_v63 = vxor.u32 2147483648, %v5651_v2  ;;  %vm2920_vm6 = vcmp.lt.s32.totalorder %v9170_v18, 0  ;;  %v3030_v58 = vor.u32 8388608, %v3029_v32 }
 0x281   : > { %vm3056_vm13 = vcmp.lt.s32.totalorder %v9173_v62, 3  ;;  %v3062_v24 = vsel %vm3054_vm12, %v3041_v25, %v3044_v59  ;;  %v2898_v20 = vxor.u32 2147483648, %v2897_v17  ;;  %vm4456_vm2 = vcmp.lt.s32.totalorder %v8139_v52, 2 }
 0x282   : > { %v2981_v50 = vshll.u32 %v2980_v51, 30  ;;  %v3064_v6 = vsel %vm3056_vm13, %v3047_v0, %v8103_v43  ;;  %v3066_v11 = vsel %vm3054_vm12, %v3044_v59, %v3047_v0  ;;  %v2807_v41 = vxor.u32 2147483648, %v5653_v23 }
 0x283   : > { %v8190_v5 = vand.u32 3, %v2907_v1  ;;  %vm3055_vm11 = vcmp.lt.s32.totalorder %v9173_v62, 2  ;;  %v3058_v3 = vsel %vm3054_vm12, %v3038_v40, %v3041_v25  ;;  %v2899_v13 = vsel %vm2816_vm0, %v2898_v20, %v2897_v17 }
 0x284   : > { %vm8197_vm3 = vcmp.le.f32.partialorder %v2918_v21, 0.7853982  ;;  %v8201_v14 = vsub.s32 %v2978_v53, %v2981_v50  ;;  %v3059_v43 = vsel %vm3057_vm1, %v3047_v0, 2102212464  ;;  %v3068_v27 = vsel %vm3056_vm13, %v8069_v16, %v3067_v56  ;;  %v9188_v56 = vld [vmem:[#allocation13_spill] sm:$0xff] }
 0x285   : > { %vm2802_vm14 = vweird.f32 %v9156_v30  ;;  %v2902_v33 = vsel %vm8135_vm15, %v9168_v34, %v2899_v13  ;;  %v3065_v21 = vsel %vm3055_vm11, %v3062_v24, %v3064_v6  ;;  %v3069_v42 = vsel %vm3055_vm11, %v3066_v11, %v3068_v27 }
 0x286   : > { %v3070_v7 = vshll.u32 %v3030_v58, 8  ;;  %5654 = vcosq.f32 %v2902_v33  ;;  %v4462_v15 = vsel %vm4460_vm10, %v2810_v63, %v5653_v23  ;;  %v2984_v8 = vsub.s32 0, %v8201_v14 }
 0x287   : > { %v3004_v16 = vsub.s32 4, %v2980_v51  ;;  %5656 = vsinq.f32 %v2902_v33  ;;  %v3060_v60 = vsel %vm3056_vm13, %v3044_v59, %v3059_v43  ;;  %v4459_v31 = vsel %vm4457_vm9, %v5651_v2, %v2807_v41 }
 0x288   : > { %v8221_v29 = vmul.u32.u64.low %v3070_v7, %v3069_v42  ;;  %v8222_v61 = vmul.u32.u64.high %v3070_v7, %v3069_v42, %v8221_v29  ;;  %v5259_v45 = vmin.u32 %v2984_v8, %v8201_v14  ;;  %vm2805_vm1 = vcmp.lt.s32.totalorder %v8141_v44, 2 }
 0x289   : > { %v8227_v35 = vmul.u32.u64.low %v3070_v7, %v3065_v21  ;;  %v8228_v55 = vmul.u32.u64.high %v3070_v7, %v3065_v21, %v8227_v35  ;;  %v2808_v28 = vsel %vm2806_vm7, %v5651_v2, %v2807_v41  ;;  %v2811_v53 = vsel %vm2809_vm4, %v2810_v63, %v5653_v23 }
 0x28a   : > { %v8238_v32 = vrot.slane %v9188_v56, %v9187_v4  ;;  %vm4563_vm0 = vcmp.eq.s32.totalorder %v8177_v47, 2  ;;  %v2986_v25 = vclz %v5259_v45  ;;  %v3005_v59 = vsel %vm2920_vm6, %v3004_v16, %v2980_v51  ;;  %v344_v51 = vpop.permute.xlu0 %343 }
 0x28b   : > { %v3061_v22 = vsel %vm3055_vm11, %v3058_v3, %v3060_v60  ;;  %v4463_v36 = vsel %vm4456_vm2, %v4459_v31, %v4462_v15  ;;  %vm4560_vm8 = vcmp.eq.s32.totalorder %v8177_v47, 0  ;;  %vm2910_vm15 = vcmp.eq.s32.totalorder %v8190_v5, 0 }
 0x28c   : > { %vm3079_vm5 = vc.u32 %v8222_v61, %v8227_v35  ;;  %v8252_v2 = vmul.f32 %v8238_v32, %v349_v49  ;;  %vm4559_vm9 = vcmp.lt.s32.totalorder %v8177_v47, 2  ;;  %v2812_v12 = vsel %vm2805_vm1, %v2808_v28, %v2811_v53 }
 0x28d   : > { %vm2909_vm10 = vcmp.lt.s32.totalorder %v8190_v5, 2  ;;  %vm2913_vm7 = vcmp.eq.s32.totalorder %v8190_v5, 2  ;;  %v5260_v62 = vadd.s32 4294967294, %v2986_v25  ;;  %v3080_v52 = vadd.s32 1, %v8228_v55 }
 0x28e   : > { %vm2906_vm4 = vweird.f32 %v9168_v34  ;;  %v3007_v0 = vsel %vm8197_vm3, 0, %v3005_v59  ;;  %v3077_v1 = vmul.u32 %v3070_v7, %v3061_v22  ;;  %v473_v23 = vand.u32 2147483647, %v8252_v2 }
 0x28f   : > { %v476_v17 = vand.u32 2139095040, %v8252_v2  ;;  %v4464_v44 = vsel %vm2802_vm14, nan, %v4463_v36  ;;  %v2974_v40 = vadd.s32 %v8127_v48, %v8124_v54  ;;  %vm5261_vm12 = vcmp.lt.s32.totalorder %v5260_v62, 0 }
 0x290   : > { %vm3024_vm13 = vcmp.lt.s32.totalorder %v9184_v9, 0  ;;  %v3081_v63 = vsel %vm3079_vm5, %v3080_v52, %v8228_v55  ;;  %v2813_v58 = vsel %vm2802_vm14, nan, %v2812_v12  ;;  %v2989_v24 = vsel %vm5261_vm12, 0, %v5260_v62  ;;  %v5655_v6 = vpop.eup %5654 }
 0x291   : > { %v3082_v20 = vadd.s32 %v3081_v63, %v3077_v1  ;;  %v477_v50 = vshrl.u32 %v476_v17, 23  ;;  %v2990_v11 = vsub.s32 32, %v2989_v24  ;;  %v2994_v41 = vsub.s32 4294967266, %v2989_v24  ;;  %v5657_v48 = vpop.eup %5656 }
 0x292   : > { %v3011_v3 = vadd.s32 3, %v3007_v0  ;;  %v8277_v54 = vmul.f32 %v8238_v32, %v344_v51  ;;  %v2914_v13 = vxor.u32 2147483648, %v5655_v6  ;;  %v480_v33 = vand.u32 8388607, %v473_v23 }
 0x293   : > { %v3083_v43 = vadd.s32 536870912, %v3082_v20  ;;  %v5169_v27 = vadd.s32 4294967169, %v477_v50  ;;  %v2911_v21 = vxor.u32 2147483648, %v5657_v48  ;;  %v2991_v30 = vshll.u32 %v8201_v14, %v2989_v24 }
 0x294   : > { %v2992_v42 = vshrl.u32 %v2974_v40, %v2990_v11  ;;  %v2995_v7 = vadd.s32 127, %v2994_v41  ;;  %v4565_v15 = vsel %vm4563_vm0, %v2914_v13, %v5657_v48  ;;  %v2915_v8 = vsel %vm2913_vm7, %v2914_v13, %v5657_v48 }
 0x295   : > { %v3084_v16 = vshrl.u32 %v3083_v43, 30  ;;  %v483_v60 = vadd.s32 1, %v5169_v27  ;;  %v4562_v29 = vsel %vm4560_vm8, %v5655_v6, %v2911_v21  ;;  %v2912_v31 = vsel %vm2910_vm15, %v5655_v6, %v2911_v21 }
 0x296   : > { %v2993_v45 = vor.u32 %v2992_v42, %v2991_v30  ;;  %v2996_v55 = vshll.u32 %v2995_v7, 23  ;;  %v4566_v14 = vsel %vm4559_vm9, %v4562_v29, %v4565_v15  ;;  %v2916_v49 = vsel %vm2909_vm10, %v2912_v31, %v2915_v8 }
 0x297   : > { %v3085_v28 = vshll.u32 %v3084_v16, 30  ;;  %v3108_v53 = vsub.s32 4, %v3084_v16  ;;  %v4567_v56 = vsel %vm2906_vm4, nan, %v4566_v14  ;;  %v2917_v25 = vsel %vm2906_vm4, nan, %v2916_v49 }
 0x298   : > { %v2997_v59 = vor.u32 4788187, %v2996_v55  ;;  %v372_v22 = vand.u32 2139095040, %v8277_v54  ;;  %v4792_v36 = vpack.c.bf16 %v4567_v56, %v4464_v44  ;;  %v481_v62 = vor.u32 8388608, %v480_v33 }
 0x299   : > { %v8299_v12 = vsub.s32 %v3082_v20, %v3085_v28  ;;  %v3109_v47 = vsel %vm3024_vm13, %v3108_v53, %v3084_v16  ;;  %v4784_v5 = vpack.c.bf16 %v2917_v25, %v2813_v58  ;;  %v3000_v1 = vcvt.s32.f32 %v2993_v45 }
 0x29a   : > { %v2998_v52 = vand.u32 2147483647, %v2997_v59  ;;  %vm484_vm2 = vcmp.gt.s32.totalorder %v483_v60, 0  ;;  %5360 = vmatprep.subr.bf16.mxu1 %v4792_v36  ;;  %vm8305_vm11 = vcmp.le.f32.partialorder %v3022_v46, 0.7853982  ;;  %v8314_v63 = vand.u32 3, %v3007_v0 }
 0x29b   : > { %v3088_v17 = vsub.s32 0, %v8299_v12  ;;  %v485_v51 = vsel %vm484_vm2, %v483_v60, 0  ;;  %5361 = vmatpush3.bf16.msra.mxu1 %v4784_v5  ;;  %v8312_v40 = vsel %vm8305_vm11, 0, %v3109_v47  ;;  %v3078_v24 = vadd.s32 %v8227_v35, %v8222_v61 }
 0x29c   : > { %v3001_v44 = vmul.f32 %v3000_v1, %v2998_v52  ;;  %v487_v58 = vand.u32 31, %v485_v51  ;;  %v8319_v20 = vand.u32 3, %v3011_v3  ;;  %v369_v50 = vand.u32 2147483647, %v8277_v54 }
 0x29d   : > { %v5263_v46 = vmin.u32 %v3088_v17, %v8299_v12  ;;  %v8322_v41 = vshll.u32 %v481_v62, 8  ;;  %v373_v48 = vshrl.u32 %v372_v22, 23  ;;  %v8325_v43 = vadd.s32 3, %v8312_v40 }
 0x29e   : > { %v3002_v6 = vxor.u32 2147483648, %v3001_v44  ;;  %v488_v11 = vsub.s32 32, %v487_v58  ;;  %v486_v0 = vshrl.u32 %v485_v51, 5  ;;  %v490_v27 = vshll.u32 %v9080_v26, %v487_v58 }
 0x29f   : > { %v3090_v13 = vclz %v5263_v46  ;;  %v493_v35 = vshll.u32 %v9081_v10, %v487_v58  ;;  %v496_v3 = vshll.u32 %v9082_v37, %v487_v58  ;;  %v499_v33 = vshll.u32 %v9041_v38, %v487_v58 }
 0x2a0   : > { %v3003_v61 = vsel %vm2920_vm6, %v3002_v6, %v3001_v44  ;;  %v489_v42 = vshrl.u32 %v9080_v26, %v488_v11  ;;  %v491_v7 = vshrl.u32 %v9081_v10, %v488_v11  ;;  %v494_v15 = vshrl.u32 %v9082_v37, %v488_v11 }
 0x2a1   : > { %v3006_v21 = vsel %vm8197_vm3, %v9170_v18, %v3003_v61  ;;  %v5264_v30 = vadd.s32 4294967294, %v3090_v13  ;;  %v497_v8 = vshrl.u32 %v9041_v38, %v488_v11  ;;  %v500_v16 = vshrl.u32 %v9056_v39, %v488_v11 }
 0x2a2   : > { %5658 = vcosq.f32 %v3006_v21  ;;  %v492_v60 = vor.u32 %v491_v7, %v490_v27  ;;  %v502_v29 = vshll.u32 %v9056_v39, %v487_v58  ;;  %v495_v57 = vor.u32 %v494_v15, %v493_v35 }
 0x2a3   : > { %5660 = vsinq.f32 %v3006_v21  ;;  %vm5265_vm6 = vcmp.lt.s32.totalorder %v5264_v30, 0  ;;  %v498_v45 = vor.u32 %v497_v8, %v496_v3  ;;  %v501_v55 = vor.u32 %v500_v16, %v499_v33  ;;  %v354_v8 = vpop.permute.xlu1 %353 }
 0x2a4   : > { %v3093_v31 = vsel %vm5265_vm6, 0, %v5264_v30  ;;  %v503_v53 = vshrl.u32 %v9057_v19, %v488_v11  ;;  %vm505_vm3 = vcmp.lt.s32.totalorder %v486_v0, 1  ;;  %vm506_vm14 = vcmp.lt.s32.totalorder %v486_v0, 2 }
 0x2a5   : > { %v3094_v14 = vsub.s32 32, %v3093_v31  ;;  %v3095_v49 = vshll.u32 %v8299_v12, %v3093_v31  ;;  %v3098_v28 = vsub.s32 4294967266, %v3093_v31  ;;  %vm507_vm1 = vcmp.lt.s32.totalorder %v486_v0, 3  ;;  %v359_v31 = vpop.permute.xlu0 %358 }
 0x2a6   : > { %vm508_vm0 = vcmp.lt.s32.totalorder %v486_v0, 4  ;;  %v504_v59 = vor.u32 %v503_v53, %v502_v29  ;;  %v509_v22 = vsel %vm505_vm3, %v489_v42, %v492_v60  ;;  %vm4663_vm8 = vcmp.eq.s32.totalorder %v8314_v63, 0 }
 0x2a7   : > { %v3096_v56 = vshrl.u32 %v3078_v24, %v3094_v14  ;;  %v3099_v25 = vadd.s32 127, %v3098_v28  ;;  %v510_v36 = vsel %vm508_vm0, %v498_v45, 2102212464  ;;  %v513_v47 = vsel %vm505_vm3, %v492_v60, %v495_v57 }
 0x2a8   : > { %v514_v62 = vsel %vm508_vm0, %v501_v55, 920167782  ;;  %v517_v5 = vsel %vm505_vm3, %v495_v57, %v498_v45  ;;  %v511_v12 = vsel %vm507_vm1, %v495_v57, %v510_v36  ;;  %v518_v44 = vsel %vm508_vm0, %v504_v59, 1326507024 }
 0x2a9   : > { %v3097_v52 = vor.u32 %v3096_v56, %v3095_v49  ;;  %v3100_v1 = vshll.u32 %v3099_v25, 23  ;;  %v515_v17 = vsel %vm507_vm1, %v498_v45, %v514_v62  ;;  %v5165_v58 = vadd.s32 4294967169, %v373_v48 }
 0x2aa   : > { %v516_v51 = vsel %vm506_vm14, %v513_v47, %v515_v17  ;;  %v376_v24 = vand.u32 8388607, %v369_v50  ;;  %vm4662_vm15 = vcmp.lt.s32.totalorder %v8314_v63, 2  ;;  %v512_v11 = vsel %vm506_vm14, %v509_v22, %v511_v12 }
 0x2ab   : > { %v3101_v46 = vor.u32 4788187, %v3100_v1  ;;  %v3104_v6 = vcvt.s32.f32 %v3097_v52  ;;  %v519_v13 = vsel %vm507_vm1, %v501_v55, %v518_v44  ;;  %vm4666_vm5 = vcmp.eq.s32.totalorder %v8314_v63, 2 }
 0x2ac   : > { %v5659_v27 = vpop.eup %5658  ;;  %v520_v61 = vsel %vm506_vm14, %v517_v5, %v519_v13  ;;  %v8355_v35 = vmul.u32.u64.low %v8322_v41, %v516_v51  ;;  %v8356_v3 = vmul.u32.u64.high %v8322_v41, %v516_v51, %v8355_v35  ;;  %v377_v48 = vor.u32 8388608, %v376_v24 }
 0x2ad   : > { %v5661_v33 = vpop.eup %5660  ;;  %v3018_v21 = vxor.u32 2147483648, %v5659_v27  ;;  %v3102_v30 = vand.u32 2147483647, %v3101_v46  ;;  %v8360_v42 = vmul.u32.u64.low %v8322_v41, %v520_v61  ;;  %v8361_v7 = vmul.u32.u64.high %v8322_v41, %v520_v61, %v8360_v42 }
 0x2ae   : > { %v3015_v15 = vxor.u32 2147483648, %v5661_v33  ;;  %vm3014_vm9 = vcmp.eq.s32.totalorder %v8319_v20, 0  ;;  %v379_v0 = vadd.s32 1, %v5165_v58  ;;  %v8366_v60 = vand.u32 3, %v8312_v40 }
 0x2af   : > { %v3105_v16 = vmul.f32 %v3104_v6, %v3102_v30  ;;  %vm3017_vm10 = vcmp.eq.s32.totalorder %v8319_v20, 2  ;;  %v8370_v29 = vand.u32 3, %v8325_v43  ;;  %v528_v57 = vmul.u32 %v8322_v41, %v512_v11 }
 0x2b0   : > { %v531_v45 = vadd.s32 1, %v8356_v3  ;;  %vm380_vm7 = vcmp.gt.s32.totalorder %v379_v0, 0  ;;  %v8374_v55 = vshll.u32 %v377_v48, 8  ;;  %v4665_v49 = vsel %vm4663_vm8, %v5659_v27, %v3015_v15 }
 0x2b1   : > { %v3106_v14 = vxor.u32 2147483648, %v3105_v16  ;;  %v4668_v40 = vsel %vm4666_vm5, %v3018_v21, %v5661_v33  ;;  %v8381_v28 = vmul.f32 %v8238_v32, %v354_v8  ;;  %v3019_v43 = vsel %vm3017_vm10, %v3018_v21, %v5661_v33 }
 0x2b2   : > { %vm530_vm4 = vc.u32 %v8361_v7, %v8355_v35  ;;  %v381_v41 = vsel %vm380_vm7, %v379_v0, 0  ;;  %v8386_v53 = vmul.f32 %v8238_v32, %v359_v31  ;;  %v3016_v25 = vsel %vm3014_vm9, %v5659_v27, %v3015_v15 }
 0x2b3   : > { %v3107_v56 = vsel %vm3024_vm13, %v3106_v14, %v3105_v16  ;;  %v532_v59 = vsel %vm530_vm4, %v531_v45, %v8356_v3  ;;  %v383_v22 = vand.u32 31, %v381_v41  ;;  %v4669_v47 = vsel %vm4662_vm15, %v4665_v49, %v4668_v40 }
 0x2b4   : > { %v3110_v36 = vsel %vm8305_vm11, %v9184_v9, %v3107_v56  ;;  %vm3013_vm12 = vcmp.lt.s32.totalorder %v8319_v20, 2  ;;  %v533_v32 = vadd.s32 %v532_v59, %v528_v57  ;;  %v382_v62 = vshrl.u32 %v381_v41, 5 }
 0x2b5   : > { %5662 = vcosq.f32 %v3110_v36  ;;  %v384_v5 = vsub.s32 32, %v383_v22  ;;  %v386_v52 = vshll.u32 %v9080_v26, %v383_v22  ;;  %v389_v1 = vshll.u32 %v9081_v10, %v383_v22 }
 0x2b6   : > { %5664 = vsinq.f32 %v3110_v36  ;;  %v534_v12 = vadd.s32 536870912, %v533_v32  ;;  %v392_v17 = vshll.u32 %v9082_v37, %v383_v22  ;;  %v395_v34 = vshll.u32 %v9041_v38, %v383_v22 }
 0x2b7   : > { %v385_v51 = vshrl.u32 %v9080_v26, %v384_v5  ;;  %v387_v63 = vshrl.u32 %v9081_v10, %v384_v5  ;;  %v390_v44 = vshrl.u32 %v9082_v37, %v384_v5  ;;  %v393_v58 = vshrl.u32 %v9041_v38, %v384_v5 }
 0x2b8   : > { %vm3010_vm13 = vweird.f32 %v9170_v18  ;;  %v8408_v24 = vshrl.u32 %v534_v12, 30  ;;  %v396_v46 = vshrl.u32 %v9056_v39, %v384_v5  ;;  %v398_v6 = vshll.u32 %v9056_v39, %v383_v22  ;;  %v5587_v18 = vld [vmem:[%s8882_s4 + $0x14] ss:$8 sps:$4 sm:$0xff]  }
 0x2b9   : > { %v399_v11 = vshrl.u32 %v9057_v19, %v384_v5  ;;  %vm4769_vm2 = vcmp.eq.s32.totalorder %v8366_v60, 2  ;;  %vm3121_vm11 = vcmp.eq.s32.totalorder %v8370_v29, 2  ;;  %v388_v13 = vor.u32 %v387_v63, %v386_v52 }
 0x2ba   : > { %v391_v27 = vor.u32 %v390_v44, %v389_v1  ;;  %v394_v61 = vor.u32 %v393_v58, %v392_v17  ;;  %vm401_vm6 = vcmp.lt.s32.totalorder %v382_v62, 1  ;;  %vm4766_vm3 = vcmp.eq.s32.totalorder %v8366_v60, 0 }
 0x2bb   : > { %vm3118_vm14 = vcmp.eq.s32.totalorder %v8370_v29, 0  ;;  %v536_v3 = vshll.u32 %v8408_v24, 30  ;;  %v397_v48 = vor.u32 %v396_v46, %v395_v34  ;;  %v400_v33 = vor.u32 %v399_v11, %v398_v6 }
 0x2bc   : > { %vm402_vm1 = vcmp.lt.s32.totalorder %v382_v62, 2  ;;  %vm4765_vm0 = vcmp.lt.s32.totalorder %v8366_v60, 2  ;;  %vm3117_vm8 = vcmp.lt.s32.totalorder %v8370_v29, 2  ;;  %vm403_vm15 = vcmp.lt.s32.totalorder %v382_v62, 3 }
 0x2bd   : > { %vm404_vm5 = vcmp.lt.s32.totalorder %v382_v62, 4  ;;  %v405_v21 = vsel %vm401_vm6, %v385_v51, %v388_v13  ;;  %v409_v30 = vsel %vm401_vm6, %v388_v13, %v391_v27  ;;  %vm3114_vm9 = vweird.f32 %v9184_v9  ;;  %v5584_v9 = vld [vmem:[%s8882_s4] ss:$8 sps:$4 sm:$0xff]  }
 0x2be   : > { %v8423_v42 = vsub.s32 %v533_v32, %v536_v3  ;;  %v406_v15 = vsel %vm404_vm5, %v394_v61, 2102212464  ;;  %v410_v0 = vsel %vm404_vm5, %v397_v48, 920167782  ;;  %v413_v8 = vsel %vm401_vm6, %v391_v27, %v394_v61 }
 0x2bf   : > { %v3020_v16 = vsel %vm3013_vm12, %v3016_v25, %v3019_v43  ;;  %v407_v31 = vsel %vm403_vm15, %v391_v27, %v406_v15  ;;  %v411_v57 = vsel %vm403_vm15, %v394_v61, %v410_v0  ;;  %v414_v45 = vsel %vm404_vm5, %v400_v33, 1326507024  ;;  %v5663_v56 = vpop.eup %5662 }
 0x2c0   : > { %v539_v14 = vsub.s32 0, %v8423_v42  ;;  %v412_v49 = vsel %vm402_vm1, %v409_v30, %v411_v57  ;;  %v415_v40 = vsel %vm403_vm15, %v397_v48, %v414_v45  ;;  %v577_v41 = vand.u32 2147483647, %v8381_v28  ;;  %v5665_v20 = vpop.eup %5664 }
 0x2c1   : > { %v408_v59 = vsel %vm402_vm1, %v405_v21, %v407_v31  ;;  %v416_v22 = vsel %vm402_vm1, %v413_v8, %v415_v40  ;;  %v8434_v36 = vmul.u32.u64.low %v8374_v55, %v412_v49  ;;  %v8435_v32 = vmul.u32.u64.high %v8374_v55, %v412_v49, %v8434_v36 }
 0x2c2   : > { %v3122_v43 = vxor.u32 2147483648, %v5663_v56  ;;  %v5170_v25 = vmin.u32 %v539_v14, %v8423_v42  ;;  %v8439_v5 = vmul.u32.u64.low %v8374_v55, %v416_v22  ;;  %v8440_v52 = vmul.u32.u64.high %v8374_v55, %v416_v22, %v8439_v5 }
 0x2c3   : > { %v3119_v1 = vxor.u32 2147483648, %v5665_v20  ;;  %v4670_v12 = vsel %vm3010_vm13, nan, %v4669_v47  ;;  %v529_v62 = vadd.s32 %v8355_v35, %v8361_v7  ;;  %v580_v17 = vand.u32 2139095040, %v8381_v28 }
 0x2c4   : > { %v4771_v34 = vsel %vm4769_vm2, %v3122_v43, %v5665_v20  ;;  %v3123_v51 = vsel %vm3121_vm11, %v3122_v43, %v5665_v20  ;;  %v541_v63 = vclz %v5170_v25  ;;  %v424_v44 = vmul.u32 %v8374_v55, %v408_v59 }
 0x2c5   : > { %v4768_v58 = vsel %vm4766_vm3, %v5663_v56, %v3119_v1  ;;  %v3120_v47 = vsel %vm3118_vm14, %v5663_v56, %v3119_v1  ;;  %v427_v46 = vadd.s32 1, %v8435_v32  ;;  %v581_v35 = vshrl.u32 %v580_v17, 23 }
 0x2c6   : > { %v4772_v7 = vsel %vm4765_vm0, %v4768_v58, %v4771_v34  ;;  %v3124_v6 = vsel %vm3117_vm8, %v3120_v47, %v3123_v51  ;;  %v5171_v11 = vadd.s32 4294967294, %v541_v63  ;;  %v584_v13 = vand.u32 8388607, %v577_v41  ;;  %v8496_v34 = vld [vmem:[%s8880_s2] sm:$0xff]  ;;  %v8507_v47 = vld [vmem:[%s8880_s2 + $0x8] sm:$0xff] }
 0x2c7   : > { %v4773_v55 = vsel %vm3114_vm9, nan, %v4772_v7  ;;  %v3125_v27 = vsel %vm3114_vm9, nan, %v3124_v6  ;;  %vm426_vm10 = vc.u32 %v8440_v52, %v8434_v36  ;;  %v5173_v61 = vadd.s32 4294967169, %v581_v35 }
 0x2c8   : > { %v4793_v3 = vpack.c.bf16 %v4773_v55, %v4670_v12  ;;  %v3021_v60 = vsel %vm3010_vm13, nan, %v3020_v16  ;;  %vm5172_vm7 = vcmp.lt.s32.totalorder %v5171_v11, 0  ;;  %v428_v29 = vsel %vm426_vm10, %v427_v46, %v8435_v32  ;;  %v5589_v46 = vld [vmem:[%s8882_s4 + $0x10] ss:$8 sps:$4 sm:$0xff]  }
 0x2c9   : > { %v4785_v48 = vpack.c.bf16 %v3125_v27, %v3021_v60  ;;  %v544_v33 = vsel %vm5172_vm7, 0, %v5171_v11  ;;  %v429_v21 = vadd.s32 %v428_v29, %v424_v44  ;;  %v587_v30 = vadd.s32 1, %v5173_v61 }
 0x2ca   : > { %5362 = vmatprep.subr.bf16.mxu1 %v4793_v3  ;;  %v545_v15 = vsub.s32 32, %v544_v33  ;;  %v549_v0 = vsub.s32 4294967266, %v544_v33  ;;  %v585_v8 = vor.u32 8388608, %v584_v13  ;;  %v546_v16 = vshll.u32 %v8423_v42, %v544_v33 }
 0x2cb   : > { %5363 = vmatpush3.bf16.msra.mxu1 %v4785_v48  ;;  %v430_v31 = vadd.s32 536870912, %v429_v21  ;;  %vm588_vm4 = vcmp.gt.s32.totalorder %v587_v30, 0  ;;  %v684_v49 = vand.u32 2139095040, %v8386_v53  ;;  %v8480_v40 = vadd.s32 %v8434_v36, %v8440_v52 }
 0x2cc   : > { %v547_v57 = vshrl.u32 %v529_v62, %v545_v15  ;;  %v550_v45 = vadd.s32 127, %v549_v0  ;;  %v589_v14 = vsel %vm588_vm4, %v587_v30, 0  ;;  %v681_v22 = vand.u32 2147483647, %v8386_v53  ;;  %v8523_v30 = vld [vmem:[%s8880_s2 + $0x10] sm:$0xff] }
 0x2cd   : > { %v8482_v56 = vshrl.u32 %v430_v31, 30  ;;  %v591_v59 = vand.u32 31, %v589_v14  ;;  %v590_v20 = vshrl.u32 %v589_v14, 5  ;;  %v8485_v43 = vshll.u32 %v585_v8, 8 }
 0x2ce   : > { %4871 = vmatmul.mubr.bf16.vlgmr.msra.gmra.mrb[0].mxu1 %v5584_v9  ;;  %v551_v32 = vshll.u32 %v550_v45, 23  ;;  %v5876_v36 = vmov 5   ;;  %v548_v52 = vor.u32 %v547_v57, %v546_v16  ;;  %v685_v17 = vshrl.u32 %v684_v49, 23 }
 0x2cf   : > { %4878 = vmatprep.mubr.bf16.mxu1 %v5587_v18  ;;  %v432_v42 = vshll.u32 %v8482_v56, 30  ;;  %v592_v25 = vsub.s32 32, %v591_v59  ;;  %v594_v5 = vshll.u32 %v9080_v26, %v591_v59  ;;  %v597_v1 = vshll.u32 %v9081_v10, %v591_v59  ;;  %5572 = vset.pattern.permute.xlu1 %v5876_v36 }
 0x2d0   : > { %v600_v12 = vshll.u32 %v9082_v37, %v591_v59  ;;  %v603_v62 = vshll.u32 %v9041_v38, %v591_v59  ;;  %4795 = vperm.xlu1 %5572, %v8496_v34   ;;  %5573 = vset.pattern.permute.xlu0 %v5876_v36  ;;  %v552_v51 = vor.u32 4788187, %v551_v32  ;;  %v606_v11 = vshll.u32 %v9056_v39, %v591_v59 }
 0x2d1   : > { %v8500_v63 = vsub.s32 %v429_v21, %v432_v42  ;;  %v595_v44 = vshrl.u32 %v9081_v10, %v592_v25  ;;  %v598_v58 = vshrl.u32 %v9082_v37, %v592_v25  ;;  %4799 = vperm.xlu0 %5573, %v8507_v47   ;;  %v593_v35 = vshrl.u32 %v9080_v26, %v592_v25 }
 0x2d2   : > { %v601_v7 = vshrl.u32 %v9041_v38, %v592_v25  ;;  %v604_v6 = vshrl.u32 %v9056_v39, %v592_v25  ;;  %v607_v61 = vshrl.u32 %v9057_v19, %v592_v25  ;;  %v555_v3 = vcvt.s32.f32 %v548_v52 }
 0x2d3   : > { %v435_v13 = vsub.s32 0, %v8500_v63  ;;  %v596_v55 = vor.u32 %v595_v44, %v594_v5  ;;  %v599_v27 = vor.u32 %v598_v58, %v597_v1  ;;  %vm609_vm12 = vcmp.lt.s32.totalorder %v590_v20, 1 }
 0x2d4   : > { %v602_v60 = vor.u32 %v601_v7, %v600_v12  ;;  %v605_v29 = vor.u32 %v604_v6, %v603_v62  ;;  %v553_v48 = vand.u32 2147483647, %v552_v51  ;;  %v608_v21 = vor.u32 %v607_v61, %v606_v11 }
 0x2d5   : > { %v5166_v33 = vmin.u32 %v435_v13, %v8500_v63  ;;  %vm611_vm13 = vcmp.lt.s32.totalorder %v590_v20, 3  ;;  %4803 = vperm.xlu0 %5573, %v8523_v30   ;;  %vm610_vm2 = vcmp.lt.s32.totalorder %v590_v20, 2  ;;  %vm612_vm11 = vcmp.lt.s32.totalorder %v590_v20, 4 }
 0x2d6   : > { %4879 = vmatmul.mubr.bf16.gmra.mrb[4].mxu1 %v5589_v46  ;;  %v613_v9 = vsel %vm609_vm12, %v593_v35, %v596_v55  ;;  %v617_v15 = vsel %vm609_vm12, %v596_v55, %v599_v27  ;;  %v614_v8 = vsel %vm612_vm11, %v602_v60, 2102212464  ;;  %v618_v18 = vsel %vm612_vm11, %v605_v29, 920167782 }
 0x2d7   : > { %v437_v0 = vclz %v5166_v33  ;;  %v621_v16 = vsel %vm609_vm12, %v599_v27, %v602_v60  ;;  %v615_v31 = vsel %vm611_vm13, %v599_v27, %v614_v8  ;;  %v619_v57 = vsel %vm611_vm13, %v602_v60, %v618_v18 }
 0x2d8   : > { %v622_v45 = vsel %vm612_vm11, %v608_v21, 1326507024  ;;  %v688_v14 = vand.u32 8388607, %v681_v22  ;;  %v616_v59 = vsel %vm610_vm2, %v613_v9, %v615_v31  ;;  %v620_v32 = vsel %vm610_vm2, %v617_v15, %v619_v57 }
 0x2d9   : > { %v5167_v49 = vadd.s32 4294967294, %v437_v0  ;;  %v623_v42 = vsel %vm611_vm13, %v605_v29, %v622_v45  ;;  %v556_v25 = vmul.f32 %v555_v3, %v553_v48  ;;  %v5177_v51 = vadd.s32 4294967169, %v685_v17 }
 0x2da   : > { %v624_v5 = vsel %vm610_vm2, %v621_v16, %v623_v42  ;;  %v8535_v1 = vmul.u32.u64.low %v8485_v43, %v620_v32  ;;  %v8536_v52 = vmul.u32.u64.high %v8485_v43, %v620_v32, %v8535_v1  ;;  %v632_v58 = vmul.u32 %v8485_v43, %v616_v59 }
 0x2db   : > { %vm5168_vm6 = vcmp.lt.s32.totalorder %v5167_v49, 0  ;;  %v8540_v12 = vmul.u32.u64.low %v8485_v43, %v624_v5  ;;  %v8541_v62 = vmul.u32.u64.high %v8485_v43, %v624_v5, %v8540_v12  ;;  %v691_v20 = vadd.s32 1, %v5177_v51 }
 0x2dc   : > { %v440_v44 = vsel %vm5168_vm6, 0, %v5167_v49  ;;  %v5877_v6 = vmov 6   ;;  %v557_v11 = vxor.u32 2147483648, %v556_v25  ;;  %v635_v13 = vadd.s32 1, %v8536_v52 }
 0x2dd   : > { %v441_v46 = vsub.s32 32, %v440_v44  ;;  %v442_v35 = vshll.u32 %v8500_v63, %v440_v44  ;;  %v445_v7 = vsub.s32 4294967266, %v440_v44  ;;  %5574 = vset.pattern.permute.xlu1 %v5877_v6  ;;  %5576 = vset.pattern.permute.xlu0 %v5877_v6  ;;  %v689_v55 = vor.u32 8388608, %v688_v14 }
 0x2de   : > { %4888 = vperm.xlu1 %5574, %v8496_v34   ;;  %4896 = vperm.xlu0 %5576, %v8523_v30   ;;  %v455_v43 = vsub.s32 4, %v8482_v56  ;;  %vm475_vm3 = vcmp.lt.s32.totalorder %v8252_v2, 0  ;;  %vm634_vm14 = vc.u32 %v8541_v62, %v8535_v1  ;;  %vm371_vm1 = vcmp.lt.s32.totalorder %v8277_v54, 0 }
 0x2df   : > { %v443_v17 = vshrl.u32 %v8480_v40, %v441_v46  ;;  %v446_v63 = vadd.s32 127, %v445_v7  ;;  %v636_v27 = vsel %vm634_vm14, %v635_v13, %v8536_v52  ;;  %vm692_vm0 = vcmp.gt.s32.totalorder %v691_v20, 0 }
 0x2e0   : > { %v637_v60 = vadd.s32 %v636_v27, %v632_v58  ;;  %v693_v29 = vsel %vm692_vm0, %v691_v20, 0  ;;  %v8559_v48 = vsel %vm475_vm3, %v557_v11, %v556_v25  ;;  %v8561_v21 = vshll.u32 %v689_v55, 8 }
 0x2e1   : > { %v444_v61 = vor.u32 %v443_v17, %v442_v35  ;;  %v447_v3 = vshll.u32 %v446_v63, 23  ;;  %v695_v33 = vand.u32 31, %v693_v29  ;;  %v5878_v40 = vmov 3  }
 0x2e2   : > { %4892 = vperm.xlu1 %5574, %v8507_v47   ;;  %5579 = vset.pattern.permute.xlu0 %v5878_v40  ;;  %v456_v9 = vsel %vm371_vm1, %v455_v43, %v8482_v56  ;;  %v638_v8 = vadd.s32 536870912, %v637_v60  ;;  %v694_v18 = vshrl.u32 %v693_v29, 5  ;;  %vm8571_vm8 = vcmp.le.f32.partialorder %v369_v50, 0.7853982 }
 0x2e3   : > { %v448_v15 = vor.u32 4788187, %v447_v3  ;;  %v451_v0 = vcvt.s32.f32 %v444_v61  ;;  %4920 = vperm.xlu0 %5579, %v8507_v47   ;;  %v696_v31 = vsub.s32 32, %v695_v33  ;;  %v698_v57 = vshll.u32 %v9080_v26, %v695_v33 }
 0x2e4   : > { %v701_v45 = vshll.u32 %v9081_v10, %v695_v33  ;;  %v704_v14 = vshll.u32 %v9082_v37, %v695_v33  ;;  %v8578_v49 = vshrl.u32 %v638_v8, 30  ;;  %v707_v59 = vshll.u32 %v9041_v38, %v695_v33 }
 0x2e5   : > { %v449_v56 = vand.u32 2147483647, %v448_v15  ;;  %v710_v32 = vshll.u32 %v9056_v39, %v695_v33  ;;  %v697_v42 = vshrl.u32 %v9080_v26, %v696_v31  ;;  %v699_v50 = vshrl.u32 %v9081_v10, %v696_v31  ;;  %v8599_v10 = vld [vmem:[%s8880_s2 + $0x18] sm:$0xff] }
 0x2e6   : > { %v702_v25 = vshrl.u32 %v9082_v37, %v696_v31  ;;  %v705_v5 = vshrl.u32 %v9041_v38, %v696_v31  ;;  %5575 = vset.pattern.permute.xlu1 %v5876_v36  ;;  %vm8589_vm15 = vcmp.le.f32.partialorder %v473_v23, 0.7853982  ;;  %v640_v51 = vshll.u32 %v8578_v49, 30 }
 0x2e7   : > { %v452_v12 = vmul.f32 %v451_v0, %v449_v56  ;;  %v708_v44 = vshrl.u32 %v9056_v39, %v696_v31  ;;  %v711_v26 = vshrl.u32 %v9057_v19, %v696_v31  ;;  %4807 = vperm.xlu1 %5575, %v8599_v10   ;;  %v700_v38 = vor.u32 %v699_v50, %v698_v57 }
 0x2e8   : > { %v703_v37 = vor.u32 %v702_v25, %v701_v45  ;;  %v706_v23 = vor.u32 %v705_v5, %v704_v14  ;;  %vm713_vm5 = vcmp.lt.s32.totalorder %v694_v18, 1  ;;  %v8602_v58 = vsub.s32 %v637_v60, %v640_v51 }
 0x2e9   : > { %v453_v36 = vxor.u32 2147483648, %v452_v12  ;;  %v709_v46 = vor.u32 %v708_v44, %v707_v59  ;;  %v712_v35 = vor.u32 %v711_v26, %v710_v32  ;;  %vm714_vm9 = vcmp.lt.s32.totalorder %v694_v18, 2 }
 0x2ea   : > { %vm715_vm10 = vcmp.lt.s32.totalorder %v694_v18, 3  ;;  %vm716_vm7 = vcmp.lt.s32.totalorder %v694_v18, 4  ;;  %v559_v39 = vsub.s32 4, %v8408_v24  ;;  %v643_v7 = vsub.s32 0, %v8602_v58 }
 0x2eb   : > { %v454_v19 = vsel %vm371_vm1, %v453_v36, %v452_v12  ;;  %v718_v20 = vsel %vm716_vm7, %v706_v23, 2102212464  ;;  %v721_v11 = vsel %vm713_vm5, %v700_v38, %v703_v37  ;;  %5577 = vset.pattern.permute.xlu1 %v5877_v6  ;;  %v717_v13 = vsel %vm713_vm5, %v697_v42, %v700_v38 }
 0x2ec   : > { %v722_v55 = vsel %vm716_vm7, %v709_v46, 920167782  ;;  %v725_v43 = vsel %vm713_vm5, %v703_v37, %v706_v23  ;;  %v726_v17 = vsel %vm716_vm7, %v712_v35, 1326507024  ;;  %4900 = vperm.xlu1 %5577, %v8599_v10   ;;  %v5174_v63 = vmin.u32 %v643_v7, %v8602_v58 }
 0x2ed   : > { %v719_v27 = vsel %vm715_vm10, %v703_v37, %v718_v20  ;;  %v723_v61 = vsel %vm715_vm10, %v706_v23, %v722_v55  ;;  %v727_v3 = vsel %vm715_vm10, %v709_v46, %v726_v17  ;;  %v457_v29 = vsel %vm8571_vm8, %v8277_v54, %v454_v19 }
 0x2ee   : > { %v724_v60 = vsel %vm714_vm9, %v721_v11, %v723_v61  ;;  %v728_v6 = vsel %vm714_vm9, %v725_v43, %v727_v3  ;;  %v8624_v33 = vsel %vm8571_vm8, 0, %v456_v9  ;;  %v645_v15 = vclz %v5174_v63 }
 0x2ef   : > { %v8627_v0 = vmul.u32.u64.low %v8561_v21, %v728_v6  ;;  %v8628_v8 = vmul.u32.u64.high %v8561_v21, %v728_v6, %v8627_v0  ;;  %5666 = vcosq.f32 %v457_v29  ;;  %v720_v31 = vsel %vm714_vm9, %v717_v13, %v719_v27 }
 0x2f0   : > { %v8632_v57 = vmul.u32.u64.low %v8561_v21, %v724_v60  ;;  %v8633_v45 = vmul.u32.u64.high %v8561_v21, %v724_v60, %v8632_v57  ;;  %5578 = vset.pattern.permute.xlu1 %v5878_v40  ;;  %5668 = vsinq.f32 %v457_v29  ;;  %v5175_v14 = vadd.s32 4294967294, %v645_v15 }
 0x2f1   : > { %4916 = vperm.xlu1 %5578, %v8496_v34   ;;  %v462_v9 = vadd.s32 3, %v8624_v33  ;;  %v560_v16 = vsel %vm475_vm3, %v559_v39, %v8408_v24  ;;  %v561_v18 = vsel %vm8589_vm15, %v8252_v2, %v8559_v48  ;;  %v633_v56 = vadd.s32 %v8535_v1, %v8541_v62 }
 0x2f2   : > { %v8650_v40 = vsel %vm8589_vm15, 0, %v560_v16  ;;  %vm5176_vm4 = vcmp.lt.s32.totalorder %v5175_v14, 0  ;;  %v736_v59 = vmul.u32 %v8561_v21, %v720_v31  ;;  %vm738_vm12 = vc.u32 %v8628_v8, %v8632_v57  ;;  %v5696_v16 = vld [vmem:[%s6105_s30] sm:$0x1] }
 0x2f3   : > { %5670 = vcosq.f32 %v561_v18  ;;  %v648_v24 = vsel %vm5176_vm4, 0, %v5175_v14  ;;  %v739_v32 = vadd.s32 1, %v8633_v45  ;;  %v463_v1 = vand.u32 3, %v462_v9 }
 0x2f4   : > { %5672 = vsinq.f32 %v561_v18  ;;  %v649_v42 = vsub.s32 32, %v648_v24  ;;  %v653_v48 = vsub.s32 4294967266, %v648_v24  ;;  %v566_v62 = vadd.s32 3, %v8650_v40  ;;  %v9195_v18 = vld [vmem:[#allocation14_spill] sm:$0xff] }
 0x2f5   : > { %4924 = vperm.xlu1 %5578, %v8523_v30   ;;  %v650_v50 = vshll.u32 %v8602_v58, %v648_v24  ;;  %v740_v25 = vsel %vm738_vm12, %v739_v32, %v8633_v45  ;;  %vm468_vm13 = vcmp.eq.s32.totalorder %v463_v1, 2  ;;  %vm465_vm2 = vcmp.eq.s32.totalorder %v463_v1, 0  ;;  %v9196_v24 = vld [vmem:[#allocation15_spill] sm:$0xff] }
 0x2f6   : > { %v651_v21 = vshrl.u32 %v633_v56, %v649_v42  ;;  %v654_v5 = vadd.s32 127, %v653_v48  ;;  %v741_v52 = vadd.s32 %v740_v25, %v736_v59  ;;  %v567_v26 = vand.u32 3, %v566_v62  ;;  %v5697_v59 = vld [vmem:[%s6105_s30 + $0x1] sm:$0x1]  ;;  %v9199_v25 = vld [vmem:[#allocation16_spill] sm:$0xff] }
 0x2f7   : > { %vm464_vm11 = vcmp.lt.s32.totalorder %v463_v1, 2  ;;  %vm461_vm6 = vweird.f32 %v8277_v54  ;;  %vm565_vm0 = vweird.f32 %v8252_v2  ;;  %vm579_vm8 = vcmp.lt.s32.totalorder %v8381_v28, 0 }
 0x2f8   : > { %v655_v51 = vshll.u32 %v654_v5, 23  ;;  %v742_v44 = vadd.s32 536870912, %v741_v52  ;;  %v652_v37 = vor.u32 %v651_v21, %v650_v50  ;;  %vm569_vm3 = vcmp.eq.s32.totalorder %v567_v26, 0  ;;  %v5698_v50 = vld [vmem:[%s6105_s30 + $0x2] sm:$0x1] }
 0x2f9   : > { %v8660_v12 = vpop.eup %5666  ;;  %4928 = vperm.xlu1 %5578, %v8599_v10   ;;  %vm572_vm14 = vcmp.eq.s32.totalorder %v567_v26, 2  ;;  %vm568_vm1 = vcmp.lt.s32.totalorder %v567_v26, 2  ;;  %v1342_v56 = vmul.f32 %v5696_v16, %v9195_v18  ;;  %v1343_v32 = vmul.f32 %v5697_v59, %v9196_v24 }
 0x2fa   : > { %v8663_v38 = vpop.eup %5668  ;;  %v469_v23 = vxor.u32 2147483648, %v8660_v12  ;;  %v656_v36 = vor.u32 4788187, %v655_v51  ;;  %v8666_v58 = vshrl.u32 %v742_v44, 30  ;;  %v659_v13 = vcvt.s32.f32 %v652_v37 }
 0x2fb   : > { %v466_v46 = vxor.u32 2147483648, %v8663_v38  ;;  %v737_v42 = vadd.s32 %v8632_v57, %v8628_v8  ;;  %vm8703_vm5 = vcmp.le.f32.partialorder %v577_v41, 0.7853982  ;;  %v1345_v21 = vmul.f32 %v5698_v50, %v9199_v25  ;;  %v5699_v8 = vld [vmem:[%s6105_s30 + $0x3] sm:$0x1] }
 0x2fc   : > { %v470_v35 = vsel %vm468_vm13, %v469_v23, %v8663_v38  ;;  %v744_v19 = vshll.u32 %v8666_v58, 30  ;;  %v657_v11 = vand.u32 2147483647, %v656_v36  ;;  %v1357_v57 = vmul.f32 %v5699_v8, %v9195_v18  ;;  %v5700_v36 = vld [vmem:[%s6105_s30 + $0x4] sm:$0x1] }
 0x2fd   : > { %v8673_v39 = vpop.eup %5670  ;;  %v467_v7 = vsel %vm465_vm2, %v8660_v12, %v466_v46  ;;  %v663_v44 = vsub.s32 4, %v8578_v49  ;;  %v1344_v41 = vadd.f32 %v1343_v32, %v1342_v56  ;;  %v767_v16 = vsub.s32 4, %v8666_v58  ;;  %v9202_v56 = vld [vmem:[#allocation18_spill] sm:$0xff] }
 0x2fe   : > { %v8679_v20 = vpop.eup %5672  ;;  %v471_v55 = vsel %vm464_vm11, %v467_v7, %v470_v35  ;;  %v573_v43 = vxor.u32 2147483648, %v8673_v39  ;;  %v745_v17 = vsub.s32 %v741_v52, %v744_v19  ;;  %v660_v6 = vmul.f32 %v659_v13, %v657_v11  ;;  %v5701_v19 = vld [vmem:[%s6105_s30 + $0x5] sm:$0x1]  ;;  %s310_s30 = scalar_lea.vmem [#allocation8], %s5160_s29 }
 0x2ff   : > { %v570_v63 = vxor.u32 2147483648, %v8679_v20  ;;  %v472_v3 = vsel %vm461_vm6, nan, %v471_v55  ;;  %v1358_v35 = vmul.f32 %v5700_v36, %v9196_v24  ;;  %v1360_v7 = vmul.f32 %v5701_v19, %v9199_v25  ;;  %v9200_v11 = vld [vmem:[#allocation17_spill] sm:$0xff]  ;;  %s5048_s8 = sshll.u32 %s310_s30, 4  ;;  %s8829_s8 = int_to_ptr.vmem [resolvable:$true] %s5048_s8 }
 0x300   : > { %v574_v27 = vsel %vm572_vm14, %v573_v43, %v8679_v20  ;;  %v747_v61 = vsub.s32 0, %v745_v17  ;;  %v661_v14 = vxor.u32 2147483648, %v660_v6  ;;  %v1372_v13 = vmul.f32 %v9200_v11, %v9200_v11  ;;  %s5788_s14 = scalar_lea.vmem %s8829_s8, 512  ;;  %p5795_p7 = scmp.lt.s32.totalorder %s8829_s8, %s5793_s16 }
 0x301   : > { %v571_v60 = vsel %vm569_vm3, %v8673_v39, %v570_v63  ;;  %vm683_vm9 = vcmp.lt.s32.totalorder %v8386_v53, 0  ;;  %vm8748_vm12 = vcmp.le.f32.partialorder %v681_v22, 0.7853982  ;;  %vm669_vm3 = vweird.f32 %v8381_v28  ;;  %p5789_p9 = scmp.ne.s32.totalorder %s8829_s8, %s5788_s14  ;;  %p5796_p2 = scmp.lt.s32.totalorder %s5794_s15, %s5788_s14 }
 0x302   : > { %v575_v29 = vsel %vm568_vm1, %v571_v60, %v574_v27  ;;  %v5178_v15 = vmin.u32 %v747_v61, %v745_v17  ;;  %v662_v1 = vsel %vm579_vm8, %v661_v14, %v660_v6  ;;  %v9201_v27 = vld [vmem:[#allocation20_spill] sm:$0xff]  ;;  %v1359_v6 = vadd.f32 %v1358_v35, %v1357_v57 }
 0x303   : > { %v576_v0 = vsel %vm565_vm0, nan, %v575_v29  ;;  %v665_v55 = vsel %vm8703_vm5, %v8381_v28, %v662_v1  ;;  %v1375_v61 = vmul.f32 %v9201_v27, %v9201_v27  ;;  %v878_v29 = vand.u32 3, %v8624_v33  ;;  %p5790_p1 = pnand %p5789_p9, %p9207_p10  ;;  %p5797_p5 = por %p5796_p2, %p5795_p7 }
 0x304   : > { %v1201_v31 = vpack.c.bf16 %v576_v0, %v472_v3  ;;  %v749_v45 = vclz %v5178_v15  ;;  %v981_v15 = vand.u32 3, %v8650_v40  ;;  %v664_v0 = vsel %vm579_vm8, %v663_v44, %v8578_v49  ;;  %v9203_v40 = vld [vmem:[#allocation21_spill] sm:$0xff] }
 0x305   : > { %5674 = vcosq.f32 %v665_v55  ;;  %v1384_v33 = vmul.f32 %v9202_v56, %v9202_v56  ;;  %v1387_v59 = vmul.f32 %v9203_v40, %v9203_v40  ;;  %v666_v49 = vsel %vm8703_vm5, 0, %v664_v0  ;;  %p5791_p0 = pneg %p5790_p1 }
 0x306   : > { %5380 = vmatprep.subr.bf16.mxu0 %v1201_v31  ;;  %v5179_v9 = vadd.s32 4294967294, %v749_v45  ;;  %5676 = vsinq.f32 %v665_v55  ;;  %vm880_vm10 = vcmp.eq.s32.totalorder %v878_v29, 0  ;;  %vm883_vm7 = vcmp.eq.s32.totalorder %v878_v29, 2 }
 0x307   : > { %5381 = vmatpush3.bf16.msra.mxu0 %v1201_v31  ;;  %vm986_vm4 = vcmp.eq.s32.totalorder %v981_v15, 2  ;;  %vm983_vm13 = vcmp.eq.s32.totalorder %v981_v15, 0  ;;  %v768_v48 = vsel %vm683_vm9, %v767_v16, %v8666_v58  ;;  %vm879_vm2 = vcmp.lt.s32.totalorder %v878_v29, 2  ;;  %p5798_p11 = pnand %p5797_p5, %p5791_p0 }
 0x308   : > { %vm5180_vm15 = vcmp.lt.s32.totalorder %v5179_v9, 0  ;;  %v670_v25 = vadd.s32 3, %v666_v49  ;;  %v885_v22 = vsel %vm883_vm7, %v469_v23, %v8663_v38  ;;  %vm982_vm11 = vcmp.lt.s32.totalorder %v981_v15, 2 }
 0x309   : > { %v752_v62 = vsel %vm5180_vm15, 0, %v5179_v9  ;;  %v8734_v9 = vadd.f32 %v1360_v7, %v1359_v6  ;;  %v770_v8 = vsel %vm8748_vm12, 0, %v768_v48  ;;  %vm773_vm5 = vweird.f32 %v8386_v53 }
 0x30a   : > { %v753_v5 = vsub.s32 32, %v752_v62  ;;  %v754_v52 = vshll.u32 %v745_v17, %v752_v62  ;;  %v757_v51 = vsub.s32 4294967266, %v752_v62  ;;  %v8723_v17 = vadd.f32 %v1345_v21, %v1344_v41 }
 0x30b   : > { %v774_v41 = vadd.s32 3, %v770_v8 }
 0x30c   : > { %v755_v26 = vshrl.u32 %v737_v42, %v753_v5  ;;  %v758_v37 = vadd.s32 127, %v757_v51  ;;  %v1373_v31 = vmul.f32 %v8723_v17, %v8723_v17  ;;  %v1385_v42 = vmul.f32 %v8734_v9, %v8734_v9 }
 0x30d   : > { %v882_v5 = vsel %vm880_vm10, %v8660_v12, %v466_v46  ;;  %v985_v51 = vsel %vm983_vm13, %v8673_v39, %v570_v63  ;;  %v1187_v63 = vand.u32 3, %v770_v8  ;;  %v775_v19 = vand.u32 3, %v774_v41 }
 0x30e   : > { %v756_v3 = vor.u32 %v755_v26, %v754_v52  ;;  %v759_v60 = vshll.u32 %v758_v37, 23  ;;  %v1374_v18 = vadd.f32 %v1373_v31, %v1372_v13  ;;  %v1386_v21 = vadd.f32 %v1385_v42, %v1384_v33 }
 0x30f   : > { %v988_v52 = vsel %vm986_vm4, %v573_v43, %v8679_v20  ;;  %v5675_v38 = vpop.eup %5674  ;;  %v886_v23 = vsel %vm879_vm2, %v882_v5, %v885_v22  ;;  %v671_v43 = vand.u32 3, %v670_v25  ;;  %v1084_v20 = vand.u32 3, %v666_v49 }
 0x310   : > { %v760_v45 = vor.u32 4788187, %v759_v60  ;;  %v763_v14 = vcvt.s32.f32 %v756_v3  ;;  %v1376_v32 = vadd.f32 %v1375_v61, %v1374_v18  ;;  %v8771_v46 = vadd.f32 %v1387_v59, %v1386_v21  ;;  %v5677_v57 = vpop.eup %5676 }
 0x311   : > { %v989_v44 = vsel %vm982_vm11, %v985_v51, %v988_v52  ;;  %v887_v39 = vsel %vm461_vm6, nan, %v886_v23  ;;  %vm673_vm14 = vcmp.eq.s32.totalorder %v671_v43, 0  ;;  %v674_v37 = vxor.u32 2147483648, %v5677_v57 }
 0x312   : > { %v761_v24 = vand.u32 2147483647, %v760_v45  ;;  %5678 = vrsqrt.f32 %v1376_v32  ;;  %v990_v26 = vsel %vm565_vm0, nan, %v989_v44  ;;  %v677_v36 = vxor.u32 2147483648, %v5675_v38 }
 0x313   : > { %vm676_vm1 = vcmp.eq.s32.totalorder %v671_v43, 2  ;;  %vm1379_vm8 = vcmp.eq.f32.partialorder %v1376_v32, inf  ;;  %v1382_v7 = vand.u32 2147483648, %v1376_v32  ;;  %vm672_vm15 = vcmp.lt.s32.totalorder %v671_v43, 2 }
 0x314   : > { %v764_v1 = vmul.f32 %v763_v14, %v761_v24  ;;  %vm1381_vm6 = vcmp.eq.f32.partialorder %v1376_v32, 0.0  ;;  %vm1086_vm10 = vcmp.eq.s32.totalorder %v1084_v20, 0  ;;  %vm1089_vm7 = vcmp.eq.s32.totalorder %v1084_v20, 2 }
 0x315   : > { %vm1188_vm4 = vcmp.lt.s32.totalorder %v1187_v63, 2  ;;  %v675_v2 = vsel %vm673_vm14, %v5675_v38, %v674_v37  ;;  %v678_v11 = vsel %vm676_vm1, %v677_v36, %v5677_v57  ;;  %vm1189_vm0 = vcmp.eq.s32.totalorder %v1187_v63, 0 }
 0x316   : > { %v765_v50 = vxor.u32 2147483648, %v764_v1  ;;  %vm777_vm13 = vcmp.eq.s32.totalorder %v775_v19, 0  ;;  %vm780_vm2 = vcmp.eq.s32.totalorder %v775_v19, 2  ;;  %v1091_v3 = vsel %vm1089_vm7, %v677_v36, %v5677_v57 }
 0x317   : > { %vm1192_vm11 = vcmp.eq.s32.totalorder %v1187_v63, 2  ;;  %v1370_v60 = vmul.f32 %v9203_v40, %v9201_v27  ;;  %v679_v15 = vsel %vm672_vm15, %v675_v2, %v678_v11  ;;  %v1088_v31 = vsel %vm1086_vm10, %v5675_v38, %v674_v37 }
 0x318   : > { %v766_v58 = vsel %vm683_vm9, %v765_v50, %v764_v1  ;;  %vm1085_vm9 = vcmp.lt.s32.totalorder %v1084_v20, 2  ;;  %v1368_v45 = vmul.f32 %v8734_v9, %v8723_v17  ;;  %vm1391_vm14 = vcmp.eq.f32.partialorder %v8771_v46, inf }
 0x319   : > { %v769_v12 = vsel %vm8748_vm12, %v8386_v53, %v766_v58  ;;  %vm776_vm12 = vcmp.lt.s32.totalorder %v775_v19, 2  ;;  %v1394_v18 = vand.u32 2147483648, %v8771_v46  ;;  %vm1393_vm1 = vcmp.eq.f32.partialorder %v8771_v46, 0.0  ;;  %v5590_v58 = vld [vmem:[#allocation5] sm:$0xff]   ;;  %v5592_v53 = vld [vmem:[#allocation7] sm:$0xff]  }
 0x31a   : > { %5680 = vcosq.f32 %v769_v12  ;;  %v680_v40 = vsel %vm669_vm3, nan, %v679_v15  ;;  %v1092_v17 = vsel %vm1085_vm9, %v1088_v31, %v1091_v3  ;;  %v1203_v25 = vpack.c.bf16 %v990_v26, %v887_v39 }
 0x31b   : > { %5682 = vsinq.f32 %v769_v12  ;;  %v1093_v5 = vsel %vm669_vm3, nan, %v1092_v17  ;;  %v5591_v12 = vld [vmem:[#allocation5 + $0x8] sm:$0xff]   ;;  %vm4971_vm3 = vcmask 261120   ;;  %v5879_v23 = vmov 2  }
 0x31c   : > { %5684 = vrsqrt.f32 %v8771_v46  ;;  %v5679_v35 = vpop.eup %5678  ;;  %5581 = vset.pattern.permute.xlu1 %v5879_v23  ;;  %5580 = vset.pattern.permute.xlu0 %v5879_v23  ;;  %v5880_v43 = vmov 4  }
 0x31d   : > { %v1378_v54 = vmul.f32 %v5679_v35, %v1376_v32  ;;  %1210 = vperm.xlu1 %5581, %v8507_v47   ;;  %1206 = vperm.xlu0 %5580, %v8496_v34  }
 0x31f   : > { %v1380_v13 = vsel %vm1379_vm8, %v1376_v32, %v1378_v54  ;;  %v9206_v32 = vld [vmem:[#allocation19_spill] sm:$0xff]  ;;  %vm1231_vm8 = vcmask 523264  }
 0x320   : > { %v1383_v55 = vsel %vm1381_vm6, %v1382_v7, %v1380_v13  ;;  %v1369_v42 = vadd.f32 %v1368_v45, %v9206_v32  ;;  %5388 = vmatprep.mubr.msk.bf16.mxu0 %vm1231_vm8, %v5590_v58 }
 0x321   : > { %v1396_v6 = vadd.f32 1e-05, %v1383_v55  ;;  %1214 = vperm.xlu1 %5581, %v8523_v30   ;;  %1218 = vperm.xlu0 %5580, %v8599_v10  }
 0x322   : > { %v1371_v52 = vadd.f32 %v1370_v60, %v1369_v42 }
 0x323   : > { %5686 = vrcp.f32 %v1396_v6 }
 0x324   : > { %v5681_v61 = vpop.eup %5680 }
 0x325   : > { %v5683_v29 = vpop.eup %5682  ;;  %v781_v0 = vxor.u32 2147483648, %v5681_v61  ;;  %5582 = vset.pattern.permute.xlu1 %v5880_v43  ;;  %5583 = vset.pattern.permute.xlu0 %v5880_v43 }
 0x326   : > { %v5685_v14 = vpop.eup %5684  ;;  %v778_v16 = vxor.u32 2147483648, %v5683_v29  ;;  %4946 = vperm.xlu1 %5582, %v8496_v34   ;;  %4950 = vperm.xlu0 %5583, %v8507_v47  }
 0x327   : > { %v782_v56 = vsel %vm780_vm2, %v781_v0, %v5683_v29  ;;  %v1194_v27 = vsel %vm1192_vm11, %v781_v0, %v5683_v29  ;;  %v1390_v33 = vmul.f32 %v5685_v14, %v8771_v46 }
 0x328   : > { %v779_v59 = vsel %vm777_vm13, %v5681_v61, %v778_v16  ;;  %v1191_v9 = vsel %vm1189_vm0, %v5681_v61, %v778_v16 }
 0x329   : > { %v783_v24 = vsel %vm776_vm12, %v779_v59, %v782_v56  ;;  %v1195_v49 = vsel %vm1188_vm4, %v1191_v9, %v1194_v27  ;;  %v1392_v1 = vsel %vm1391_vm14, %v8771_v46, %v1390_v33 }
 0x32a   : > { %v784_v62 = vsel %vm773_vm5, nan, %v783_v24  ;;  %v1395_v48 = vsel %vm1393_vm1, %v1394_v18, %v1392_v1  ;;  %v1196_v22 = vsel %vm773_vm5, nan, %v1195_v49  ;;  %4954 = vperm.xlu1 %5582, %v8523_v30  }
 0x32b   : > { %v1202_v50 = vpack.c.bf16 %v784_v62, %v680_v40  ;;  %v1399_v21 = vadd.f32 1e-05, %v1395_v48  ;;  %v1204_v51 = vpack.c.bf16 %v1196_v22, %v1093_v5 }
 0x32d   : > { %5382 = vmatprep.subr.bf16.mxu0 %v1202_v50  ;;  %5688 = vrcp.f32 %v1399_v21  ;;  %v5687_v8 = vpop.eup %5686 }
 0x32e   : > { %5383 = vmatpush3.bf16.msra.mxu0 %v1202_v50  ;;  %v1398_v46 = vmul.f32 %v5687_v8, %v1371_v52  ;;  %4958 = vperm.xlu1 %5582, %v8599_v10  }
 0x32f   : > { %5384 = vmatprep.subr.bf16.mxu0 %v1203_v25 }
 0x332   : > { %5385 = vmatpush3.bf16.msra.mxu0 %v1203_v25 }
 0x333   : > { %5386 = vmatprep.subr.bf16.mxu0 %v1204_v51 }
 0x336   : > { %5387 = vmatpush3.bf16.msra.mxu0 %v1204_v51 }
 0x337   : > { %v5689_v28 = vpop.eup %5688 }
 0x338   : > { %v1401_v38 = vmul.f32 %v5689_v28, %v1398_v46 }
 0x339   : > { %5389 = vmatmul.mubr.msk.bf16.vlgmr.msra.gmra.mrb[0].mxu0 %vm1231_vm8, %v5591_v12 }
 0x33a   : > { %5396 = vmatprep.mubr.msk.bf16.mxu0 %vm4971_vm3, %v5592_v53  ;;  %v5201_v57 = vclamps-f32 %v1401_v38, 1.0  ;;  %v5593_v53 = vld [vmem:[#allocation7 + $0x8] sm:$0xff]  }
 0x33c   : > { %v1404_v44 = vmul.f32 %v5201_v57, %v5201_v57  ;;  %v4906_v2 = vrot.slane %v5201_v57, %v9187_v4 }
 0x33e   : > { %v1405_v41 = vsub.f32 1.0, %v1404_v44 }
 0x340   : > { %v1406_v39 = vmax.f32 %v1405_v41, 0.0 }
 0x342   : > { %5690 = vrsqrt.f32 %v1406_v39  ;;  %vm1409_vm15 = vcmp.eq.f32.partialorder %v1406_v39, inf  ;;  %v1412_v35 = vand.u32 2147483648, %v1406_v39  ;;  %vm1411_vm5 = vcmp.eq.f32.partialorder %v1406_v39, 0.0 }
 0x34c   : > { %v5691_v26 = vpop.eup %5690 }
 0x34d   : > { %v1408_v36 = vmul.f32 %v5691_v26, %v1406_v39 }
 0x34f   : > { %v4796_v20 = vpop.permute.xlu1 %4795  ;;  %v1410_v34 = vsel %vm1409_vm15, %v1406_v39, %v1408_v36 }
 0x350   : > { %v4800_v19 = vpop.permute.xlu0 %4799  ;;  %v1413_v7 = vsel %vm1411_vm5, %v1412_v35, %v1410_v34  ;;  %v1289_v35 = vld [vmem:[%s6090_s26 + $0x10] sm:$0xff]  ;;  %v1287_v34 = vld [vmem:[%s6090_s26] sm:$0xff] }
 0x351   : > { %v4813_v10 = vrot.slane %v1413_v7, %v9187_v4 }
 0x353   : > { %v4814_v61 = vmul.f32 %v4813_v10, %v4796_v20  ;;  %v4815_v15 = vmul.f32 %v4813_v10, %v4800_v19 }
 0x354   : > { %v4804_v30 = vpop.permute.xlu0 %4803 }
 0x355   : > { %v4816_v59 = vmul.f32 %v4813_v10, %v4804_v30  ;;  %v1290_v30 = vld [vmem:[%s6090_s26 + $0x18] sm:$0xff] }
 0x35d   : > { %v4889_v63 = vpop.permute.xlu1 %4888  ;;  %v4897_v55 = vpop.permute.xlu0 %4896 }
 0x35e   : > { %v4907_v29 = vmul.f32 %v4906_v2, %v4889_v63  ;;  %v4909_v42 = vmul.f32 %v4906_v2, %v4897_v55 }
 0x361   : > { %v4893_v37 = vpop.permute.xlu1 %4892 }
 0x362   : > { %v4908_v14 = vmul.f32 %v4906_v2, %v4893_v37  ;;  %v4921_v56 = vpop.permute.xlu0 %4920 }
 0x366   : > { %v4808_v47 = vpop.permute.xlu1 %4807 }
 0x367   : > { %v4817_v49 = vmul.f32 %v4813_v10, %v4808_v47 }
 0x36b   : > { %v4901_v54 = vpop.permute.xlu1 %4900 }
 0x36c   : > { %v4910_v21 = vmul.f32 %v4906_v2, %v4901_v54  ;;  %v1288_v2 = vld [vmem:[%s6090_s26 + $0x8] sm:$0xff] }
 0x370   : > { %v4917_v45 = vpop.permute.xlu1 %4916 }
 0x374   : > { %v4925_v32 = vpop.permute.xlu1 %4924 }
 0x378   : > { %v4929_v8 = vpop.permute.xlu1 %4928 }
 0x39c   : > { %v1211_v41 = vpop.permute.xlu1 %1210  ;;  %v1207_v63 = vpop.permute.xlu0 %1206 }
 0x3a0   : > { %v1215_v39 = vpop.permute.xlu1 %1214  ;;  %v1219_v37 = vpop.permute.xlu0 %1218 }
 0x3a1   : > { %v5364_v11 = vpop.f32.mrb[0].mxu1 }
 0x3a2   : > { %v5365_v13 = vpop.f32.mrb[1].mxu1 }
 0x3a3   : > { %v5366_v3 = vadd.f32 %v5365_v13, %v5364_v11  ;;  %v5367_v60 = vpop.f32.mrb[2].mxu1 }
 0x3a4   : > { %v5368_v6 = vpop.f32.mrb[3].mxu1 }
 0x3a5   : > { %v4873_v0 = vadd.f32 %v5366_v3, %v4814_v61  ;;  %v5369_v31 = vadd.f32 %v5368_v6, %v5367_v60  ;;  %v4947_v20 = vpop.permute.xlu1 %4946  ;;  %v4951_v55 = vpop.permute.xlu0 %4950 }
 0x3a7   : > { %v4911_v16 = vadd.f32 %v4907_v29, %v4873_v0  ;;  %v4876_v18 = vadd.f32 %v5369_v31, %v4815_v15 }
 0x3a9   : > { %v5370_v27 = vpop.f32.mrb[4].mxu1  ;;  %v4912_v33 = vadd.f32 %v4908_v14, %v4876_v18  ;;  %v4931_v40 = vadd.f32 %v4917_v45, %v4911_v16  ;;  %v4955_v26 = vpop.permute.xlu1 %4954 }
 0x3aa   : > { %v5371_v4 = vpop.f32.mrb[5].mxu1 }
 0x3ab   : > { %v5372_v17 = vadd.f32 %v5371_v4, %v5370_v27  ;;  %v4932_v9 = vadd.f32 %v4921_v56, %v4912_v33  ;;  %v5373_v24 = vpop.f32.mrb[6].mxu1  ;;  %v4935_v48 = vmax.f32 %v4931_v40, 0.0 }
 0x3ac   : > { %v5374_v1 = vpop.f32.mrb[7].mxu1 }
 0x3ad   : > { %v4881_v62 = vadd.f32 %v5372_v17, %v4816_v59  ;;  %v4936_v50 = vmax.f32 %v4932_v9, 0.0  ;;  %v5375_v25 = vadd.f32 %v5374_v1, %v5373_v24  ;;  %v4959_v3 = vpop.permute.xlu1 %4958 }
 0x3af   : > { %v4913_v5 = vadd.f32 %v4909_v42, %v4881_v62  ;;  %v4943_v22 = vpack.c.bf16 %v4936_v50, %v4935_v48  ;;  %v4884_v52 = vadd.f32 %v5375_v25, %v4817_v49 }
 0x3b1   : > { %v4914_v58 = vadd.f32 %v4910_v21, %v4884_v52  ;;  %5392 = vmatprep.subr.bf16.mxu0 %v4943_v22  ;;  %v4933_v51 = vadd.f32 %v4925_v32, %v4913_v5 }
 0x3b2   : > { %5393 = vmatpush3.bf16.msra.mxu0 %v4943_v22 }
 0x3b3   : > { %v4934_v46 = vadd.f32 %v4929_v8, %v4914_v58  ;;  %v4937_v12 = vmax.f32 %v4933_v51, 0.0 }
 0x3b5   : > { %v4938_v28 = vmax.f32 %v4934_v46, 0.0 }
 0x3b7   : > { %v4944_v38 = vpack.c.bf16 %v4938_v28, %v4937_v12 }
 0x3b9   : > { %5394 = vmatprep.subr.bf16.mxu0 %v4944_v38 }
 0x3ba   : > { %5395 = vmatpush3.bf16.msra.mxu0 %v4944_v38 }
 0x3bd   : > { %5397 = vmatmul.mubr.msk.bf16.vlgmr.msra.gmra.mrb[4].mxu0 %vm4971_vm3, %v5593_v53 }
 0x40c   : > { %v5390_v23 = vpop.f32.mrb[0].mxu0 }
 0x40d   : > { %v1272_v43 = vpop.f32.mrb[1].mxu0  ;;  %v1281_v36 = vadd.f32 %v5390_v23, %v1215_v39 }
 0x40e   : > { %v5391_v57 = vpop.f32.mrb[2].mxu0  ;;  %v1273_v19 = vadd.f32 %v1272_v43, %v1207_v63 }
 0x40f   : > { %v1275_v44 = vpop.f32.mrb[3].mxu0  ;;  %v1284_v47 = vadd.f32 %v5391_v57, %v1219_v37  ;;  %v1293_v54 = vmul.f32 %v1289_v35, %v1281_v36 }
 0x410   : > { %v1276_v7 = vadd.f32 %v1275_v44, %v1211_v41  ;;  %v1291_v61 = vmul.f32 %v1287_v34, %v1273_v19 }
 0x411   : > { %v1294_v29 = vmul.f32 %v1290_v30, %v1284_v47 }
 0x412   : > { %v1292_v45 = vmul.f32 %v1288_v2, %v1276_v7 }
 0x490   : > { %v5398_v10 = vpop.f32.mrb[4].mxu0 }
 0x491   : > { %v5021_v11 = vadd.f32 %v5398_v10, %v4955_v26  ;;  %v5012_v13 = vpop.f32.mrb[5].mxu0 }
 0x492   : > { %v5013_v60 = vadd.f32 %v5012_v13, %v4947_v20  ;;  %v5399_v6 = vpop.f32.mrb[6].mxu0 }
 0x493   : > { %v5029_v15 = vadd.f32 %v5021_v11, %v1293_v54  ;;  %v5024_v0 = vadd.f32 %v5399_v6, %v4959_v3  ;;  %v5015_v31 = vpop.f32.mrb[7].mxu0 }
 0x494   : > { %v5027_v14 = vadd.f32 %v5013_v60, %v1291_v61  ;;  %v5016_v16 = vadd.f32 %v5015_v31, %v4951_v55 }
 0x495   : > { %5033 = vst [vmem:[%s310_s30 + $0x10] sm:$0xff] %v5029_v15  ;;  %v5030_v18 = vadd.f32 %v5024_v0, %v1294_v29 }
 0x496   : > { %5031 = vst [vmem:[%s310_s30] sm:$0xff] %v5027_v14  ;;  %v5028_v56 = vadd.f32 %v5016_v16, %v1292_v45 }
 0x497   : > { %5034 = vst [vmem:[%s310_s30 + $0x18] sm:$0xff] %v5030_v18 }
 0x498   : > { %5032 = vst [vmem:[%s310_s30 + $0x8] sm:$0xff] %v5028_v56 }
 0x499   : > { %5801 = shalt.err (!%p5798_p11)
}
 0x49a   : > { %s5802_s12 = scalar_lea.hbm %s8834_s25, 512  ;;  %s5806_s7 = scalar_lea.hbm %s8884_s6, 1024 }
 0x49b   : > { %p5803_p12 = scmp.ne.s32.totalorder %s8834_s25, %s5802_s12  ;;  %p5807_p8 = scmp.lt.u32.totalorder %s8834_s25, %s8884_s6 }
 0x49c   : > { %p5808_p13 = scmp.lt.u32.totalorder %s5806_s7, %s5802_s12  ;;  %p5810_p9 = scmp.lt.u32.totalorder %s5802_s12, %s8834_s25 }
 0x49d   : > { %p5804_p4 = pnand %p5803_p12, %p9207_p10 }
 0x49e   : > { %p5809_p3 = por %p5808_p13, %p5807_p8 }
 0x49f   : > { %p5805_p6 = pneg %p5804_p4 }
 0x4a0   : > { %p5811_p1 = por %p5810_p9, %p5809_p3 }
 0x4a2   : > { %p5812_p0 = pnand %p5811_p1, %p5805_p6 }
 0x4a4   : > { %5815 = shalt.err (!%p5812_p0)
}
 0x4a5   : > { %s5882_s28 = smov 128   ;;  %s5883_s29 = smov 256  }
 0x4a6   : > { %s5884_s26 = smov 8  }
 0x4a7   : > { %5490 = dma.vmem_to_hbm [thread:$0]  (%p9207_p10), %s8829_s8, 512, %s8834_s25, %s5036_s13, %s5882_s28, %s5883_s29, %s5884_s26  }
 0x4a8 PF: > { %s5063_s14 = sand.u32 1, %s5846_s21   ;;  %p9208_p7 = scmp.ne.s32.totalorder %s9003_s10, 0 }
 0x4a9   : > { %p9209_p2 = scmp.ge.s32.totalorder %s5858_s24, 2  ;;  %s5064_s19 = scalar_lea.sflag [#allocation4], %s5063_s14 }
 0x4ab   : > { %p5504_p5 = pnand %p9209_p2, %p9208_p7 }
 0x4ad   : > { %5841 = dma.done.wait (!%p5504_p5), %s5064_s19, 512  }
 0x4ae   : > { %5843 = vsyncadd (!%p5504_p5), %s5064_s19, 4294966784  ;;  %s9210_s16 = sld [smem:[#allocation12_spill]]  ;;  %p20_p11 = scmp.ge.s32.totalorder %s5945_s27, 4  }
 0x4af   : > { %s9211_s21 = smov %s5850_s22  ;;  %s9212_s22 = smov %s5854_s23 }
 0x4b0   : > { %s9214_s24 = smov %s5945_s27  ;;  %22 = sbr.rel (!%p20_p11) target bundleno = 6 (0x6), region = 100 }
 0x4b4   : > { %s9213_s23 = smov %s9210_s16 }
 0x4b7   :  { %5069 = vsyncpa [#allocation3], 1 }
 0x4b8   :  { %5071 = vsyncpa [#allocation3 + $0x1], 1 }
 0x4b9   :  { %5072 = vsyncpa [#allocation6], 1 }
 0x4ba   :  { %5073 = vsyncpa [#allocation4], 1 }
 0x4bb   :  { %5075 = vsyncpa [#allocation4 + $0x1], 1 }

</bundles_post_ra>
